<compile_context>
chip_gen: v7x
topology: tpu7x:2x2x1
jax: 0.10.0
libtpu: 0.0.40
codegen_flags: <defaults>
</compile_context>

<pallas_src>
import functools
import math

import jax
import jax.numpy as jnp
from jax.experimental import pallas as pl
from jax.experimental.pallas import tpu as pltpu


def _layer_norm(x, g, b, eps=1e-6):
    mu = jnp.mean(x, axis=-1, keepdims=True)
    var = jnp.mean((x - mu) ** 2, axis=-1, keepdims=True)
    return (x - mu) * jax.lax.rsqrt(var + eps) * g + b


def _gelu(x):
    # exact erf-based gelu, matching bertTransformer's gelu()
    return 0.5 * x * (1.0 + jax.lax.erf(x / math.sqrt(2.0)))


def encoder_layer_kernel(
    x_ref, mask_ref,
    ln1g_ref, ln1b_ref,
    wq_ref, bq_ref, wk_ref, bk_ref, wv_ref, bv_ref,
    wo_ref, bo_ref,
    ln2g_ref, ln2b_ref,
    w1_ref, b1_ref, w2_ref, b2_ref,
    out_ref,
    kT_scr, v_scr, ctx_scr,
    *, heads, q_tile, apply_input_ln):
    qi = pl.program_id(1)

    ln1g = ln1g_ref[...]
    ln1b = ln1b_ref[...]

    # ---- K / V over the full sequence: computed once per batch row (qi == 0).
    #      K is cached TRANSPOSED (D, S) bf16 so per-head slices are sublane-granular
    #      and the score matmul needs no transposed dot_general. ----
    @pl.when(qi == 0)
    def _():
        xf = x_ref[0]                                            # (S, D) f32
        xfn = _layer_norm(xf, ln1g, ln1b) if apply_input_ln else xf
        xfb = xfn.astype(jnp.bfloat16)
        k = jnp.dot(xfb, wk_ref[...], preferred_element_type=jnp.float32) + bk_ref[...]
        v = jnp.dot(xfb, wv_ref[...], preferred_element_type=jnp.float32) + bv_ref[...]
        kT_scr[...] = k.T.astype(jnp.bfloat16)                   # one-time transpose / row
        v_scr[...] = v.astype(jnp.bfloat16)

    TQ = q_tile
    q_start = pl.multiple_of(qi * TQ, TQ)
    # Query tile sliced from the resident full-row block (no second HBM stream).
    x_q = x_ref[0, pl.ds(q_start, TQ), :]                        # (TQ, D) f32

    xq_n = _layer_norm(x_q, ln1g, ln1b) if apply_input_ln else x_q
    xq_b = xq_n.astype(jnp.bfloat16)

    D = x_q.shape[-1]
    S = v_scr.shape[0]
    dh = D // heads

    # Q projection (f32 accumulate). 1/sqrt(d_head) is pre-folded into wq/bq.
    q = jnp.dot(xq_b, wq_ref[...], preferred_element_type=jnp.float32) + bq_ref[...]
    q_b = q.astype(jnp.bfloat16)                                 # (TQ, D)

    # Additive mask bias, hoisted out of the head loop (broadcast emitted once).
    masked = mask_ref[0] != 0                                    # (1, S) bool
    bias = jnp.broadcast_to(
        jnp.where(masked, jnp.float32(-1e18), jnp.float32(0.0)), (TQ, S))

    # ---- per-head attention (static unroll); heads write into a bf16 scratch slab ----
    for h in range(heads):
        lo = h * dh
        qh = q_b[:, lo:lo + dh]                                  # (TQ, dh) bf16
        kh = kT_scr[lo:lo + dh, :]                               # (dh, S)  bf16, sublane slice
        vh = v_scr[:, lo:lo + dh]                                # (S, dh)  bf16
        sc = jnp.dot(qh, kh, preferred_element_type=jnp.float32) + bias   # (TQ, S) f32
        m = jnp.max(sc, axis=-1, keepdims=True)
        e = jnp.exp(sc - m)
        p = e * pl.reciprocal(jnp.sum(e, axis=-1, keepdims=True), approx=True)
        ch = jnp.dot(p.astype(jnp.bfloat16), vh,
                     preferred_element_type=jnp.float32)         # (TQ, dh) f32
        ctx_scr[:, lo:lo + dh] = ch.astype(jnp.bfloat16)

    attn_out = jnp.dot(ctx_scr[...], wo_ref[...],
                       preferred_element_type=jnp.float32) + bo_ref[...]
    out = attn_out + x_q                                         # dropout == identity

    # ---- positionwise feed forward ----
    xn2 = _layer_norm(out, ln2g_ref[...], ln2b_ref[...])
    h1 = jnp.dot(xn2.astype(jnp.bfloat16), w1_ref[...],
                 preferred_element_type=jnp.float32) + b1_ref[...]
    inter = _gelu(h1)
    ff = jnp.dot(inter.astype(jnp.bfloat16), w2_ref[...],
                 preferred_element_type=jnp.float32) + b2_ref[...]
    out_ref[0] = (ff + out).astype(out_ref.dtype)


# ----------------------------------------------------------------------------
# Wrapper / launch configuration
# ----------------------------------------------------------------------------

def prepare_encoder_params(params, heads):
    """One-time parameter prep (do this at model init, not per layer call):
    cast matmul weights to bf16 (MXU native) and fold the 1/sqrt(d_head) query
    scale into wq / bq so the kernel does no per-tile scaling multiply."""
    D = params["wq"].shape[0]
    scale = 1.0 / math.sqrt(D // heads)
    bf = jnp.bfloat16
    p = dict(params)
    p["wq"] = (params["wq"].astype(jnp.float32) * scale).astype(bf)
    p["bq"] = params["bq"].astype(jnp.float32) * scale
    for name in ("wk", "wv", "wo", "w1", "w2"):
        p[name] = params[name].astype(bf)
    return p


def _tpu_vmem_capacity_bytes():
    try:
        return int(pltpu.get_tpu_info().vmem_capacity_bytes)
    except Exception:
        return 64 << 20          # conservative fallback (v7x per-TensorCore capacity)


def _pick_q_tile(S, vmem_bytes):
    # Bigger tiles amortize per-grid-step overhead; 128-MiB parts (v5e/v6e) can
    # afford TQ=512, 64-MiB parts (v7x) stay at 256.
    target = 512 if vmem_bytes >= (96 << 20) else 256
    if S <= target:
        return S
    for t in range(target, 7, -8):
        if S % t == 0:
            return t
    return S


def _vmem_limit_bytes(S, TQ, D, F, vmem_bytes):
    bf, f32 = 2, 4
    weights = (4 * D * D + 2 * D * F) * bf            # single-buffered bf16 weights
    biases = (9 * D + F) * f32
    x_in = 2 * S * D * f32 + 2 * S * 4                # double-buffered x row + mask
    out_b = 2 * TQ * D * f32
    scratch = (2 * S * D + TQ * D) * bf               # K^T / V / ctx scratch
    work = (2 * TQ * S + TQ * F + 6 * TQ * D) * f32   # scores, gelu slab, temps
    est = weights + biases + x_in + out_b + scratch + work + (4 << 20)
    cap = vmem_bytes - (12 << 20)                      # headroom for Mosaic internals
    return int(max(min(est, cap), 16 << 20))


def _build_encoder_call(B, S, D, F, TQ, heads, apply_input_ln,
                        single_buffer_weights, vmem_bytes):
    n_q = S // TQ

    def const_spec(shape):
        nd = len(shape)
        idx = lambda b, qi, _nd=nd: (0,) * _nd
        if single_buffer_weights:
            try:
                # Index-invariant operands: one resident VMEM buffer instead of two.
                return pl.BlockSpec(shape, idx, pipeline_mode=pl.Buffered(1))
            except TypeError:
                pass
        return pl.BlockSpec(shape, idx)

    in_specs = [
        pl.BlockSpec((1, S, D), lambda b, qi: (b, 0, 0)),    # x full row (query tiles sliced in-kernel)
        pl.BlockSpec((1, 1, S), lambda b, qi: (b, 0, 0)),    # mask
        const_spec((1, D)), const_spec((1, D)),              # ln1 gamma/beta
        const_spec((D, D)), const_spec((1, D)),              # wq, bq (scale folded)
        const_spec((D, D)), const_spec((1, D)),              # wk, bk
        const_spec((D, D)), const_spec((1, D)),              # wv, bv
        const_spec((D, D)), const_spec((1, D)),              # wo, bo
        const_spec((1, D)), const_spec((1, D)),              # ln2 gamma/beta
        const_spec((D, F)), const_spec((1, F)),              # w1, b1
        const_spec((F, D)), const_spec((1, D)),              # w2, b2
    ]

    flops = B * (8 * S * D * D + 4 * S * S * D + 4 * S * D * F)
    transcendentals = B * (heads * S * S + S * F)
    bytes_accessed = (2 * B * S * D * 4 + B * S * 4
                      + (4 * D * D + 2 * D * F) * 2 + (9 * D + F) * 4)

    kernel = functools.partial(
        encoder_layer_kernel, heads=heads, q_tile=TQ,
        apply_input_ln=apply_input_ln)

    return pl.pallas_call(
        kernel,
        out_shape=jax.ShapeDtypeStruct((B, S, D), jnp.float32),
        grid=(B, n_q),
        in_specs=in_specs,
        out_specs=pl.BlockSpec((1, TQ, D), lambda b, qi: (b, qi, 0)),
        scratch_shapes=[
            pltpu.VMEM((D, S), jnp.bfloat16),    # K cache (transposed)
            pltpu.VMEM((S, D), jnp.bfloat16),    # V cache
            pltpu.VMEM((TQ, D), jnp.bfloat16),   # per-tile multi-head context
        ],
        compiler_params=pltpu.CompilerParams(
            dimension_semantics=("parallel", "arbitrary"),
            vmem_limit_bytes=_vmem_limit_bytes(S, TQ, D, F, vmem_bytes)),
        cost_estimate=pl.CostEstimate(
            flops=flops, transcendentals=transcendentals,
            bytes_accessed=bytes_accessed),
    )


def transformer_encoder_layer(iter_, x, mask, params, heads, q_tile=None):
    """x: (B, S, D) f32, mask: (B, S) bool/int (True == masked / padding).
    `params` must come from prepare_encoder_params (bf16 weights, folded scale).
    `iter_` must be a static Python int (trace-time branch, as in the PyTorch code)."""
    B, S, D = x.shape
    F = params["w1"].shape[1]
    vmem_bytes = _tpu_vmem_capacity_bytes()
    TQ = q_tile if q_tile is not None else _pick_q_tile(S, vmem_bytes)
    assert S % TQ == 0

    mask_i = mask.astype(jnp.int32).reshape(B, 1, S)
    args = (x, mask_i,
            params["ln1g"], params["ln1b"],
            params["wq"], params["bq"], params["wk"], params["bk"],
            params["wv"], params["bv"], params["wo"], params["bo"],
            params["ln2g"], params["ln2b"],
            params["w1"], params["b1"], params["w2"], params["b2"])

    apply_input_ln = (iter_ != 0)
    try:
        call = _build_encoder_call(B, S, D, F, TQ, heads, apply_input_ln,
                                   single_buffer_weights=True,
                                   vmem_bytes=vmem_bytes)
        return call(*args)
    except Exception:
        # TODO(synk): pl.Buffered(1) pipeline_mode unsupported on this jax version;
        # fall back to default double-buffered weights (correctness identical).
        call = _build_encoder_call(B, S, D, F, TQ, heads, apply_input_ln,
                                   single_buffer_weights=False,
                                   vmem_bytes=vmem_bytes)
        return call(*args)


# ----------------------------------------------------------------------------
# Reference + self-test
# ----------------------------------------------------------------------------

def _reference(iter_, x, mask, params, heads):
    """Pure-JAX f32 reference mirroring the PyTorch forward (eval mode)."""
    B, S, D = x.shape
    dh = D // heads
    xn = _layer_norm(x, params["ln1g"], params["ln1b"]) if iter_ != 0 else x
    q = xn @ params["wq"] + params["bq"]
    k = xn @ params["wk"] + params["bk"]
    v = xn @ params["wv"] + params["bv"]

    def split(t):  # (B,S,D) -> (B,H,S,dh)
        return t.reshape(B, S, heads, dh).transpose(0, 2, 1, 3)

    q, k, v = split(q) / math.sqrt(dh), split(k), split(v)
    sc = jnp.einsum("bhqd,bhkd->bhqk", q, k)
    sc = jnp.where(mask[:, None, None, :], -1e18, sc)
    attn = jax.nn.softmax(sc, axis=-1)
    ctx = jnp.einsum("bhqk,bhkd->bhqd", attn, v).transpose(0, 2, 1, 3).reshape(B, S, D)
    out = ctx @ params["wo"] + params["bo"] + x
    yn = _layer_norm(out, params["ln2g"], params["ln2b"])
    inter = _gelu(yn @ params["w1"] + params["b1"])
    return inter @ params["w2"] + params["b2"] + out


if __name__ == "__main__":
    # Small but lane-aligned shapes: D multiple of 128, S multiple of 8.
    B, S, D, H, F = 2, 16, 128, 4, 256
    key = jax.random.PRNGKey(0)
    ks = jax.random.split(key, 12)
    s = 0.05

    params = dict(
        ln1g=jnp.ones((1, D), jnp.float32), ln1b=jnp.zeros((1, D), jnp.float32),
        wq=s * jax.random.normal(ks[0], (D, D), jnp.float32),
        bq=s * jax.random.normal(ks[1], (1, D), jnp.float32),
        wk=s * jax.random.normal(ks[2], (D, D), jnp.float32),
        bk=s * jax.random.normal(ks[3], (1, D), jnp.float32),
        wv=s * jax.random.normal(ks[4], (D, D), jnp.float32),
        bv=s * jax.random.normal(ks[5], (1, D), jnp.float32),
        wo=s * jax.random.normal(ks[6], (D, D), jnp.float32),
        bo=s * jax.random.normal(ks[7], (1, D), jnp.float32),
        ln2g=jnp.ones((1, D), jnp.float32), ln2b=jnp.zeros((1, D), jnp.float32),
        w1=s * jax.random.normal(ks[8], (D, F), jnp.float32),
        b1=s * jax.random.normal(ks[9], (1, F), jnp.float32),
        w2=s * jax.random.normal(ks[10], (F, D), jnp.float32),
        b2=s * jax.random.normal(ks[11], (1, D), jnp.float32),
    )

    x = jax.random.normal(jax.random.PRNGKey(42), (B, S, D), jnp.float32)
    lengths = jnp.array([S, 9])
    mask = jnp.arange(S)[None, :] >= lengths[:, None]   # (B, S) bool, True == padding

    it = 1  # non-zero -> apply input LayerNorm, as in the PyTorch forward
    prepared = prepare_encoder_params(params, H)         # one-time weight prep
    out = transformer_encoder_layer(it, x, mask, prepared, H)
    out = jax.block_until_ready(out)

    ref = _reference(it, x, mask, params, H)
    assert out.shape == (B, S, D)
    # bf16 MXU inputs + approx reciprocal -> loosened tolerance vs the f32 reference.
    assert jnp.allclose(out, ref, atol=5e-2, rtol=5e-2), (
        "mismatch vs JAX reference, max abs diff "
        f"{float(jnp.max(jnp.abs(out - ref))):.4e}")
    print("KERNEL_OK")
</pallas_src>

<mosaic_0001>
module attributes {stable_mosaic.version = 11 : i64} {
  func.func @encoder_layer_kernel(%arg0: i32, %arg1: i32, %arg2: memref<1x16x128xf32, #tpu.memory_space<vmem>>, %arg3: memref<1x1x16xi32, #tpu.memory_space<vmem>>, %arg4: memref<1x128xf32, #tpu.memory_space<vmem>>, %arg5: memref<1x128xf32, #tpu.memory_space<vmem>>, %arg6: memref<128x128xbf16, #tpu.memory_space<vmem>>, %arg7: memref<1x128xf32, #tpu.memory_space<vmem>>, %arg8: memref<128x128xbf16, #tpu.memory_space<vmem>>, %arg9: memref<1x128xf32, #tpu.memory_space<vmem>>, %arg10: memref<128x128xbf16, #tpu.memory_space<vmem>>, %arg11: memref<1x128xf32, #tpu.memory_space<vmem>>, %arg12: memref<128x128xbf16, #tpu.memory_space<vmem>>, %arg13: memref<1x128xf32, #tpu.memory_space<vmem>>, %arg14: memref<1x128xf32, #tpu.memory_space<vmem>>, %arg15: memref<1x128xf32, #tpu.memory_space<vmem>>, %arg16: memref<128x256xbf16, #tpu.memory_space<vmem>>, %arg17: memref<1x256xf32, #tpu.memory_space<vmem>>, %arg18: memref<256x128xbf16, #tpu.memory_space<vmem>>, %arg19: memref<1x128xf32, #tpu.memory_space<vmem>>, %arg20: memref<1x16x128xf32, #tpu.memory_space<vmem>>, %arg21: memref<128x16xbf16, #tpu.memory_space<vmem>>, %arg22: memref<16x128xbf16, #tpu.memory_space<vmem>>, %arg23: memref<16x128xbf16, #tpu.memory_space<vmem>>) attributes {dimension_semantics = [#tpu.dimension_semantics<parallel>, #tpu.dimension_semantics<arbitrary>], iteration_bounds = array<i64: 2, 1>, scalar_prefetch = 0 : i64, scratch_operands = 3 : i64, tpu.core_type = #tpu.core_type<tc>, window_params = [{transform_indices = @transform_0, window_bounds = array<i64: 1, 16, 128>}, {transform_indices = @transform_1, window_bounds = array<i64: 1, 1, 16>}, {pipeline_mode = #tpu.pipeline_mode<synchronous>, transform_indices = @transform_2, window_bounds = array<i64: 1, 128>}, {pipeline_mode = #tpu.pipeline_mode<synchronous>, transform_indices = @transform_3, window_bounds = array<i64: 1, 128>}, {pipeline_mode = #tpu.pipeline_mode<synchronous>, transform_indices = @transform_4, window_bounds = array<i64: 128, 128>}, {pipeline_mode = #tpu.pipeline_mode<synchronous>, transform_indices = @transform_5, window_bounds = array<i64: 1, 128>}, {pipeline_mode = #tpu.pipeline_mode<synchronous>, transform_indices = @transform_6, window_bounds = array<i64: 128, 128>}, {pipeline_mode = #tpu.pipeline_mode<synchronous>, transform_indices = @transform_7, window_bounds = array<i64: 1, 128>}, {pipeline_mode = #tpu.pipeline_mode<synchronous>, transform_indices = @transform_8, window_bounds = array<i64: 128, 128>}, {pipeline_mode = #tpu.pipeline_mode<synchronous>, transform_indices = @transform_9, window_bounds = array<i64: 1, 128>}, {pipeline_mode = #tpu.pipeline_mode<synchronous>, transform_indices = @transform_10, window_bounds = array<i64: 128, 128>}, {pipeline_mode = #tpu.pipeline_mode<synchronous>, transform_indices = @transform_11, window_bounds = array<i64: 1, 128>}, {pipeline_mode = #tpu.pipeline_mode<synchronous>, transform_indices = @transform_12, window_bounds = array<i64: 1, 128>}, {pipeline_mode = #tpu.pipeline_mode<synchronous>, transform_indices = @transform_13, window_bounds = array<i64: 1, 128>}, {pipeline_mode = #tpu.pipeline_mode<synchronous>, transform_indices = @transform_14, window_bounds = array<i64: 128, 256>}, {pipeline_mode = #tpu.pipeline_mode<synchronous>, transform_indices = @transform_15, window_bounds = array<i64: 1, 256>}, {pipeline_mode = #tpu.pipeline_mode<synchronous>, transform_indices = @transform_16, window_bounds = array<i64: 256, 128>}, {pipeline_mode = #tpu.pipeline_mode<synchronous>, transform_indices = @transform_17, window_bounds = array<i64: 1, 128>}, {transform_indices = @transform_18, window_bounds = array<i64: 1, 16, 128>}]} {
    %c0 = arith.constant 0 : index
    %c0_0 = arith.constant 0 : index
    %0 = vector.load %arg4[%c0, %c0_0] : memref<1x128xf32, #tpu.memory_space<vmem>>, vector<1x128xf32>
    %c0_1 = arith.constant 0 : index
    %c0_2 = arith.constant 0 : index
    %1 = vector.load %arg5[%c0_1, %c0_2] : memref<1x128xf32, #tpu.memory_space<vmem>>, vector<1x128xf32>
    %c0_i32 = arith.constant 0 : i32
    %2 = arith.cmpi eq, %arg1, %c0_i32 : i32
    %3 = arith.extui %2 : i1 to i32
    %c0_i32_3 = arith.constant 0 : i32
    %4 = arith.cmpi ne, %3, %c0_i32_3 : i32
    scf.if %4 {
      %c0_90 = arith.constant 0 : index
      %c0_91 = arith.constant 0 : index
      %c0_92 = arith.constant 0 : index
      %179 = vector.load %arg2[%c0_90, %c0_91, %c0_92] : memref<1x16x128xf32, #tpu.memory_space<vmem>>, vector<1x16x128xf32>
      %180 = vector.shape_cast %179 : vector<1x16x128xf32> to vector<16x128xf32>
      %cst_93 = arith.constant dense<0.000000e+00> : vector<16xf32>
      %181 = vector.multi_reduction <add>, %180, %cst_93 [1] : vector<16x128xf32> to vector<16xf32>
      %182 = vector.shape_cast %181 : vector<16xf32> to vector<16x1xf32>
      %cst_94 = arith.constant 1.280000e+02 : f32
      %183 = vector.broadcast %cst_94 : f32 to vector<16x1xf32>
      %184 = arith.divf %182, %183 : vector<16x1xf32>
      %185 = vector.broadcast %184 : vector<16x1xf32> to vector<16x128xf32>
      %186 = arith.subf %180, %185 : vector<16x128xf32>
      %187 = arith.mulf %186, %186 : vector<16x128xf32>
      %cst_95 = arith.constant dense<0.000000e+00> : vector<16xf32>
      %188 = vector.multi_reduction <add>, %187, %cst_95 [1] : vector<16x128xf32> to vector<16xf32>
      %189 = vector.shape_cast %188 : vector<16xf32> to vector<16x1xf32>
      %cst_96 = arith.constant 1.280000e+02 : f32
      %190 = vector.broadcast %cst_96 : f32 to vector<16x1xf32>
      %191 = arith.divf %189, %190 : vector<16x1xf32>
      %192 = vector.broadcast %184 : vector<16x1xf32> to vector<16x128xf32>
      %193 = arith.subf %180, %192 : vector<16x128xf32>
      %cst_97 = arith.constant 9.99999997E-7 : f32
      %194 = vector.broadcast %cst_97 : f32 to vector<16x1xf32>
      %195 = arith.addf %191, %194 : vector<16x1xf32>
      %196 = math.rsqrt %195 : vector<16x1xf32>
      %197 = vector.broadcast %196 : vector<16x1xf32> to vector<16x128xf32>
      %198 = arith.mulf %193, %197 : vector<16x128xf32>
      %199 = vector.broadcast %0 : vector<1x128xf32> to vector<16x128xf32>
      %200 = arith.mulf %198, %199 : vector<16x128xf32>
      %201 = vector.broadcast %1 : vector<1x128xf32> to vector<16x128xf32>
      %202 = arith.addf %200, %201 : vector<16x128xf32>
      %203 = arith.truncf %202 : vector<16x128xf32> to vector<16x128xbf16>
      %c0_98 = arith.constant 0 : index
      %c0_99 = arith.constant 0 : index
      %204 = vector.load %arg8[%c0_98, %c0_99] : memref<128x128xbf16, #tpu.memory_space<vmem>>, vector<128x128xbf16>
      %cst_100 = arith.constant dense<0.000000e+00> : vector<16x128xf32>
      %205 = tpu.matmul %203, %204, %cst_100 {dimension_numbers = #tpu.dot_dimension_numbers<[1], [0], [0], [1], [0, 0, 1, 1], [], []>} : vector<16x128xbf16>, vector<128x128xbf16>, vector<16x128xf32> -> vector<16x128xf32>
      %c0_101 = arith.constant 0 : index
      %c0_102 = arith.constant 0 : index
      %206 = vector.load %arg9[%c0_101, %c0_102] : memref<1x128xf32, #tpu.memory_space<vmem>>, vector<1x128xf32>
      %207 = vector.broadcast %206 : vector<1x128xf32> to vector<16x128xf32>
      %208 = arith.addf %205, %207 : vector<16x128xf32>
      %c0_103 = arith.constant 0 : index
      %c0_104 = arith.constant 0 : index
      %209 = vector.load %arg10[%c0_103, %c0_104] : memref<128x128xbf16, #tpu.memory_space<vmem>>, vector<128x128xbf16>
      %cst_105 = arith.constant dense<0.000000e+00> : vector<16x128xf32>
      %210 = tpu.matmul %203, %209, %cst_105 {dimension_numbers = #tpu.dot_dimension_numbers<[1], [0], [0], [1], [0, 0, 1, 1], [], []>} : vector<16x128xbf16>, vector<128x128xbf16>, vector<16x128xf32> -> vector<16x128xf32>
      %c0_106 = arith.constant 0 : index
      %c0_107 = arith.constant 0 : index
      %211 = vector.load %arg11[%c0_106, %c0_107] : memref<1x128xf32, #tpu.memory_space<vmem>>, vector<1x128xf32>
      %212 = vector.broadcast %211 : vector<1x128xf32> to vector<16x128xf32>
      %213 = arith.addf %210, %212 : vector<16x128xf32>
      %214 = tpu.transpose %208, [1, 0] : vector<16x128xf32> -> vector<128x16xf32>
      %215 = arith.truncf %214 : vector<128x16xf32> to vector<128x16xbf16>
      %c0_108 = arith.constant 0 : index
      %c0_109 = arith.constant 0 : index
      %216 = vector.load %arg21[%c0_108, %c0_109] : memref<128x16xbf16, #tpu.memory_space<vmem>>, vector<128x16xbf16>
      tpu.vector_store %arg21[%c0_108, %c0_109], %215 {strides = array<i32>} : memref<128x16xbf16, #tpu.memory_space<vmem>>, vector<128x16xbf16>,
      %217 = arith.truncf %213 : vector<16x128xf32> to vector<16x128xbf16>
      %c0_110 = arith.constant 0 : index
      %c0_111 = arith.constant 0 : index
      %218 = vector.load %arg22[%c0_110, %c0_111] : memref<16x128xbf16, #tpu.memory_space<vmem>>, vector<16x128xbf16>
      tpu.vector_store %arg22[%c0_110, %c0_111], %217 {strides = array<i32>} : memref<16x128xbf16, #tpu.memory_space<vmem>>, vector<16x128xbf16>,
    } else {
    }
    %c16_i32 = arith.constant 16 : i32
    %5 = arith.muli %arg1, %c16_i32 : i32
    %6 = tpu.assume_multiple %5, 16 : i32
    %c0_4 = arith.constant 0 : index
    %7 = arith.index_cast %6 : i32 to index
    %c0_5 = arith.constant 0 : index
    %8 = vector.load %arg2[%c0_4, %7, %c0_5] : memref<1x16x128xf32, #tpu.memory_space<vmem>>, vector<1x16x128xf32>
    %9 = vector.shape_cast %8 : vector<1x16x128xf32> to vector<16x128xf32>
    %cst = arith.constant dense<0.000000e+00> : vector<16xf32>
    %10 = vector.multi_reduction <add>, %9, %cst [1] : vector<16x128xf32> to vector<16xf32>
    %11 = vector.shape_cast %10 : vector<16xf32> to vector<16x1xf32>
    %cst_6 = arith.constant 1.280000e+02 : f32
    %12 = vector.broadcast %cst_6 : f32 to vector<16x1xf32>
    %13 = arith.divf %11, %12 : vector<16x1xf32>
    %14 = vector.broadcast %13 : vector<16x1xf32> to vector<16x128xf32>
    %15 = arith.subf %9, %14 : vector<16x128xf32>
    %16 = arith.mulf %15, %15 : vector<16x128xf32>
    %cst_7 = arith.constant dense<0.000000e+00> : vector<16xf32>
    %17 = vector.multi_reduction <add>, %16, %cst_7 [1] : vector<16x128xf32> to vector<16xf32>
    %18 = vector.shape_cast %17 : vector<16xf32> to vector<16x1xf32>
    %cst_8 = arith.constant 1.280000e+02 : f32
    %19 = vector.broadcast %cst_8 : f32 to vector<16x1xf32>
    %20 = arith.divf %18, %19 : vector<16x1xf32>
    %21 = vector.broadcast %13 : vector<16x1xf32> to vector<16x128xf32>
    %22 = arith.subf %9, %21 : vector<16x128xf32>
    %cst_9 = arith.constant 9.99999997E-7 : f32
    %23 = vector.broadcast %cst_9 : f32 to vector<16x1xf32>
    %24 = arith.addf %20, %23 : vector<16x1xf32>
    %25 = math.rsqrt %24 : vector<16x1xf32>
    %26 = vector.broadcast %25 : vector<16x1xf32> to vector<16x128xf32>
    %27 = arith.mulf %22, %26 : vector<16x128xf32>
    %28 = vector.broadcast %0 : vector<1x128xf32> to vector<16x128xf32>
    %29 = arith.mulf %27, %28 : vector<16x128xf32>
    %30 = vector.broadcast %1 : vector<1x128xf32> to vector<16x128xf32>
    %31 = arith.addf %29, %30 : vector<16x128xf32>
    %32 = arith.truncf %31 : vector<16x128xf32> to vector<16x128xbf16>
    %c0_10 = arith.constant 0 : index
    %c0_11 = arith.constant 0 : index
    %33 = vector.load %arg6[%c0_10, %c0_11] : memref<128x128xbf16, #tpu.memory_space<vmem>>, vector<128x128xbf16>
    %cst_12 = arith.constant dense<0.000000e+00> : vector<16x128xf32>
    %34 = tpu.matmul %32, %33, %cst_12 {dimension_numbers = #tpu.dot_dimension_numbers<[1], [0], [0], [1], [0, 0, 1, 1], [], []>} : vector<16x128xbf16>, vector<128x128xbf16>, vector<16x128xf32> -> vector<16x128xf32>
    %c0_13 = arith.constant 0 : index
    %c0_14 = arith.constant 0 : index
    %35 = vector.load %arg7[%c0_13, %c0_14] : memref<1x128xf32, #tpu.memory_space<vmem>>, vector<1x128xf32>
    %36 = vector.broadcast %35 : vector<1x128xf32> to vector<16x128xf32>
    %37 = arith.addf %34, %36 : vector<16x128xf32>
    %38 = arith.truncf %37 : vector<16x128xf32> to vector<16x128xbf16>
    %c0_15 = arith.constant 0 : index
    %c0_16 = arith.constant 0 : index
    %c0_17 = arith.constant 0 : index
    %39 = vector.load %arg3[%c0_15, %c0_16, %c0_17] : memref<1x1x16xi32, #tpu.memory_space<vmem>>, vector<1x1x16xi32>
    %40 = vector.shape_cast %39 : vector<1x1x16xi32> to vector<1x16xi32>
    %c0_i32_18 = arith.constant 0 : i32
    %41 = vector.broadcast %c0_i32_18 : i32 to vector<1x16xi32>
    %42 = arith.cmpi ne, %40, %41 : vector<1x16xi32>
    %cst_19 = arith.constant -9.99999984E+17 : f32
    %cst_20 = arith.constant 0.000000e+00 : f32
    %43 = vector.broadcast %cst_19 : f32 to vector<1x16xf32>
    %44 = vector.broadcast %cst_20 : f32 to vector<1x16xf32>
    %45 = arith.select %42, %43, %44 : vector<1x16xi1>, vector<1x16xf32>
    %46 = vector.shape_cast %45 : vector<1x16xf32> to vector<1x16xf32>
    %47 = vector.broadcast %46 : vector<1x16xf32> to vector<16x16xf32>
    %48 = vector.extract_strided_slice %38 {offsets = [0, 0], sizes = [16, 32], strides = [1, 1]} : vector<16x128xbf16> to vector<16x32xbf16>
    %c0_21 = arith.constant 0 : index
    %c0_22 = arith.constant 0 : index
    %49 = vector.load %arg21[%c0_21, %c0_22] : memref<128x16xbf16, #tpu.memory_space<vmem>>, vector<32x16xbf16>
    %c0_23 = arith.constant 0 : index
    %c0_24 = arith.constant 0 : index
    %50 = vector.load %arg22[%c0_23, %c0_24] : memref<16x128xbf16, #tpu.memory_space<vmem>>, vector<16x32xbf16>
    %cst_25 = arith.constant dense<0.000000e+00> : vector<16x16xf32>
    %51 = tpu.matmul %48, %49, %cst_25 {dimension_numbers = #tpu.dot_dimension_numbers<[1], [0], [0], [1], [0, 0, 1, 1], [], []>} : vector<16x32xbf16>, vector<32x16xbf16>, vector<16x16xf32> -> vector<16x16xf32>
    %52 = arith.addf %51, %47 : vector<16x16xf32>
    %cst_26 = arith.constant dense<0xFF800000> : vector<16xf32>
    %53 = vector.multi_reduction <maximumf>, %52, %cst_26 [1] : vector<16x16xf32> to vector<16xf32>
    %54 = vector.shape_cast %53 : vector<16xf32> to vector<16x1xf32>
    %55 = vector.broadcast %54 : vector<16x1xf32> to vector<16x16xf32>
    %56 = arith.subf %52, %55 : vector<16x16xf32>
    %57 = math.exp %56 : vector<16x16xf32>
    %cst_27 = arith.constant dense<0.000000e+00> : vector<16xf32>
    %58 = vector.multi_reduction <add>, %57, %cst_27 [1] : vector<16x16xf32> to vector<16xf32>
    %59 = vector.shape_cast %58 : vector<16xf32> to vector<16x1xf32>
    %60 = tpu.reciprocal %59 {approx = true} : vector<16x1xf32> -> vector<16x1xf32>
    %61 = vector.broadcast %60 : vector<16x1xf32> to vector<16x16xf32>
    %62 = arith.mulf %57, %61 : vector<16x16xf32>
    %63 = arith.truncf %62 : vector<16x16xf32> to vector<16x16xbf16>
    %cst_28 = arith.constant dense<0.000000e+00> : vector<16x32xf32>
    %64 = tpu.matmul %63, %50, %cst_28 {dimension_numbers = #tpu.dot_dimension_numbers<[1], [0], [0], [1], [0, 0, 1, 1], [], []>} : vector<16x16xbf16>, vector<16x32xbf16>, vector<16x32xf32> -> vector<16x32xf32>
    %65 = arith.truncf %64 : vector<16x32xf32> to vector<16x32xbf16>
    %c0_29 = arith.constant 0 : index
    %c0_30 = arith.constant 0 : index
    %66 = vector.load %arg23[%c0_29, %c0_30] : memref<16x128xbf16, #tpu.memory_space<vmem>>, vector<16x32xbf16>
    tpu.vector_store %arg23[%c0_29, %c0_30], %65 {strides = array<i32>} : memref<16x128xbf16, #tpu.memory_space<vmem>>, vector<16x32xbf16>,
    %67 = vector.extract_strided_slice %38 {offsets = [0, 32], sizes = [16, 32], strides = [1, 1]} : vector<16x128xbf16> to vector<16x32xbf16>
    %c32 = arith.constant 32 : index
    %c0_31 = arith.constant 0 : index
    %68 = vector.load %arg21[%c32, %c0_31] : memref<128x16xbf16, #tpu.memory_space<vmem>>, vector<32x16xbf16>
    %c0_32 = arith.constant 0 : index
    %c32_33 = arith.constant 32 : index
    %69 = vector.load %arg22[%c0_32, %c32_33] : memref<16x128xbf16, #tpu.memory_space<vmem>>, vector<16x32xbf16>
    %cst_34 = arith.constant dense<0.000000e+00> : vector<16x16xf32>
    %70 = tpu.matmul %67, %68, %cst_34 {dimension_numbers = #tpu.dot_dimension_numbers<[1], [0], [0], [1], [0, 0, 1, 1], [], []>} : vector<16x32xbf16>, vector<32x16xbf16>, vector<16x16xf32> -> vector<16x16xf32>
    %71 = arith.addf %70, %47 : vector<16x16xf32>
    %cst_35 = arith.constant dense<0xFF800000> : vector<16xf32>
    %72 = vector.multi_reduction <maximumf>, %71, %cst_35 [1] : vector<16x16xf32> to vector<16xf32>
    %73 = vector.shape_cast %72 : vector<16xf32> to vector<16x1xf32>
    %74 = vector.broadcast %73 : vector<16x1xf32> to vector<16x16xf32>
    %75 = arith.subf %71, %74 : vector<16x16xf32>
    %76 = math.exp %75 : vector<16x16xf32>
    %cst_36 = arith.constant dense<0.000000e+00> : vector<16xf32>
    %77 = vector.multi_reduction <add>, %76, %cst_36 [1] : vector<16x16xf32> to vector<16xf32>
    %78 = vector.shape_cast %77 : vector<16xf32> to vector<16x1xf32>
    %79 = tpu.reciprocal %78 {approx = true} : vector<16x1xf32> -> vector<16x1xf32>
    %80 = vector.broadcast %79 : vector<16x1xf32> to vector<16x16xf32>
    %81 = arith.mulf %76, %80 : vector<16x16xf32>
    %82 = arith.truncf %81 : vector<16x16xf32> to vector<16x16xbf16>
    %cst_37 = arith.constant dense<0.000000e+00> : vector<16x32xf32>
    %83 = tpu.matmul %82, %69, %cst_37 {dimension_numbers = #tpu.dot_dimension_numbers<[1], [0], [0], [1], [0, 0, 1, 1], [], []>} : vector<16x16xbf16>, vector<16x32xbf16>, vector<16x32xf32> -> vector<16x32xf32>
    %84 = arith.truncf %83 : vector<16x32xf32> to vector<16x32xbf16>
    %c0_38 = arith.constant 0 : index
    %c32_39 = arith.constant 32 : index
    %85 = vector.load %arg23[%c0_38, %c32_39] : memref<16x128xbf16, #tpu.memory_space<vmem>>, vector<16x32xbf16>
    tpu.vector_store %arg23[%c0_38, %c32_39], %84 {strides = array<i32>} : memref<16x128xbf16, #tpu.memory_space<vmem>>, vector<16x32xbf16>,
    %86 = vector.extract_strided_slice %38 {offsets = [0, 64], sizes = [16, 32], strides = [1, 1]} : vector<16x128xbf16> to vector<16x32xbf16>
    %c64 = arith.constant 64 : index
    %c0_40 = arith.constant 0 : index
    %87 = vector.load %arg21[%c64, %c0_40] : memref<128x16xbf16, #tpu.memory_space<vmem>>, vector<32x16xbf16>
    %c0_41 = arith.constant 0 : index
    %c64_42 = arith.constant 64 : index
    %88 = vector.load %arg22[%c0_41, %c64_42] : memref<16x128xbf16, #tpu.memory_space<vmem>>, vector<16x32xbf16>
    %cst_43 = arith.constant dense<0.000000e+00> : vector<16x16xf32>
    %89 = tpu.matmul %86, %87, %cst_43 {dimension_numbers = #tpu.dot_dimension_numbers<[1], [0], [0], [1], [0, 0, 1, 1], [], []>} : vector<16x32xbf16>, vector<32x16xbf16>, vector<16x16xf32> -> vector<16x16xf32>
    %90 = arith.addf %89, %47 : vector<16x16xf32>
    %cst_44 = arith.constant dense<0xFF800000> : vector<16xf32>
    %91 = vector.multi_reduction <maximumf>, %90, %cst_44 [1] : vector<16x16xf32> to vector<16xf32>
    %92 = vector.shape_cast %91 : vector<16xf32> to vector<16x1xf32>
    %93 = vector.broadcast %92 : vector<16x1xf32> to vector<16x16xf32>
    %94 = arith.subf %90, %93 : vector<16x16xf32>
    %95 = math.exp %94 : vector<16x16xf32>
    %cst_45 = arith.constant dense<0.000000e+00> : vector<16xf32>
    %96 = vector.multi_reduction <add>, %95, %cst_45 [1] : vector<16x16xf32> to vector<16xf32>
    %97 = vector.shape_cast %96 : vector<16xf32> to vector<16x1xf32>
    %98 = tpu.reciprocal %97 {approx = true} : vector<16x1xf32> -> vector<16x1xf32>
    %99 = vector.broadcast %98 : vector<16x1xf32> to vector<16x16xf32>
    %100 = arith.mulf %95, %99 : vector<16x16xf32>
    %101 = arith.truncf %100 : vector<16x16xf32> to vector<16x16xbf16>
    %cst_46 = arith.constant dense<0.000000e+00> : vector<16x32xf32>
    %102 = tpu.matmul %101, %88, %cst_46 {dimension_numbers = #tpu.dot_dimension_numbers<[1], [0], [0], [1], [0, 0, 1, 1], [], []>} : vector<16x16xbf16>, vector<16x32xbf16>, vector<16x32xf32> -> vector<16x32xf32>
    %103 = arith.truncf %102 : vector<16x32xf32> to vector<16x32xbf16>
    %c0_47 = arith.constant 0 : index
    %c64_48 = arith.constant 64 : index
    %104 = vector.load %arg23[%c0_47, %c64_48] : memref<16x128xbf16, #tpu.memory_space<vmem>>, vector<16x32xbf16>
    tpu.vector_store %arg23[%c0_47, %c64_48], %103 {strides = array<i32>} : memref<16x128xbf16, #tpu.memory_space<vmem>>, vector<16x32xbf16>,
    %105 = vector.extract_strided_slice %38 {offsets = [0, 96], sizes = [16, 32], strides = [1, 1]} : vector<16x128xbf16> to vector<16x32xbf16>
    %c96 = arith.constant 96 : index
    %c0_49 = arith.constant 0 : index
    %106 = vector.load %arg21[%c96, %c0_49] : memref<128x16xbf16, #tpu.memory_space<vmem>>, vector<32x16xbf16>
    %c0_50 = arith.constant 0 : index
    %c96_51 = arith.constant 96 : index
    %107 = vector.load %arg22[%c0_50, %c96_51] : memref<16x128xbf16, #tpu.memory_space<vmem>>, vector<16x32xbf16>
    %cst_52 = arith.constant dense<0.000000e+00> : vector<16x16xf32>
    %108 = tpu.matmul %105, %106, %cst_52 {dimension_numbers = #tpu.dot_dimension_numbers<[1], [0], [0], [1], [0, 0, 1, 1], [], []>} : vector<16x32xbf16>, vector<32x16xbf16>, vector<16x16xf32> -> vector<16x16xf32>
    %109 = arith.addf %108, %47 : vector<16x16xf32>
    %cst_53 = arith.constant dense<0xFF800000> : vector<16xf32>
    %110 = vector.multi_reduction <maximumf>, %109, %cst_53 [1] : vector<16x16xf32> to vector<16xf32>
    %111 = vector.shape_cast %110 : vector<16xf32> to vector<16x1xf32>
    %112 = vector.broadcast %111 : vector<16x1xf32> to vector<16x16xf32>
    %113 = arith.subf %109, %112 : vector<16x16xf32>
    %114 = math.exp %113 : vector<16x16xf32>
    %cst_54 = arith.constant dense<0.000000e+00> : vector<16xf32>
    %115 = vector.multi_reduction <add>, %114, %cst_54 [1] : vector<16x16xf32> to vector<16xf32>
    %116 = vector.shape_cast %115 : vector<16xf32> to vector<16x1xf32>
    %117 = tpu.reciprocal %116 {approx = true} : vector<16x1xf32> -> vector<16x1xf32>
    %118 = vector.broadcast %117 : vector<16x1xf32> to vector<16x16xf32>
    %119 = arith.mulf %114, %118 : vector<16x16xf32>
    %120 = arith.truncf %119 : vector<16x16xf32> to vector<16x16xbf16>
    %cst_55 = arith.constant dense<0.000000e+00> : vector<16x32xf32>
    %121 = tpu.matmul %120, %107, %cst_55 {dimension_numbers = #tpu.dot_dimension_numbers<[1], [0], [0], [1], [0, 0, 1, 1], [], []>} : vector<16x16xbf16>, vector<16x32xbf16>, vector<16x32xf32> -> vector<16x32xf32>
    %122 = arith.truncf %121 : vector<16x32xf32> to vector<16x32xbf16>
    %c0_56 = arith.constant 0 : index
    %c96_57 = arith.constant 96 : index
    %123 = vector.load %arg23[%c0_56, %c96_57] : memref<16x128xbf16, #tpu.memory_space<vmem>>, vector<16x32xbf16>
    tpu.vector_store %arg23[%c0_56, %c96_57], %122 {strides = array<i32>} : memref<16x128xbf16, #tpu.memory_space<vmem>>, vector<16x32xbf16>,
    %c0_58 = arith.constant 0 : index
    %c0_59 = arith.constant 0 : index
    %124 = vector.load %arg23[%c0_58, %c0_59] : memref<16x128xbf16, #tpu.memory_space<vmem>>, vector<16x128xbf16>
    %c0_60 = arith.constant 0 : index
    %c0_61 = arith.constant 0 : index
    %125 = vector.load %arg12[%c0_60, %c0_61] : memref<128x128xbf16, #tpu.memory_space<vmem>>, vector<128x128xbf16>
    %cst_62 = arith.constant dense<0.000000e+00> : vector<16x128xf32>
    %126 = tpu.matmul %124, %125, %cst_62 {dimension_numbers = #tpu.dot_dimension_numbers<[1], [0], [0], [1], [0, 0, 1, 1], [], []>} : vector<16x128xbf16>, vector<128x128xbf16>, vector<16x128xf32> -> vector<16x128xf32>
    %c0_63 = arith.constant 0 : index
    %c0_64 = arith.constant 0 : index
    %127 = vector.load %arg13[%c0_63, %c0_64] : memref<1x128xf32, #tpu.memory_space<vmem>>, vector<1x128xf32>
    %128 = vector.broadcast %127 : vector<1x128xf32> to vector<16x128xf32>
    %129 = arith.addf %126, %128 : vector<16x128xf32>
    %130 = arith.addf %129, %9 : vector<16x128xf32>
    %c0_65 = arith.constant 0 : index
    %c0_66 = arith.constant 0 : index
    %131 = vector.load %arg14[%c0_65, %c0_66] : memref<1x128xf32, #tpu.memory_space<vmem>>, vector<1x128xf32>
    %c0_67 = arith.constant 0 : index
    %c0_68 = arith.constant 0 : index
    %132 = vector.load %arg15[%c0_67, %c0_68] : memref<1x128xf32, #tpu.memory_space<vmem>>, vector<1x128xf32>
    %cst_69 = arith.constant dense<0.000000e+00> : vector<16xf32>
    %133 = vector.multi_reduction <add>, %130, %cst_69 [1] : vector<16x128xf32> to vector<16xf32>
    %134 = vector.shape_cast %133 : vector<16xf32> to vector<16x1xf32>
    %cst_70 = arith.constant 1.280000e+02 : f32
    %135 = vector.broadcast %cst_70 : f32 to vector<16x1xf32>
    %136 = arith.divf %134, %135 : vector<16x1xf32>
    %137 = vector.broadcast %136 : vector<16x1xf32> to vector<16x128xf32>
    %138 = arith.subf %130, %137 : vector<16x128xf32>
    %139 = arith.mulf %138, %138 : vector<16x128xf32>
    %cst_71 = arith.constant dense<0.000000e+00> : vector<16xf32>
    %140 = vector.multi_reduction <add>, %139, %cst_71 [1] : vector<16x128xf32> to vector<16xf32>
    %141 = vector.shape_cast %140 : vector<16xf32> to vector<16x1xf32>
    %cst_72 = arith.constant 1.280000e+02 : f32
    %142 = vector.broadcast %cst_72 : f32 to vector<16x1xf32>
    %143 = arith.divf %141, %142 : vector<16x1xf32>
    %144 = vector.broadcast %136 : vector<16x1xf32> to vector<16x128xf32>
    %145 = arith.subf %130, %144 : vector<16x128xf32>
    %cst_73 = arith.constant 9.99999997E-7 : f32
    %146 = vector.broadcast %cst_73 : f32 to vector<16x1xf32>
    %147 = arith.addf %143, %146 : vector<16x1xf32>
    %148 = math.rsqrt %147 : vector<16x1xf32>
    %149 = vector.broadcast %148 : vector<16x1xf32> to vector<16x128xf32>
    %150 = arith.mulf %145, %149 : vector<16x128xf32>
    %151 = vector.broadcast %131 : vector<1x128xf32> to vector<16x128xf32>
    %152 = arith.mulf %150, %151 : vector<16x128xf32>
    %153 = vector.broadcast %132 : vector<1x128xf32> to vector<16x128xf32>
    %154 = arith.addf %152, %153 : vector<16x128xf32>
    %155 = arith.truncf %154 : vector<16x128xf32> to vector<16x128xbf16>
    %c0_74 = arith.constant 0 : index
    %c0_75 = arith.constant 0 : index
    %156 = vector.load %arg16[%c0_74, %c0_75] : memref<128x256xbf16, #tpu.memory_space<vmem>>, vector<128x256xbf16>
    %cst_76 = arith.constant dense<0.000000e+00> : vector<16x256xf32>
    %157 = tpu.matmul %155, %156, %cst_76 {dimension_numbers = #tpu.dot_dimension_numbers<[1], [0], [0], [1], [0, 0, 1, 1], [], []>} : vector<16x128xbf16>, vector<128x256xbf16>, vector<16x256xf32> -> vector<16x256xf32>
    %c0_77 = arith.constant 0 : index
    %c0_78 = arith.constant 0 : index
    %158 = vector.load %arg17[%c0_77, %c0_78] : memref<1x256xf32, #tpu.memory_space<vmem>>, vector<1x256xf32>
    %159 = vector.broadcast %158 : vector<1x256xf32> to vector<16x256xf32>
    %160 = arith.addf %157, %159 : vector<16x256xf32>
    %cst_79 = arith.constant 5.000000e-01 : f32
    %161 = vector.broadcast %cst_79 : f32 to vector<16x256xf32>
    %162 = arith.mulf %161, %160 : vector<16x256xf32>
    %cst_80 = arith.constant 1.41421354 : f32
    %163 = vector.broadcast %cst_80 : f32 to vector<16x256xf32>
    %164 = arith.divf %160, %163 : vector<16x256xf32>
    %165 = math.erf %164 : vector<16x256xf32>
    %cst_81 = arith.constant 1.000000e+00 : f32
    %166 = vector.broadcast %cst_81 : f32 to vector<16x256xf32>
    %167 = arith.addf %166, %165 : vector<16x256xf32>
    %168 = arith.mulf %162, %167 : vector<16x256xf32>
    %169 = arith.truncf %168 : vector<16x256xf32> to vector<16x256xbf16>
    %c0_82 = arith.constant 0 : index
    %c0_83 = arith.constant 0 : index
    %170 = vector.load %arg18[%c0_82, %c0_83] : memref<256x128xbf16, #tpu.memory_space<vmem>>, vector<256x128xbf16>
    %cst_84 = arith.constant dense<0.000000e+00> : vector<16x128xf32>
    %171 = tpu.matmul %169, %170, %cst_84 {dimension_numbers = #tpu.dot_dimension_numbers<[1], [0], [0], [1], [0, 0, 1, 1], [], []>} : vector<16x256xbf16>, vector<256x128xbf16>, vector<16x128xf32> -> vector<16x128xf32>
    %c0_85 = arith.constant 0 : index
    %c0_86 = arith.constant 0 : index
    %172 = vector.load %arg19[%c0_85, %c0_86] : memref<1x128xf32, #tpu.memory_space<vmem>>, vector<1x128xf32>
    %173 = vector.broadcast %172 : vector<1x128xf32> to vector<16x128xf32>
    %174 = arith.addf %171, %173 : vector<16x128xf32>
    %175 = arith.addf %174, %130 : vector<16x128xf32>
    %c0_87 = arith.constant 0 : index
    %c0_88 = arith.constant 0 : index
    %c0_89 = arith.constant 0 : index
    %176 = vector.load %arg20[%c0_87, %c0_88, %c0_89] : memref<1x16x128xf32, #tpu.memory_space<vmem>>, vector<1x16x128xf32>
    %177 = vector.shape_cast %176 : vector<1x16x128xf32> to vector<16x128xf32>
    %178 = vector.shape_cast %175 : vector<16x128xf32> to vector<1x16x128xf32>
    tpu.vector_store %arg20[%c0_87, %c0_88, %c0_89], %178 {strides = array<i32>} : memref<1x16x128xf32, #tpu.memory_space<vmem>>, vector<1x16x128xf32>,
    return
  }
  func.func @transform_0(%arg0: i32, %arg1: i32) -> (i32, i32, i32) {
    %c0_i32 = arith.constant 0 : i32
    %c0_i32_0 = arith.constant 0 : i32
    %c0_i32_1 = arith.constant 0 : i32
    return %arg0, %c0_i32, %c0_i32_0 : i32, i32, i32
  }
  func.func @transform_1(%arg0: i32, %arg1: i32) -> (i32, i32, i32) {
    %c0_i32 = arith.constant 0 : i32
    %c0_i32_0 = arith.constant 0 : i32
    %c0_i32_1 = arith.constant 0 : i32
    return %arg0, %c0_i32, %c0_i32_0 : i32, i32, i32
  }
  func.func @transform_2(%arg0: i32, %arg1: i32) -> (i32, i32) {
    %c0_i32 = arith.constant 0 : i32
    %c0_i32_0 = arith.constant 0 : i32
    %c0_i32_1 = arith.constant 0 : i32
    return %c0_i32, %c0_i32_0 : i32, i32
  }
  func.func @transform_3(%arg0: i32, %arg1: i32) -> (i32, i32) {
    %c0_i32 = arith.constant 0 : i32
    %c0_i32_0 = arith.constant 0 : i32
    %c0_i32_1 = arith.constant 0 : i32
    return %c0_i32, %c0_i32_0 : i32, i32
  }
  func.func @transform_4(%arg0: i32, %arg1: i32) -> (i32, i32) {
    %c0_i32 = arith.constant 0 : i32
    %c0_i32_0 = arith.constant 0 : i32
    %c0_i32_1 = arith.constant 0 : i32
    return %c0_i32, %c0_i32_0 : i32, i32
  }
  func.func @transform_5(%arg0: i32, %arg1: i32) -> (i32, i32) {
    %c0_i32 = arith.constant 0 : i32
    %c0_i32_0 = arith.constant 0 : i32
    %c0_i32_1 = arith.constant 0 : i32
    return %c0_i32, %c0_i32_0 : i32, i32
  }
  func.func @transform_6(%arg0: i32, %arg1: i32) -> (i32, i32) {
    %c0_i32 = arith.constant 0 : i32
    %c0_i32_0 = arith.constant 0 : i32
    %c0_i32_1 = arith.constant 0 : i32
    return %c0_i32, %c0_i32_0 : i32, i32
  }
  func.func @transform_7(%arg0: i32, %arg1: i32) -> (i32, i32) {
    %c0_i32 = arith.constant 0 : i32
    %c0_i32_0 = arith.constant 0 : i32
    %c0_i32_1 = arith.constant 0 : i32
    return %c0_i32, %c0_i32_0 : i32, i32
  }
  func.func @transform_8(%arg0: i32, %arg1: i32) -> (i32, i32) {
    %c0_i32 = arith.constant 0 : i32
    %c0_i32_0 = arith.constant 0 : i32
    %c0_i32_1 = arith.constant 0 : i32
    return %c0_i32, %c0_i32_0 : i32, i32
  }
  func.func @transform_9(%arg0: i32, %arg1: i32) -> (i32, i32) {
    %c0_i32 = arith.constant 0 : i32
    %c0_i32_0 = arith.constant 0 : i32
    %c0_i32_1 = arith.constant 0 : i32
    return %c0_i32, %c0_i32_0 : i32, i32
  }
  func.func @transform_10(%arg0: i32, %arg1: i32) -> (i32, i32) {
    %c0_i32 = arith.constant 0 : i32
    %c0_i32_0 = arith.constant 0 : i32
    %c0_i32_1 = arith.constant 0 : i32
    return %c0_i32, %c0_i32_0 : i32, i32
  }
  func.func @transform_11(%arg0: i32, %arg1: i32) -> (i32, i32) {
    %c0_i32 = arith.constant 0 : i32
    %c0_i32_0 = arith.constant 0 : i32
    %c0_i32_1 = arith.constant 0 : i32
    return %c0_i32, %c0_i32_0 : i32, i32
  }
  func.func @transform_12(%arg0: i32, %arg1: i32) -> (i32, i32) {
    %c0_i32 = arith.constant 0 : i32
    %c0_i32_0 = arith.constant 0 : i32
    %c0_i32_1 = arith.constant 0 : i32
    return %c0_i32, %c0_i32_0 : i32, i32
  }
  func.func @transform_13(%arg0: i32, %arg1: i32) -> (i32, i32) {
    %c0_i32 = arith.constant 0 : i32
    %c0_i32_0 = arith.constant 0 : i32
    %c0_i32_1 = arith.constant 0 : i32
    return %c0_i32, %c0_i32_0 : i32, i32
  }
  func.func @transform_14(%arg0: i32, %arg1: i32) -> (i32, i32) {
    %c0_i32 = arith.constant 0 : i32
    %c0_i32_0 = arith.constant 0 : i32
    %c0_i32_1 = arith.constant 0 : i32
    return %c0_i32, %c0_i32_0 : i32, i32
  }
  func.func @transform_15(%arg0: i32, %arg1: i32) -> (i32, i32) {
    %c0_i32 = arith.constant 0 : i32
    %c0_i32_0 = arith.constant 0 : i32
    %c0_i32_1 = arith.constant 0 : i32
    return %c0_i32, %c0_i32_0 : i32, i32
  }
  func.func @transform_16(%arg0: i32, %arg1: i32) -> (i32, i32) {
    %c0_i32 = arith.constant 0 : i32
    %c0_i32_0 = arith.constant 0 : i32
    %c0_i32_1 = arith.constant 0 : i32
    return %c0_i32, %c0_i32_0 : i32, i32
  }
  func.func @transform_17(%arg0: i32, %arg1: i32) -> (i32, i32) {
    %c0_i32 = arith.constant 0 : i32
    %c0_i32_0 = arith.constant 0 : i32
    %c0_i32_1 = arith.constant 0 : i32
    return %c0_i32, %c0_i32_0 : i32, i32
  }
  func.func @transform_18(%arg0: i32, %arg1: i32) -> (i32, i32, i32) {
    %c0_i32 = arith.constant 0 : i32
    %c0_i32_0 = arith.constant 0 : i32
    return %arg0, %arg1, %c0_i32 : i32, i32, i32
  }
}

module attributes {stable_mosaic.version = 11 : i64} {
  func.func @encoder_layer_kernel(%arg0: i32, %arg1: i32, %arg2: memref<1x16x128xf32, #tpu.memory_space<vmem>>, %arg3: memref<1x1x16xi32, #tpu.memory_space<vmem>>, %arg4: memref<1x128xf32, #tpu.memory_space<vmem>>, %arg5: memref<1x128xf32, #tpu.memory_space<vmem>>, %arg6: memref<128x128xbf16, #tpu.memory_space<vmem>>, %arg7: memref<1x128xf32, #tpu.memory_space<vmem>>, %arg8: memref<128x128xbf16, #tpu.memory_space<vmem>>, %arg9: memref<1x128xf32, #tpu.memory_space<vmem>>, %arg10: memref<128x128xbf16, #tpu.memory_space<vmem>>, %arg11: memref<1x128xf32, #tpu.memory_space<vmem>>, %arg12: memref<128x128xbf16, #tpu.memory_space<vmem>>, %arg13: memref<1x128xf32, #tpu.memory_space<vmem>>, %arg14: memref<1x128xf32, #tpu.memory_space<vmem>>, %arg15: memref<1x128xf32, #tpu.memory_space<vmem>>, %arg16: memref<128x256xbf16, #tpu.memory_space<vmem>>, %arg17: memref<1x256xf32, #tpu.memory_space<vmem>>, %arg18: memref<256x128xbf16, #tpu.memory_space<vmem>>, %arg19: memref<1x128xf32, #tpu.memory_space<vmem>>, %arg20: memref<1x16x128xf32, #tpu.memory_space<vmem>>, %arg21: memref<128x16xbf16, #tpu.memory_space<vmem>>, %arg22: memref<16x128xbf16, #tpu.memory_space<vmem>>, %arg23: memref<16x128xbf16, #tpu.memory_space<vmem>>) attributes {dimension_semantics = [#tpu.dimension_semantics<parallel>, #tpu.dimension_semantics<arbitrary>], iteration_bounds = array<i64: 2, 1>, scalar_prefetch = 0 : i64, scratch_operands = 3 : i64, tpu.core_type = #tpu.core_type<tc>, window_params = [{transform_indices = @transform_0, window_bounds = array<i64: 1, 16, 128>}, {transform_indices = @transform_1, window_bounds = array<i64: 1, 1, 16>}, {pipeline_mode = #tpu.pipeline_mode<synchronous>, transform_indices = @transform_2, window_bounds = array<i64: 1, 128>}, {pipeline_mode = #tpu.pipeline_mode<synchronous>, transform_indices = @transform_3, window_bounds = array<i64: 1, 128>}, {pipeline_mode = #tpu.pipeline_mode<synchronous>, transform_indices = @transform_4, window_bounds = array<i64: 128, 128>}, {pipeline_mode = #tpu.pipeline_mode<synchronous>, transform_indices = @transform_5, window_bounds = array<i64: 1, 128>}, {pipeline_mode = #tpu.pipeline_mode<synchronous>, transform_indices = @transform_6, window_bounds = array<i64: 128, 128>}, {pipeline_mode = #tpu.pipeline_mode<synchronous>, transform_indices = @transform_7, window_bounds = array<i64: 1, 128>}, {pipeline_mode = #tpu.pipeline_mode<synchronous>, transform_indices = @transform_8, window_bounds = array<i64: 128, 128>}, {pipeline_mode = #tpu.pipeline_mode<synchronous>, transform_indices = @transform_9, window_bounds = array<i64: 1, 128>}, {pipeline_mode = #tpu.pipeline_mode<synchronous>, transform_indices = @transform_10, window_bounds = array<i64: 128, 128>}, {pipeline_mode = #tpu.pipeline_mode<synchronous>, transform_indices = @transform_11, window_bounds = array<i64: 1, 128>}, {pipeline_mode = #tpu.pipeline_mode<synchronous>, transform_indices = @transform_12, window_bounds = array<i64: 1, 128>}, {pipeline_mode = #tpu.pipeline_mode<synchronous>, transform_indices = @transform_13, window_bounds = array<i64: 1, 128>}, {pipeline_mode = #tpu.pipeline_mode<synchronous>, transform_indices = @transform_14, window_bounds = array<i64: 128, 256>}, {pipeline_mode = #tpu.pipeline_mode<synchronous>, transform_indices = @transform_15, window_bounds = array<i64: 1, 256>}, {pipeline_mode = #tpu.pipeline_mode<synchronous>, transform_indices = @transform_16, window_bounds = array<i64: 256, 128>}, {pipeline_mode = #tpu.pipeline_mode<synchronous>, transform_indices = @transform_17, window_bounds = array<i64: 1, 128>}, {transform_indices = @transform_18, window_bounds = array<i64: 1, 16, 128>}]} {
    %c0 = arith.constant 0 : index
    %c0_0 = arith.constant 0 : index
    %0 = vector.load %arg4[%c0, %c0_0] : memref<1x128xf32, #tpu.memory_space<vmem>>, vector<1x128xf32>
    %c0_1 = arith.constant 0 : index
    %c0_2 = arith.constant 0 : index
    %1 = vector.load %arg5[%c0_1, %c0_2] : memref<1x128xf32, #tpu.memory_space<vmem>>, vector<1x128xf32>
    %c0_i32 = arith.constant 0 : i32
    %2 = arith.cmpi eq, %arg1, %c0_i32 : i32
    %3 = arith.extui %2 : i1 to i32
    %c0_i32_3 = arith.constant 0 : i32
    %4 = arith.cmpi ne, %3, %c0_i32_3 : i32
    scf.if %4 {
      %c0_90 = arith.constant 0 : index
      %c0_91 = arith.constant 0 : index
      %c0_92 = arith.constant 0 : index
      %179 = vector.load %arg2[%c0_90, %c0_91, %c0_92] : memref<1x16x128xf32, #tpu.memory_space<vmem>>, vector<1x16x128xf32>
      %180 = vector.shape_cast %179 : vector<1x16x128xf32> to vector<16x128xf32>
      %cst_93 = arith.constant dense<0.000000e+00> : vector<16xf32>
      %181 = vector.multi_reduction <add>, %180, %cst_93 [1] : vector<16x128xf32> to vector<16xf32>
      %182 = vector.shape_cast %181 : vector<16xf32> to vector<16x1xf32>
      %cst_94 = arith.constant 1.280000e+02 : f32
      %183 = vector.broadcast %cst_94 : f32 to vector<16x1xf32>
      %184 = arith.divf %182, %183 : vector<16x1xf32>
      %185 = vector.broadcast %184 : vector<16x1xf32> to vector<16x128xf32>
      %186 = arith.subf %180, %185 : vector<16x128xf32>
      %187 = arith.mulf %186, %186 : vector<16x128xf32>
      %cst_95 = arith.constant dense<0.000000e+00> : vector<16xf32>
      %188 = vector.multi_reduction <add>, %187, %cst_95 [1] : vector<16x128xf32> to vector<16xf32>
      %189 = vector.shape_cast %188 : vector<16xf32> to vector<16x1xf32>
      %cst_96 = arith.constant 1.280000e+02 : f32
      %190 = vector.broadcast %cst_96 : f32 to vector<16x1xf32>
      %191 = arith.divf %189, %190 : vector<16x1xf32>
      %192 = vector.broadcast %184 : vector<16x1xf32> to vector<16x128xf32>
      %193 = arith.subf %180, %192 : vector<16x128xf32>
      %cst_97 = arith.constant 9.99999997E-7 : f32
      %194 = vector.broadcast %cst_97 : f32 to vector<16x1xf32>
      %195 = arith.addf %191, %194 : vector<16x1xf32>
      %196 = math.rsqrt %195 : vector<16x1xf32>
      %197 = vector.broadcast %196 : vector<16x1xf32> to vector<16x128xf32>
      %198 = arith.mulf %193, %197 : vector<16x128xf32>
      %199 = vector.broadcast %0 : vector<1x128xf32> to vector<16x128xf32>
      %200 = arith.mulf %198, %199 : vector<16x128xf32>
      %201 = vector.broadcast %1 : vector<1x128xf32> to vector<16x128xf32>
      %202 = arith.addf %200, %201 : vector<16x128xf32>
      %203 = arith.truncf %202 : vector<16x128xf32> to vector<16x128xbf16>
      %c0_98 = arith.constant 0 : index
      %c0_99 = arith.constant 0 : index
      %204 = vector.load %arg8[%c0_98, %c0_99] : memref<128x128xbf16, #tpu.memory_space<vmem>>, vector<128x128xbf16>
      %cst_100 = arith.constant dense<0.000000e+00> : vector<16x128xf32>
      %205 = tpu.matmul %203, %204, %cst_100 {dimension_numbers = #tpu.dot_dimension_numbers<[1], [0], [0], [1], [0, 0, 1, 1], [], []>} : vector<16x128xbf16>, vector<128x128xbf16>, vector<16x128xf32> -> vector<16x128xf32>
      %c0_101 = arith.constant 0 : index
      %c0_102 = arith.constant 0 : index
      %206 = vector.load %arg9[%c0_101, %c0_102] : memref<1x128xf32, #tpu.memory_space<vmem>>, vector<1x128xf32>
      %207 = vector.broadcast %206 : vector<1x128xf32> to vector<16x128xf32>
      %208 = arith.addf %205, %207 : vector<16x128xf32>
      %c0_103 = arith.constant 0 : index
      %c0_104 = arith.constant 0 : index
      %209 = vector.load %arg10[%c0_103, %c0_104] : memref<128x128xbf16, #tpu.memory_space<vmem>>, vector<128x128xbf16>
      %cst_105 = arith.constant dense<0.000000e+00> : vector<16x128xf32>
      %210 = tpu.matmul %203, %209, %cst_105 {dimension_numbers = #tpu.dot_dimension_numbers<[1], [0], [0], [1], [0, 0, 1, 1], [], []>} : vector<16x128xbf16>, vector<128x128xbf16>, vector<16x128xf32> -> vector<16x128xf32>
      %c0_106 = arith.constant 0 : index
      %c0_107 = arith.constant 0 : index
      %211 = vector.load %arg11[%c0_106, %c0_107] : memref<1x128xf32, #tpu.memory_space<vmem>>, vector<1x128xf32>
      %212 = vector.broadcast %211 : vector<1x128xf32> to vector<16x128xf32>
      %213 = arith.addf %210, %212 : vector<16x128xf32>
      %214 = tpu.transpose %208, [1, 0] : vector<16x128xf32> -> vector<128x16xf32>
      %215 = arith.truncf %214 : vector<128x16xf32> to vector<128x16xbf16>
      %c0_108 = arith.constant 0 : index
      %c0_109 = arith.constant 0 : index
      %216 = vector.load %arg21[%c0_108, %c0_109] : memref<128x16xbf16, #tpu.memory_space<vmem>>, vector<128x16xbf16>
      tpu.vector_store %arg21[%c0_108, %c0_109], %215 {strides = array<i32>} : memref<128x16xbf16, #tpu.memory_space<vmem>>, vector<128x16xbf16>,
      %217 = arith.truncf %213 : vector<16x128xf32> to vector<16x128xbf16>
      %c0_110 = arith.constant 0 : index
      %c0_111 = arith.constant 0 : index
      %218 = vector.load %arg22[%c0_110, %c0_111] : memref<16x128xbf16, #tpu.memory_space<vmem>>, vector<16x128xbf16>
      tpu.vector_store %arg22[%c0_110, %c0_111], %217 {strides = array<i32>} : memref<16x128xbf16, #tpu.memory_space<vmem>>, vector<16x128xbf16>,
    } else {
    }
    %c16_i32 = arith.constant 16 : i32
    %5 = arith.muli %arg1, %c16_i32 : i32
    %6 = tpu.assume_multiple %5, 16 : i32
    %c0_4 = arith.constant 0 : index
    %7 = arith.index_cast %6 : i32 to index
    %c0_5 = arith.constant 0 : index
    %8 = vector.load %arg2[%c0_4, %7, %c0_5] : memref<1x16x128xf32, #tpu.memory_space<vmem>>, vector<1x16x128xf32>
    %9 = vector.shape_cast %8 : vector<1x16x128xf32> to vector<16x128xf32>
    %cst = arith.constant dense<0.000000e+00> : vector<16xf32>
    %10 = vector.multi_reduction <add>, %9, %cst [1] : vector<16x128xf32> to vector<16xf32>
    %11 = vector.shape_cast %10 : vector<16xf32> to vector<16x1xf32>
    %cst_6 = arith.constant 1.280000e+02 : f32
    %12 = vector.broadcast %cst_6 : f32 to vector<16x1xf32>
    %13 = arith.divf %11, %12 : vector<16x1xf32>
    %14 = vector.broadcast %13 : vector<16x1xf32> to vector<16x128xf32>
    %15 = arith.subf %9, %14 : vector<16x128xf32>
    %16 = arith.mulf %15, %15 : vector<16x128xf32>
    %cst_7 = arith.constant dense<0.000000e+00> : vector<16xf32>
    %17 = vector.multi_reduction <add>, %16, %cst_7 [1] : vector<16x128xf32> to vector<16xf32>
    %18 = vector.shape_cast %17 : vector<16xf32> to vector<16x1xf32>
    %cst_8 = arith.constant 1.280000e+02 : f32
    %19 = vector.broadcast %cst_8 : f32 to vector<16x1xf32>
    %20 = arith.divf %18, %19 : vector<16x1xf32>
    %21 = vector.broadcast %13 : vector<16x1xf32> to vector<16x128xf32>
    %22 = arith.subf %9, %21 : vector<16x128xf32>
    %cst_9 = arith.constant 9.99999997E-7 : f32
    %23 = vector.broadcast %cst_9 : f32 to vector<16x1xf32>
    %24 = arith.addf %20, %23 : vector<16x1xf32>
    %25 = math.rsqrt %24 : vector<16x1xf32>
    %26 = vector.broadcast %25 : vector<16x1xf32> to vector<16x128xf32>
    %27 = arith.mulf %22, %26 : vector<16x128xf32>
    %28 = vector.broadcast %0 : vector<1x128xf32> to vector<16x128xf32>
    %29 = arith.mulf %27, %28 : vector<16x128xf32>
    %30 = vector.broadcast %1 : vector<1x128xf32> to vector<16x128xf32>
    %31 = arith.addf %29, %30 : vector<16x128xf32>
    %32 = arith.truncf %31 : vector<16x128xf32> to vector<16x128xbf16>
    %c0_10 = arith.constant 0 : index
    %c0_11 = arith.constant 0 : index
    %33 = vector.load %arg6[%c0_10, %c0_11] : memref<128x128xbf16, #tpu.memory_space<vmem>>, vector<128x128xbf16>
    %cst_12 = arith.constant dense<0.000000e+00> : vector<16x128xf32>
    %34 = tpu.matmul %32, %33, %cst_12 {dimension_numbers = #tpu.dot_dimension_numbers<[1], [0], [0], [1], [0, 0, 1, 1], [], []>} : vector<16x128xbf16>, vector<128x128xbf16>, vector<16x128xf32> -> vector<16x128xf32>
    %c0_13 = arith.constant 0 : index
    %c0_14 = arith.constant 0 : index
    %35 = vector.load %arg7[%c0_13, %c0_14] : memref<1x128xf32, #tpu.memory_space<vmem>>, vector<1x128xf32>
    %36 = vector.broadcast %35 : vector<1x128xf32> to vector<16x128xf32>
    %37 = arith.addf %34, %36 : vector<16x128xf32>
    %38 = arith.truncf %37 : vector<16x128xf32> to vector<16x128xbf16>
    %c0_15 = arith.constant 0 : index
    %c0_16 = arith.constant 0 : index
    %c0_17 = arith.constant 0 : index
    %39 = vector.load %arg3[%c0_15, %c0_16, %c0_17] : memref<1x1x16xi32, #tpu.memory_space<vmem>>, vector<1x1x16xi32>
    %40 = vector.shape_cast %39 : vector<1x1x16xi32> to vector<1x16xi32>
    %c0_i32_18 = arith.constant 0 : i32
    %41 = vector.broadcast %c0_i32_18 : i32 to vector<1x16xi32>
    %42 = arith.cmpi ne, %40, %41 : vector<1x16xi32>
    %cst_19 = arith.constant -9.99999984E+17 : f32
    %cst_20 = arith.constant 0.000000e+00 : f32
    %43 = vector.broadcast %cst_19 : f32 to vector<1x16xf32>
    %44 = vector.broadcast %cst_20 : f32 to vector<1x16xf32>
    %45 = arith.select %42, %43, %44 : vector<1x16xi1>, vector<1x16xf32>
    %46 = vector.shape_cast %45 : vector<1x16xf32> to vector<1x16xf32>
    %47 = vector.broadcast %46 : vector<1x16xf32> to vector<16x16xf32>
    %48 = vector.extract_strided_slice %38 {offsets = [0, 0], sizes = [16, 32], strides = [1, 1]} : vector<16x128xbf16> to vector<16x32xbf16>
    %c0_21 = arith.constant 0 : index
    %c0_22 = arith.constant 0 : index
    %49 = vector.load %arg21[%c0_21, %c0_22] : memref<128x16xbf16, #tpu.memory_space<vmem>>, vector<32x16xbf16>
    %c0_23 = arith.constant 0 : index
    %c0_24 = arith.constant 0 : index
    %50 = vector.load %arg22[%c0_23, %c0_24] : memref<16x128xbf16, #tpu.memory_space<vmem>>, vector<16x32xbf16>
    %cst_25 = arith.constant dense<0.000000e+00> : vector<16x16xf32>
    %51 = tpu.matmul %48, %49, %cst_25 {dimension_numbers = #tpu.dot_dimension_numbers<[1], [0], [0], [1], [0, 0, 1, 1], [], []>} : vector<16x32xbf16>, vector<32x16xbf16>, vector<16x16xf32> -> vector<16x16xf32>
    %52 = arith.addf %51, %47 : vector<16x16xf32>
    %cst_26 = arith.constant dense<0xFF800000> : vector<16xf32>
    %53 = vector.multi_reduction <maximumf>, %52, %cst_26 [1] : vector<16x16xf32> to vector<16xf32>
    %54 = vector.shape_cast %53 : vector<16xf32> to vector<16x1xf32>
    %55 = vector.broadcast %54 : vector<16x1xf32> to vector<16x16xf32>
    %56 = arith.subf %52, %55 : vector<16x16xf32>
    %57 = math.exp %56 : vector<16x16xf32>
    %cst_27 = arith.constant dense<0.000000e+00> : vector<16xf32>
    %58 = vector.multi_reduction <add>, %57, %cst_27 [1] : vector<16x16xf32> to vector<16xf32>
    %59 = vector.shape_cast %58 : vector<16xf32> to vector<16x1xf32>
    %60 = tpu.reciprocal %59 {approx = true} : vector<16x1xf32> -> vector<16x1xf32>
    %61 = vector.broadcast %60 : vector<16x1xf32> to vector<16x16xf32>
    %62 = arith.mulf %57, %61 : vector<16x16xf32>
    %63 = arith.truncf %62 : vector<16x16xf32> to vector<16x16xbf16>
    %cst_28 = arith.constant dense<0.000000e+00> : vector<16x32xf32>
    %64 = tpu.matmul %63, %50, %cst_28 {dimension_numbers = #tpu.dot_dimension_numbers<[1], [0], [0], [1], [0, 0, 1, 1], [], []>} : vector<16x16xbf16>, vector<16x32xbf16>, vector<16x32xf32> -> vector<16x32xf32>
    %65 = arith.truncf %64 : vector<16x32xf32> to vector<16x32xbf16>
    %c0_29 = arith.constant 0 : index
    %c0_30 = arith.constant 0 : index
    %66 = vector.load %arg23[%c0_29, %c0_30] : memref<16x128xbf16, #tpu.memory_space<vmem>>, vector<16x32xbf16>
    tpu.vector_store %arg23[%c0_29, %c0_30], %65 {strides = array<i32>} : memref<16x128xbf16, #tpu.memory_space<vmem>>, vector<16x32xbf16>,
    %67 = vector.extract_strided_slice %38 {offsets = [0, 32], sizes = [16, 32], strides = [1, 1]} : vector<16x128xbf16> to vector<16x32xbf16>
    %c32 = arith.constant 32 : index
    %c0_31 = arith.constant 0 : index
    %68 = vector.load %arg21[%c32, %c0_31] : memref<128x16xbf16, #tpu.memory_space<vmem>>, vector<32x16xbf16>
    %c0_32 = arith.constant 0 : index
    %c32_33 = arith.constant 32 : index
    %69 = vector.load %arg22[%c0_32, %c32_33] : memref<16x128xbf16, #tpu.memory_space<vmem>>, vector<16x32xbf16>
    %cst_34 = arith.constant dense<0.000000e+00> : vector<16x16xf32>
    %70 = tpu.matmul %67, %68, %cst_34 {dimension_numbers = #tpu.dot_dimension_numbers<[1], [0], [0], [1], [0, 0, 1, 1], [], []>} : vector<16x32xbf16>, vector<32x16xbf16>, vector<16x16xf32> -> vector<16x16xf32>
    %71 = arith.addf %70, %47 : vector<16x16xf32>
    %cst_35 = arith.constant dense<0xFF800000> : vector<16xf32>
    %72 = vector.multi_reduction <maximumf>, %71, %cst_35 [1] : vector<16x16xf32> to vector<16xf32>
    %73 = vector.shape_cast %72 : vector<16xf32> to vector<16x1xf32>
    %74 = vector.broadcast %73 : vector<16x1xf32> to vector<16x16xf32>
    %75 = arith.subf %71, %74 : vector<16x16xf32>
    %76 = math.exp %75 : vector<16x16xf32>
    %cst_36 = arith.constant dense<0.000000e+00> : vector<16xf32>
    %77 = vector.multi_reduction <add>, %76, %cst_36 [1] : vector<16x16xf32> to vector<16xf32>
    %78 = vector.shape_cast %77 : vector<16xf32> to vector<16x1xf32>
    %79 = tpu.reciprocal %78 {approx = true} : vector<16x1xf32> -> vector<16x1xf32>
    %80 = vector.broadcast %79 : vector<16x1xf32> to vector<16x16xf32>
    %81 = arith.mulf %76, %80 : vector<16x16xf32>
    %82 = arith.truncf %81 : vector<16x16xf32> to vector<16x16xbf16>
    %cst_37 = arith.constant dense<0.000000e+00> : vector<16x32xf32>
    %83 = tpu.matmul %82, %69, %cst_37 {dimension_numbers = #tpu.dot_dimension_numbers<[1], [0], [0], [1], [0, 0, 1, 1], [], []>} : vector<16x16xbf16>, vector<16x32xbf16>, vector<16x32xf32> -> vector<16x32xf32>
    %84 = arith.truncf %83 : vector<16x32xf32> to vector<16x32xbf16>
    %c0_38 = arith.constant 0 : index
    %c32_39 = arith.constant 32 : index
    %85 = vector.load %arg23[%c0_38, %c32_39] : memref<16x128xbf16, #tpu.memory_space<vmem>>, vector<16x32xbf16>
    tpu.vector_store %arg23[%c0_38, %c32_39], %84 {strides = array<i32>} : memref<16x128xbf16, #tpu.memory_space<vmem>>, vector<16x32xbf16>,
    %86 = vector.extract_strided_slice %38 {offsets = [0, 64], sizes = [16, 32], strides = [1, 1]} : vector<16x128xbf16> to vector<16x32xbf16>
    %c64 = arith.constant 64 : index
    %c0_40 = arith.constant 0 : index
    %87 = vector.load %arg21[%c64, %c0_40] : memref<128x16xbf16, #tpu.memory_space<vmem>>, vector<32x16xbf16>
    %c0_41 = arith.constant 0 : index
    %c64_42 = arith.constant 64 : index
    %88 = vector.load %arg22[%c0_41, %c64_42] : memref<16x128xbf16, #tpu.memory_space<vmem>>, vector<16x32xbf16>
    %cst_43 = arith.constant dense<0.000000e+00> : vector<16x16xf32>
    %89 = tpu.matmul %86, %87, %cst_43 {dimension_numbers = #tpu.dot_dimension_numbers<[1], [0], [0], [1], [0, 0, 1, 1], [], []>} : vector<16x32xbf16>, vector<32x16xbf16>, vector<16x16xf32> -> vector<16x16xf32>
    %90 = arith.addf %89, %47 : vector<16x16xf32>
    %cst_44 = arith.constant dense<0xFF800000> : vector<16xf32>
    %91 = vector.multi_reduction <maximumf>, %90, %cst_44 [1] : vector<16x16xf32> to vector<16xf32>
    %92 = vector.shape_cast %91 : vector<16xf32> to vector<16x1xf32>
    %93 = vector.broadcast %92 : vector<16x1xf32> to vector<16x16xf32>
    %94 = arith.subf %90, %93 : vector<16x16xf32>
    %95 = math.exp %94 : vector<16x16xf32>
    %cst_45 = arith.constant dense<0.000000e+00> : vector<16xf32>
    %96 = vector.multi_reduction <add>, %95, %cst_45 [1] : vector<16x16xf32> to vector<16xf32>
    %97 = vector.shape_cast %96 : vector<16xf32> to vector<16x1xf32>
    %98 = tpu.reciprocal %97 {approx = true} : vector<16x1xf32> -> vector<16x1xf32>
    %99 = vector.broadcast %98 : vector<16x1xf32> to vector<16x16xf32>
    %100 = arith.mulf %95, %99 : vector<16x16xf32>
    %101 = arith.truncf %100 : vector<16x16xf32> to vector<16x16xbf16>
    %cst_46 = arith.constant dense<0.000000e+00> : vector<16x32xf32>
    %102 = tpu.matmul %101, %88, %cst_46 {dimension_numbers = #tpu.dot_dimension_numbers<[1], [0], [0], [1], [0, 0, 1, 1], [], []>} : vector<16x16xbf16>, vector<16x32xbf16>, vector<16x32xf32> -> vector<16x32xf32>
    %103 = arith.truncf %102 : vector<16x32xf32> to vector<16x32xbf16>
    %c0_47 = arith.constant 0 : index
    %c64_48 = arith.constant 64 : index
    %104 = vector.load %arg23[%c0_47, %c64_48] : memref<16x128xbf16, #tpu.memory_space<vmem>>, vector<16x32xbf16>
    tpu.vector_store %arg23[%c0_47, %c64_48], %103 {strides = array<i32>} : memref<16x128xbf16, #tpu.memory_space<vmem>>, vector<16x32xbf16>,
    %105 = vector.extract_strided_slice %38 {offsets = [0, 96], sizes = [16, 32], strides = [1, 1]} : vector<16x128xbf16> to vector<16x32xbf16>
    %c96 = arith.constant 96 : index
    %c0_49 = arith.constant 0 : index
    %106 = vector.load %arg21[%c96, %c0_49] : memref<128x16xbf16, #tpu.memory_space<vmem>>, vector<32x16xbf16>
    %c0_50 = arith.constant 0 : index
    %c96_51 = arith.constant 96 : index
    %107 = vector.load %arg22[%c0_50, %c96_51] : memref<16x128xbf16, #tpu.memory_space<vmem>>, vector<16x32xbf16>
    %cst_52 = arith.constant dense<0.000000e+00> : vector<16x16xf32>
    %108 = tpu.matmul %105, %106, %cst_52 {dimension_numbers = #tpu.dot_dimension_numbers<[1], [0], [0], [1], [0, 0, 1, 1], [], []>} : vector<16x32xbf16>, vector<32x16xbf16>, vector<16x16xf32> -> vector<16x16xf32>
    %109 = arith.addf %108, %47 : vector<16x16xf32>
    %cst_53 = arith.constant dense<0xFF800000> : vector<16xf32>
    %110 = vector.multi_reduction <maximumf>, %109, %cst_53 [1] : vector<16x16xf32> to vector<16xf32>
    %111 = vector.shape_cast %110 : vector<16xf32> to vector<16x1xf32>
    %112 = vector.broadcast %111 : vector<16x1xf32> to vector<16x16xf32>
    %113 = arith.subf %109, %112 : vector<16x16xf32>
    %114 = math.exp %113 : vector<16x16xf32>
    %cst_54 = arith.constant dense<0.000000e+00> : vector<16xf32>
    %115 = vector.multi_reduction <add>, %114, %cst_54 [1] : vector<16x16xf32> to vector<16xf32>
    %116 = vector.shape_cast %115 : vector<16xf32> to vector<16x1xf32>
    %117 = tpu.reciprocal %116 {approx = true} : vector<16x1xf32> -> vector<16x1xf32>
    %118 = vector.broadcast %117 : vector<16x1xf32> to vector<16x16xf32>
    %119 = arith.mulf %114, %118 : vector<16x16xf32>
    %120 = arith.truncf %119 : vector<16x16xf32> to vector<16x16xbf16>
    %cst_55 = arith.constant dense<0.000000e+00> : vector<16x32xf32>
    %121 = tpu.matmul %120, %107, %cst_55 {dimension_numbers = #tpu.dot_dimension_numbers<[1], [0], [0], [1], [0, 0, 1, 1], [], []>} : vector<16x16xbf16>, vector<16x32xbf16>, vector<16x32xf32> -> vector<16x32xf32>
    %122 = arith.truncf %121 : vector<16x32xf32> to vector<16x32xbf16>
    %c0_56 = arith.constant 0 : index
    %c96_57 = arith.constant 96 : index
    %123 = vector.load %arg23[%c0_56, %c96_57] : memref<16x128xbf16, #tpu.memory_space<vmem>>, vector<16x32xbf16>
    tpu.vector_store %arg23[%c0_56, %c96_57], %122 {strides = array<i32>} : memref<16x128xbf16, #tpu.memory_space<vmem>>, vector<16x32xbf16>,
    %c0_58 = arith.constant 0 : index
    %c0_59 = arith.constant 0 : index
    %124 = vector.load %arg23[%c0_58, %c0_59] : memref<16x128xbf16, #tpu.memory_space<vmem>>, vector<16x128xbf16>
    %c0_60 = arith.constant 0 : index
    %c0_61 = arith.constant 0 : index
    %125 = vector.load %arg12[%c0_60, %c0_61] : memref<128x128xbf16, #tpu.memory_space<vmem>>, vector<128x128xbf16>
    %cst_62 = arith.constant dense<0.000000e+00> : vector<16x128xf32>
    %126 = tpu.matmul %124, %125, %cst_62 {dimension_numbers = #tpu.dot_dimension_numbers<[1], [0], [0], [1], [0, 0, 1, 1], [], []>} : vector<16x128xbf16>, vector<128x128xbf16>, vector<16x128xf32> -> vector<16x128xf32>
    %c0_63 = arith.constant 0 : index
    %c0_64 = arith.constant 0 : index
    %127 = vector.load %arg13[%c0_63, %c0_64] : memref<1x128xf32, #tpu.memory_space<vmem>>, vector<1x128xf32>
    %128 = vector.broadcast %127 : vector<1x128xf32> to vector<16x128xf32>
    %129 = arith.addf %126, %128 : vector<16x128xf32>
    %130 = arith.addf %129, %9 : vector<16x128xf32>
    %c0_65 = arith.constant 0 : index
    %c0_66 = arith.constant 0 : index
    %131 = vector.load %arg14[%c0_65, %c0_66] : memref<1x128xf32, #tpu.memory_space<vmem>>, vector<1x128xf32>
    %c0_67 = arith.constant 0 : index
    %c0_68 = arith.constant 0 : index
    %132 = vector.load %arg15[%c0_67, %c0_68] : memref<1x128xf32, #tpu.memory_space<vmem>>, vector<1x128xf32>
    %cst_69 = arith.constant dense<0.000000e+00> : vector<16xf32>
    %133 = vector.multi_reduction <add>, %130, %cst_69 [1] : vector<16x128xf32> to vector<16xf32>
    %134 = vector.shape_cast %133 : vector<16xf32> to vector<16x1xf32>
    %cst_70 = arith.constant 1.280000e+02 : f32
    %135 = vector.broadcast %cst_70 : f32 to vector<16x1xf32>
    %136 = arith.divf %134, %135 : vector<16x1xf32>
    %137 = vector.broadcast %136 : vector<16x1xf32> to vector<16x128xf32>
    %138 = arith.subf %130, %137 : vector<16x128xf32>
    %139 = arith.mulf %138, %138 : vector<16x128xf32>
    %cst_71 = arith.constant dense<0.000000e+00> : vector<16xf32>
    %140 = vector.multi_reduction <add>, %139, %cst_71 [1] : vector<16x128xf32> to vector<16xf32>
    %141 = vector.shape_cast %140 : vector<16xf32> to vector<16x1xf32>
    %cst_72 = arith.constant 1.280000e+02 : f32
    %142 = vector.broadcast %cst_72 : f32 to vector<16x1xf32>
    %143 = arith.divf %141, %142 : vector<16x1xf32>
    %144 = vector.broadcast %136 : vector<16x1xf32> to vector<16x128xf32>
    %145 = arith.subf %130, %144 : vector<16x128xf32>
    %cst_73 = arith.constant 9.99999997E-7 : f32
    %146 = vector.broadcast %cst_73 : f32 to vector<16x1xf32>
    %147 = arith.addf %143, %146 : vector<16x1xf32>
    %148 = math.rsqrt %147 : vector<16x1xf32>
    %149 = vector.broadcast %148 : vector<16x1xf32> to vector<16x128xf32>
    %150 = arith.mulf %145, %149 : vector<16x128xf32>
    %151 = vector.broadcast %131 : vector<1x128xf32> to vector<16x128xf32>
    %152 = arith.mulf %150, %151 : vector<16x128xf32>
    %153 = vector.broadcast %132 : vector<1x128xf32> to vector<16x128xf32>
    %154 = arith.addf %152, %153 : vector<16x128xf32>
    %155 = arith.truncf %154 : vector<16x128xf32> to vector<16x128xbf16>
    %c0_74 = arith.constant 0 : index
    %c0_75 = arith.constant 0 : index
    %156 = vector.load %arg16[%c0_74, %c0_75] : memref<128x256xbf16, #tpu.memory_space<vmem>>, vector<128x256xbf16>
    %cst_76 = arith.constant dense<0.000000e+00> : vector<16x256xf32>
    %157 = tpu.matmul %155, %156, %cst_76 {dimension_numbers = #tpu.dot_dimension_numbers<[1], [0], [0], [1], [0, 0, 1, 1], [], []>} : vector<16x128xbf16>, vector<128x256xbf16>, vector<16x256xf32> -> vector<16x256xf32>
    %c0_77 = arith.constant 0 : index
    %c0_78 = arith.constant 0 : index
    %158 = vector.load %arg17[%c0_77, %c0_78] : memref<1x256xf32, #tpu.memory_space<vmem>>, vector<1x256xf32>
    %159 = vector.broadcast %158 : vector<1x256xf32> to vector<16x256xf32>
    %160 = arith.addf %157, %159 : vector<16x256xf32>
    %cst_79 = arith.constant 5.000000e-01 : f32
    %161 = vector.broadcast %cst_79 : f32 to vector<16x256xf32>
    %162 = arith.mulf %161, %160 : vector<16x256xf32>
    %cst_80 = arith.constant 1.41421354 : f32
    %163 = vector.broadcast %cst_80 : f32 to vector<16x256xf32>
    %164 = arith.divf %160, %163 : vector<16x256xf32>
    %165 = math.erf %164 : vector<16x256xf32>
    %cst_81 = arith.constant 1.000000e+00 : f32
    %166 = vector.broadcast %cst_81 : f32 to vector<16x256xf32>
    %167 = arith.addf %166, %165 : vector<16x256xf32>
    %168 = arith.mulf %162, %167 : vector<16x256xf32>
    %169 = arith.truncf %168 : vector<16x256xf32> to vector<16x256xbf16>
    %c0_82 = arith.constant 0 : index
    %c0_83 = arith.constant 0 : index
    %170 = vector.load %arg18[%c0_82, %c0_83] : memref<256x128xbf16, #tpu.memory_space<vmem>>, vector<256x128xbf16>
    %cst_84 = arith.constant dense<0.000000e+00> : vector<16x128xf32>
    %171 = tpu.matmul %169, %170, %cst_84 {dimension_numbers = #tpu.dot_dimension_numbers<[1], [0], [0], [1], [0, 0, 1, 1], [], []>} : vector<16x256xbf16>, vector<256x128xbf16>, vector<16x128xf32> -> vector<16x128xf32>
    %c0_85 = arith.constant 0 : index
    %c0_86 = arith.constant 0 : index
    %172 = vector.load %arg19[%c0_85, %c0_86] : memref<1x128xf32, #tpu.memory_space<vmem>>, vector<1x128xf32>
    %173 = vector.broadcast %172 : vector<1x128xf32> to vector<16x128xf32>
    %174 = arith.addf %171, %173 : vector<16x128xf32>
    %175 = arith.addf %174, %130 : vector<16x128xf32>
    %c0_87 = arith.constant 0 : index
    %c0_88 = arith.constant 0 : index
    %c0_89 = arith.constant 0 : index
    %176 = vector.load %arg20[%c0_87, %c0_88, %c0_89] : memref<1x16x128xf32, #tpu.memory_space<vmem>>, vector<1x16x128xf32>
    %177 = vector.shape_cast %176 : vector<1x16x128xf32> to vector<16x128xf32>
    %178 = vector.shape_cast %175 : vector<16x128xf32> to vector<1x16x128xf32>
    tpu.vector_store %arg20[%c0_87, %c0_88, %c0_89], %178 {strides = array<i32>} : memref<1x16x128xf32, #tpu.memory_space<vmem>>, vector<1x16x128xf32>,
    return
  }
  func.func @transform_0(%arg0: i32, %arg1: i32) -> (i32, i32, i32) {
    %c0_i32 = arith.constant 0 : i32
    %c0_i32_0 = arith.constant 0 : i32
    %c0_i32_1 = arith.constant 0 : i32
    return %arg0, %c0_i32, %c0_i32_0 : i32, i32, i32
  }
  func.func @transform_1(%arg0: i32, %arg1: i32) -> (i32, i32, i32) {
    %c0_i32 = arith.constant 0 : i32
    %c0_i32_0 = arith.constant 0 : i32
    %c0_i32_1 = arith.constant 0 : i32
    return %arg0, %c0_i32, %c0_i32_0 : i32, i32, i32
  }
  func.func @transform_2(%arg0: i32, %arg1: i32) -> (i32, i32) {
    %c0_i32 = arith.constant 0 : i32
    %c0_i32_0 = arith.constant 0 : i32
    %c0_i32_1 = arith.constant 0 : i32
    return %c0_i32, %c0_i32_0 : i32, i32
  }
  func.func @transform_3(%arg0: i32, %arg1: i32) -> (i32, i32) {
    %c0_i32 = arith.constant 0 : i32
    %c0_i32_0 = arith.constant 0 : i32
    %c0_i32_1 = arith.constant 0 : i32
    return %c0_i32, %c0_i32_0 : i32, i32
  }
  func.func @transform_4(%arg0: i32, %arg1: i32) -> (i32, i32) {
    %c0_i32 = arith.constant 0 : i32
    %c0_i32_0 = arith.constant 0 : i32
    %c0_i32_1 = arith.constant 0 : i32
    return %c0_i32, %c0_i32_0 : i32, i32
  }
  func.func @transform_5(%arg0: i32, %arg1: i32) -> (i32, i32) {
    %c0_i32 = arith.constant 0 : i32
    %c0_i32_0 = arith.constant 0 : i32
    %c0_i32_1 = arith.constant 0 : i32
    return %c0_i32, %c0_i32_0 : i32, i32
  }
  func.func @transform_6(%arg0: i32, %arg1: i32) -> (i32, i32) {
    %c0_i32 = arith.constant 0 : i32
    %c0_i32_0 = arith.constant 0 : i32
    %c0_i32_1 = arith.constant 0 : i32
    return %c0_i32, %c0_i32_0 : i32, i32
  }
  func.func @transform_7(%arg0: i32, %arg1: i32) -> (i32, i32) {
    %c0_i32 = arith.constant 0 : i32
    %c0_i32_0 = arith.constant 0 : i32
    %c0_i32_1 = arith.constant 0 : i32
    return %c0_i32, %c0_i32_0 : i32, i32
  }
  func.func @transform_8(%arg0: i32, %arg1: i32) -> (i32, i32) {
    %c0_i32 = arith.constant 0 : i32
    %c0_i32_0 = arith.constant 0 : i32
    %c0_i32_1 = arith.constant 0 : i32
    return %c0_i32, %c0_i32_0 : i32, i32
  }
  func.func @transform_9(%arg0: i32, %arg1: i32) -> (i32, i32) {
    %c0_i32 = arith.constant 0 : i32
    %c0_i32_0 = arith.constant 0 : i32
    %c0_i32_1 = arith.constant 0 : i32
    return %c0_i32, %c0_i32_0 : i32, i32
  }
  func.func @transform_10(%arg0: i32, %arg1: i32) -> (i32, i32) {
    %c0_i32 = arith.constant 0 : i32
    %c0_i32_0 = arith.constant 0 : i32
    %c0_i32_1 = arith.constant 0 : i32
    return %c0_i32, %c0_i32_0 : i32, i32
  }
  func.func @transform_11(%arg0: i32, %arg1: i32) -> (i32, i32) {
    %c0_i32 = arith.constant 0 : i32
    %c0_i32_0 = arith.constant 0 : i32
    %c0_i32_1 = arith.constant 0 : i32
    return %c0_i32, %c0_i32_0 : i32, i32
  }
  func.func @transform_12(%arg0: i32, %arg1: i32) -> (i32, i32) {
    %c0_i32 = arith.constant 0 : i32
    %c0_i32_0 = arith.constant 0 : i32
    %c0_i32_1 = arith.constant 0 : i32
    return %c0_i32, %c0_i32_0 : i32, i32
  }
  func.func @transform_13(%arg0: i32, %arg1: i32) -> (i32, i32) {
    %c0_i32 = arith.constant 0 : i32
    %c0_i32_0 = arith.constant 0 : i32
    %c0_i32_1 = arith.constant 0 : i32
    return %c0_i32, %c0_i32_0 : i32, i32
  }
  func.func @transform_14(%arg0: i32, %arg1: i32) -> (i32, i32) {
    %c0_i32 = arith.constant 0 : i32
    %c0_i32_0 = arith.constant 0 : i32
    %c0_i32_1 = arith.constant 0 : i32
    return %c0_i32, %c0_i32_0 : i32, i32
  }
  func.func @transform_15(%arg0: i32, %arg1: i32) -> (i32, i32) {
    %c0_i32 = arith.constant 0 : i32
    %c0_i32_0 = arith.constant 0 : i32
    %c0_i32_1 = arith.constant 0 : i32
    return %c0_i32, %c0_i32_0 : i32, i32
  }
  func.func @transform_16(%arg0: i32, %arg1: i32) -> (i32, i32) {
    %c0_i32 = arith.constant 0 : i32
    %c0_i32_0 = arith.constant 0 : i32
    %c0_i32_1 = arith.constant 0 : i32
    return %c0_i32, %c0_i32_0 : i32, i32
  }
  func.func @transform_17(%arg0: i32, %arg1: i32) -> (i32, i32) {
    %c0_i32 = arith.constant 0 : i32
    %c0_i32_0 = arith.constant 0 : i32
    %c0_i32_1 = arith.constant 0 : i32
    return %c0_i32, %c0_i32_0 : i32, i32
  }
  func.func @transform_18(%arg0: i32, %arg1: i32) -> (i32, i32, i32) {
    %c0_i32 = arith.constant 0 : i32
    %c0_i32_0 = arith.constant 0 : i32
    return %arg0, %arg1, %c0_i32 : i32, i32, i32
  }
}

</mosaic_0001>

<bundles_post_ra>
// kernel: tpu_custom_call.1
= control target key start
LH: loop header
LB: loop body
LE: loop exit
PB: predicated region body
PF: predicated region fallthrough
CT: control target
= control target key end

     0   :  { %s3958_s0 = inlined_call_operand.hbm [shape: f32[2,16,128], index: 0, kind: input, shape index: {}]   ;;  %s3959_s1 = inlined_call_operand.vmem [shape: s32[2,1,16], index: 1, kind: input, shape index: {}]   ;;  %s3960_s2 = inlined_call_operand.vmem [shape: f32[1,128], index: 2, kind: input, shape index: {}]   ;;  %s3961_s3 = inlined_call_operand.vmem [shape: f32[1,128], index: 3, kind: input, shape index: {}]   ;;  %s3962_s4 = inlined_call_operand.hbm [shape: bf16[128,128], index: 4, kind: input, shape index: {}]   ;;  %s3963_s5 = inlined_call_operand.vmem [shape: f32[1,128], index: 5, kind: input, shape index: {}]   ;;  %s3964_s6 = inlined_call_operand.hbm [shape: bf16[128,128], index: 6, kind: input, shape index: {}]   ;;  %s3965_s7 = inlined_call_operand.vmem [shape: f32[1,128], index: 7, kind: input, shape index: {}]   ;;  %s3966_s8 = inlined_call_operand.hbm [shape: bf16[128,128], index: 8, kind: input, shape index: {}]   ;;  %s3967_s9 = inlined_call_operand.vmem [shape: f32[1,128], index: 9, kind: input, shape index: {}]   ;;  %s3968_s10 = inlined_call_operand.hbm [shape: bf16[128,128], index: 10, kind: input, shape index: {}]   ;;  %s3969_s11 = inlined_call_operand.vmem [shape: f32[1,128], index: 11, kind: input, shape index: {}]   ;;  %s3970_s12 = inlined_call_operand.vmem [shape: f32[1,128], index: 12, kind: input, shape index: {}]   ;;  %s3971_s13 = inlined_call_operand.vmem [shape: f32[1,128], index: 13, kind: input, shape index: {}]   ;;  %s3972_s14 = inlined_call_operand.hbm [shape: bf16[128,256], index: 14, kind: input, shape index: {}]   ;;  %s3973_s15 = inlined_call_operand.vmem [shape: f32[1,256], index: 15, kind: input, shape index: {}]   ;;  %s3974_s16 = inlined_call_operand.hbm [shape: bf16[256,128], index: 16, kind: input, shape index: {}]   ;;  %s3975_s17 = inlined_call_operand.vmem [shape: f32[1,128], index: 17, kind: input, shape index: {}]   ;;  %s3976_s18 = inlined_call_operand.hbm [shape: f32[2,16,128], index: 18, kind: output, shape index: {}]  }
   0x1   :  { %3990 = sst [smem:[#allocation24_spill]] %s3958_s0 }
   0x2   :  { %3991 = sst [smem:[#allocation25_spill]] %s3959_s1 }
   0x3   :  { %3992 = sst [smem:[#allocation26_spill]] %s3960_s2 }
   0x4   :  { %3993 = sst [smem:[#allocation27_spill]] %s3962_s4 }
   0x5   :  { %3994 = sst [smem:[#allocation28_spill]] %s3963_s5 }
   0x6   :  { %3995 = sst [smem:[#allocation29_spill]] %s3966_s8 }
   0x7   :  { %3996 = sst [smem:[#allocation30_spill]] %s3967_s9 }
   0x8   :  { %3997 = sst [smem:[#allocation31_spill]] %s3969_s11 }
   0x9   :  { %3998 = sst [smem:[#allocation32_spill]] %s3970_s12 }
   0xa   :  { %3999 = sst [smem:[#allocation33_spill]] %s3971_s13 }
   0xb   :  { %4000 = sst [smem:[#allocation34_spill]] %s3973_s15 }
   0xc   :  { %4001 = sst [smem:[#allocation35_spill]] %s3975_s17 }
   0xd   :  { %4002 = sst [smem:[#allocation36_spill]] %s3976_s18 }
   0xe   :  { %23 = vsyncpa [#allocation6], 0 }
   0xf   :  { %25 = vsyncpa [#allocation6 + $0x1], 0 }
  0x10   :  { %26 = vsyncpa [#allocation9], 0 }
  0x11   :  { %27 = vsyncpa [#allocation12], 0 }
  0x12   :  { %28 = vsyncpa [#allocation15], 0 }
  0x13   :  { %29 = vsyncpa [#allocation7], 0 }
  0x14   :  { %31 = vsyncpa [#allocation7 + $0x1], 0  ;;  %s3372_s27 = smov 0   ;;  %s3374_s28 = smov 0  }
  0x15   :  { %s3376_s29 = smov 0   ;;  %s3378_s30 = smov 0  }
  0x16   :  { %s3380_s0 = smov 0   ;;  %s3382_s19 = smov 0  }
  0x17 LB: > { %4003 = sst [smem:[#allocation23_spill]] %s3247_s30  ;;  %s3978_s1 = sadd.s32 4294967295, %s3255_s19   ;;  %s3255_s19 = sphi %s3382_s19, %s37_s19   ;;  %s3251_s0 = sphi %s3380_s0, %s4041_s0   ;;  %s3247_s30 = sphi %s3378_s30, %s4040_s30   ;;  %s3243_s29 = sphi %s3376_s29, %s4039_s29   ;;  %s3239_s28 = sphi %s3374_s28, %s4038_s28   ;;  %s3235_s27 = sphi %s3372_s27, %s4037_s27  }
  0x18   : > { %p2380_p0 = scmp.ge.s32.totalorder %s3255_s19, 1  ;;  %p3406_p1 = scmp.eq.s32.totalorder %s3978_s1, 0 }
  0x19   : > { %p470_p2 = scmp.lt.s32.totalorder %s3255_s19, 3  ;;  %s3257_s22 = smov [#allocation8]  }
  0x1a   : > { %s4004_s20 = scalar_select %p3406_p1, 1, 0 }
  0x1b   : > { %p3411_p3 = pnand %p2380_p0, %p470_p2  ;;  %s488_s2 = sshll.u32 %s3257_s22, 4  ;;  %s3415_s2 = int_to_ptr.vmem [resolvable:$true] %s488_s2 }
  0x1c   : > { %s3258_s24 = smov [#allocation11]   ;;  %s3259_s26 = smov [#allocation14]  }
  0x1d   : > { %s4005_s21 = scalar_select %p3411_p3, 1, 0 }
  0x1e   : > { %p2730_p4 = pneg %p3411_p3  ;;  %s520_s25 = sshll.u32 %s3258_s24, 4  ;;  %s3426_s25 = int_to_ptr.vmem [resolvable:$true] %s520_s25 }
  0x1f   : > { %s3428_s1 = sshll.u32 %s3259_s26, 4  ;;  %s4007_s4 = sld [smem:[#allocation27_spill]]  ;;  %s559_s1 = int_to_ptr.vmem [resolvable:$true] %s3428_s1 }
  0x20   : > { %p3422_p6 = pnand %p2730_p4, %p3406_p1 }
  0x22   : > { %p3438_p8 = pneg %p3422_p6 }
  0x25   : > { %s2963_s17 = scalar_lea.hbm %s4007_s4, 1024 }
  0x26   : > { %p2964_p7 = scmp.ne.s32.totalorder %s4007_s4, %s2963_s17  ;;  %p2970_p11 = scmp.lt.u32.totalorder %s2963_s17, %s4007_s4 }
  0x28   : > { %p2966_p9 = pnand %p3438_p8, %p2964_p7 }
  0x2a   : > { %p2967_p10 = pneg %p2966_p9 }
  0x2c   : > { %p2972_p12 = pnand %p2970_p11, %p2967_p10 }
  0x2e   : > { %2975 = shalt.err (!%p2972_p12)
}
  0x2f   : > { %s2976_s13 = scalar_lea.vmem %s3415_s2, 1024  ;;  %p2984_p4 = scmp.lt.s32.totalorder %s3415_s2, %s3415_s2 }
  0x30   : > { %p2977_p13 = scmp.ne.s32.totalorder %s3415_s2, %s2976_s13  ;;  %p2985_p5 = scmp.lt.s32.totalorder %s2976_s13, %s2976_s13 }
  0x32   : > { %p2979_p0 = pnand %p2977_p13, %p3438_p8  ;;  %p2986_p7 = por %p2985_p5, %p2984_p4 }
  0x34   : > { %p2980_p2 = pneg %p2979_p0 }
  0x36   : > { %p2987_p9 = pnand %p2986_p7, %p2980_p2 }
  0x38   : > { %2990 = shalt.err (!%p2987_p9)
}
  0x39   : > { %s3984_s15 = smov 64   ;;  %s3986_s17 = smov 4  }
  0x3a   : > { %2733 = dma.hbm_to_vmem [thread:$0]  (!%p3422_p6), %s4007_s4, 1024, %s3415_s2, [#allocation9], %s3984_s15, %s3984_s15, %s3986_s17  }
  0x3b   : > { %s4009_s8 = sld [smem:[#allocation29_spill]] }
  0x41   : > { %s2991_s13 = scalar_lea.hbm %s4009_s8, 1024 }
  0x42   : > { %p2992_p5 = scmp.ne.s32.totalorder %s4009_s8, %s2991_s13  ;;  %p2998_p12 = scmp.lt.u32.totalorder %s2991_s13, %s4009_s8 }
  0x44   : > { %p2994_p10 = pnand %p2992_p5, %p3438_p8 }
  0x46   : > { %p2995_p11 = pneg %p2994_p10 }
  0x48   : > { %p3000_p13 = pnand %p2998_p12, %p2995_p11 }
  0x4a   : > { %3003 = shalt.err (!%p3000_p13)
}
  0x4b   : > { %s3004_s2 = scalar_lea.vmem %s3426_s25, 1024  ;;  %p3012_p7 = scmp.lt.s32.totalorder %s3426_s25, %s3426_s25 }
  0x4c   : > { %p3005_p0 = scmp.ne.s32.totalorder %s3426_s25, %s3004_s2  ;;  %p3013_p9 = scmp.lt.s32.totalorder %s3004_s2, %s3004_s2 }
  0x4e   : > { %p3007_p2 = pnand %p3005_p0, %p3438_p8  ;;  %p3014_p5 = por %p3013_p9, %p3012_p7 }
  0x50   : > { %p3008_p4 = pneg %p3007_p2 }
  0x52   : > { %p3015_p10 = pnand %p3014_p5, %p3008_p4 }
  0x54   : > { %3018 = shalt.err (!%p3015_p10)
}
  0x55   : > { %2739 = dma.hbm_to_vmem [thread:$0]  (!%p3422_p6), %s4009_s8, 1024, %s3426_s25, [#allocation12], %s3984_s15, %s3984_s15, %s3986_s17  }
  0x56   : > { %s3019_s18 = scalar_lea.hbm %s3972_s14, 2048 }
  0x57   : > { %p3020_p11 = scmp.ne.s32.totalorder %s3972_s14, %s3019_s18  ;;  %p3026_p0 = scmp.lt.u32.totalorder %s3019_s18, %s3972_s14 }
  0x59   : > { %p3022_p12 = pnand %p3020_p11, %p3438_p8 }
  0x5b   : > { %p3023_p13 = pneg %p3022_p12 }
  0x5d   : > { %p3028_p2 = pnand %p3026_p0, %p3023_p13 }
  0x5f   : > { %3031 = shalt.err (!%p3028_p2)
}
  0x60   : > { %s3032_s2 = scalar_lea.vmem %s559_s1, 2048  ;;  %p3040_p5 = scmp.lt.s32.totalorder %s559_s1, %s559_s1 }
  0x61   : > { %p3033_p4 = scmp.ne.s32.totalorder %s559_s1, %s3032_s2  ;;  %p3041_p10 = scmp.lt.s32.totalorder %s3032_s2, %s3032_s2 }
  0x63   : > { %p3035_p7 = pnand %p3033_p4, %p3438_p8  ;;  %p3042_p3 = por %p3041_p10, %p3040_p5 }
  0x65   : > { %p3036_p9 = pneg %p3035_p7 }
  0x67   : > { %p3043_p1 = pnand %p3042_p3, %p3036_p9 }
  0x69   : > { %3046 = shalt.err (!%p3043_p1)
}
  0x6a   : > { %s3988_s25 = smov 128   ;;  %s3263_s5 = smov 8  }
  0x6b   : > { %2745 = dma.hbm_to_vmem [thread:$0]  (!%p3422_p6), %s3972_s14, 2048, %s559_s1, [#allocation15], %s3988_s25, %s3988_s25, %s3263_s5  }
  0x6c   : > { %s3264_s30 = smov [#allocation10]   ;;  %s3265_s22 = smov [#allocation13]  }
  0x6d   : > { %s504_s18 = sshll.u32 %s3264_s30, 4  ;;  %s536_s24 = sshll.u32 %s3265_s22, 4  ;;  %s505_s18 = int_to_ptr.vmem [resolvable:$true] %s504_s18  ;;  %s537_s24 = int_to_ptr.vmem [resolvable:$true] %s536_s24 }
  0x6e   : > { %s3047_s2 = scalar_lea.hbm %s3964_s6, 1024 }
  0x6f   : > { %p3048_p1 = scmp.ne.s32.totalorder %s3964_s6, %s3047_s2  ;;  %p3054_p12 = scmp.lt.u32.totalorder %s3047_s2, %s3964_s6 }
  0x71   : > { %p3050_p3 = pnand %p3048_p1, %p3438_p8 }
  0x73   : > { %p3051_p11 = pneg %p3050_p3 }
  0x75   : > { %p3056_p13 = pnand %p3054_p12, %p3051_p11 }
  0x77   : > { %3059 = shalt.err (!%p3056_p13)
}
  0x78   : > { %s3060_s1 = scalar_lea.vmem %s505_s18, 1024  ;;  %p3068_p7 = scmp.lt.s32.totalorder %s505_s18, %s505_s18 }
  0x79   : > { %p3061_p0 = scmp.ne.s32.totalorder %s505_s18, %s3060_s1  ;;  %p3069_p9 = scmp.lt.s32.totalorder %s3060_s1, %s3060_s1 }
  0x7b   : > { %p3063_p2 = pnand %p3061_p0, %p3438_p8  ;;  %p3070_p5 = por %p3069_p9, %p3068_p7 }
  0x7d   : > { %p3064_p4 = pneg %p3063_p2 }
  0x7f   : > { %p3071_p10 = pnand %p3070_p5, %p3064_p4 }
  0x81   : > { %3074 = shalt.err (!%p3071_p10)
}
  0x82   : > { %s4010_s15 = smov 4   ;;  %s4011_s17 = smov 64  }
  0x83   : > { %2736 = dma.hbm_to_vmem [thread:$0]  (!%p3422_p6), %s3964_s6, 1024, %s505_s18, [#allocation9], %s4011_s17, %s4011_s17, %s4010_s15  }
  0x84   : > { %s3075_s30 = scalar_lea.hbm %s3968_s10, 1024 }
  0x85   : > { %p3076_p1 = scmp.ne.s32.totalorder %s3968_s10, %s3075_s30  ;;  %p3082_p12 = scmp.lt.u32.totalorder %s3075_s30, %s3968_s10 }
  0x87   : > { %p3078_p3 = pnand %p3076_p1, %p3438_p8 }
  0x89   : > { %p3079_p11 = pneg %p3078_p3 }
  0x8b   : > { %p3084_p13 = pnand %p3082_p12, %p3079_p11 }
  0x8d   : > { %3087 = shalt.err (!%p3084_p13)
}
  0x8e   : > { %s3088_s1 = scalar_lea.vmem %s537_s24, 1024  ;;  %p3096_p7 = scmp.lt.s32.totalorder %s537_s24, %s537_s24 }
  0x8f   : > { %p3089_p0 = scmp.ne.s32.totalorder %s537_s24, %s3088_s1  ;;  %p3097_p9 = scmp.lt.s32.totalorder %s3088_s1, %s3088_s1 }
  0x91   : > { %p3091_p2 = pnand %p3089_p0, %p3438_p8  ;;  %p3098_p5 = por %p3097_p9, %p3096_p7 }
  0x93   : > { %p3092_p4 = pneg %p3091_p2 }
  0x95   : > { %p3099_p10 = pnand %p3098_p5, %p3092_p4 }
  0x97   : > { %3102 = shalt.err (!%p3099_p10)
}
  0x98   : > { %2742 = dma.hbm_to_vmem [thread:$0]  (!%p3422_p6), %s3968_s10, 1024, %s537_s24, [#allocation12], %s4011_s17, %s4011_s17, %s4010_s15  }
  0x99   : > { %s3266_s8 = smov [#allocation16]   ;;  %s3103_s22 = scalar_lea.hbm %s3974_s16, 2048 }
  0x9a   : > { %s574_s9 = sshll.u32 %s3266_s8, 4  ;;  %p3104_p1 = scmp.ne.s32.totalorder %s3974_s16, %s3103_s22  ;;  %s575_s9 = int_to_ptr.vmem [resolvable:$true] %s574_s9 }
  0x9b   : > { %p3110_p12 = scmp.lt.u32.totalorder %s3103_s22, %s3974_s16 }
  0x9c   : > { %p3106_p3 = pnand %p3104_p1, %p3438_p8 }
  0x9e   : > { %p3107_p11 = pneg %p3106_p3 }
  0xa0   : > { %p3112_p13 = pnand %p3110_p12, %p3107_p11 }
  0xa2   : > { %3115 = shalt.err (!%p3112_p13)
}
  0xa3   : > { %s3116_s24 = scalar_lea.vmem %s575_s9, 2048  ;;  %p3124_p7 = scmp.lt.s32.totalorder %s575_s9, %s575_s9 }
  0xa4   : > { %p3117_p0 = scmp.ne.s32.totalorder %s575_s9, %s3116_s24  ;;  %p3125_p9 = scmp.lt.s32.totalorder %s3116_s24, %s3116_s24 }
  0xa6   : > { %p3119_p2 = pnand %p3117_p0, %p3438_p8  ;;  %p3126_p5 = por %p3125_p9, %p3124_p7 }
  0xa8   : > { %p3120_p4 = pneg %p3119_p2 }
  0xaa   : > { %p3127_p10 = pnand %p3126_p5, %p3120_p4 }
  0xac   : > { %3130 = shalt.err (!%p3127_p10)
}
  0xad   : > { %2748 = dma.hbm_to_vmem [thread:$0]  (!%p3422_p6), %s3974_s16, 2048, %s575_s9, [#allocation15], %s4011_s17, %s4011_s17, %s4010_s15  }
  0xae   : > { %s2379_s12 = sadd.s32 4294967294, %s3255_s19   ;;  %s49_s23 = sadd.s32 1, %s3251_s0 }
  0xaf   : > { %p51_p8 = scmp.ge.s32.totalorder %s49_s23, 2  ;;  %s56_s8 = sadd.s32 1, %s3243_s29 }
  0xb0   : > { %p63_p1 = scmp.ne.s32.totalorder %s3243_s29, %s3239_s28  ;;  %p64_p3 = scmp.eq.s32.totalorder %s3255_s19, 0 }
  0xb1   : > { %s4043_s23 = smov (%p51_p8, %s49_s23), 0  ;;  %p69_p12 = scmp.ne.s32.totalorder %s3239_s28, %s3235_s27 }
  0xb2   : > { %p3581_p11 = por %p64_p3, %p63_p1  ;;  %s53_s15 = ssub.s32 %s3251_s0, %s4043_s23 }
  0xb3   : > { %s4013_s17 = sadd.s32 4294967295, %s3255_s19   ;;  %p54_p13 = scmp.eq.s32.totalorder %s53_s15, 0 }
  0xb4   : > { %p457_p6 = scmp.eq.s32.totalorder %s4013_s17, 1  ;;  %p4014_p0 = scmp.ne.s32.totalorder %s4004_s20, 0 }
  0xb5   : > { %p463_p7 = scmp.eq.s32.totalorder %s2379_s12, 1  ;;  %p2763_p5 = scmp.lt.s32.totalorder %s3255_s19, 2 }
  0xb6   : > { %p3593_p2 = por %p4014_p0, %p69_p12  ;;  %p3597_p4 = por %p457_p6, %p63_p1 }
  0xb7   : > { %s3602_s22 = scalar_select %p54_p13, %s3243_s29, %s56_s8  }
  0xb8   : > { %s4016_s30 = scalar_select %p3597_p4, 1, 0 }
  0xb9   : > { %p3604_p9 = por %p463_p7, %p69_p12  ;;  %s591_s13 = sand.u32 1, %s3243_s29  }
  0xba   : > { %s2484_s2 = sshll.u32 %s3251_s0, 8  ;;  %s2388_s1 = sshll.u32 %s591_s13, 4 }
  0xbb   : > { %s4017_s26 = scalar_select %p3604_p9, 1, 0 }
  0xbc   : > { %s4018_s4 = sld [smem:[#allocation24_spill]]  ;;  %s595_s12 = scalar_lea.vmem [#allocation5], %s2388_s1 }
  0xbd   : > { %s602_s8 = sshll.u32 %s595_s12, 4  ;;  %p3618_p10 = pnand %p2763_p5, %p3581_p11  ;;  %s3622_s8 = int_to_ptr.vmem [resolvable:$true] %s602_s8 }
  0xbe   : > { %s3624_s25 = scalar_lea.sflag [#allocation6], %s591_s13 }
  0xbf   : > { %p3133_p1 = pneg %p3618_p10 }
  0xc2   : > { %s3614_s15 = scalar_lea.hbm %s4018_s4, %s2484_s2  ;;  %s3136_s1 = scalar_lea.hbm %s4018_s4, 512 }
  0xc3   : > { %s3131_s24 = scalar_lea.hbm %s3614_s15, 256  ;;  %p3137_p11 = scmp.lt.u32.totalorder %s3614_s15, %s4018_s4 }
  0xc4   : > { %p3132_p8 = scmp.ne.s32.totalorder %s3614_s15, %s3131_s24  ;;  %p3138_p6 = scmp.lt.u32.totalorder %s3136_s1, %s3131_s24 }
  0xc5   : > { %p3140_p0 = scmp.lt.u32.totalorder %s3131_s24, %s3614_s15 }
  0xc6   : > { %p3134_p3 = pnand %p3133_p1, %p3132_p8  ;;  %p3139_p13 = por %p3138_p6, %p3137_p11 }
  0xc8   : > { %p3135_p12 = pneg %p3134_p3  ;;  %p3141_p7 = por %p3140_p0, %p3139_p13 }
  0xca   : > { %p3142_p5 = pnand %p3141_p7, %p3135_p12 }
  0xcc   : > { %3145 = shalt.err (!%p3142_p5)
}
  0xcd   : > { %s3146_s13 = scalar_lea.vmem %s3622_s8, 256  ;;  %s3267_s2 = smov [#allocation5]  }
  0xce   : > { %p3147_p8 = scmp.ne.s32.totalorder %s3622_s8, %s3146_s13  ;;  %s3151_s11 = sshll.u32 %s3267_s2, 4  ;;  %s3152_s11 = int_to_ptr.vmem [resolvable:$false] %s3151_s11 }
  0xcf   : > { %s3153_s18 = scalar_lea.vmem %s3152_s11, 512  ;;  %p3154_p4 = scmp.lt.s32.totalorder %s3622_s8, %s3152_s11 }
  0xd0   : > { %p3149_p3 = pnand %p3147_p8, %p3133_p1  ;;  %p3155_p11 = scmp.lt.s32.totalorder %s3153_s18, %s3146_s13 }
  0xd2   : > { %p3150_p9 = pneg %p3149_p3  ;;  %p3156_p6 = por %p3155_p11, %p3154_p4 }
  0xd4   : > { %p3157_p13 = pnand %p3156_p6, %p3150_p9 }
  0xd6   : > { %3160 = shalt.err (!%p3157_p13)
}
  0xd7   : > { %s4020_s24 = smov 128   ;;  %p4021_p1 = scmp.ne.s32.totalorder %s4005_s21, 0 }
  0xd8   : > { %2752 = dma.hbm_to_vmem [thread:$0]  (!%p3618_p10), %s3614_s15, 256, %s3622_s8, %s3624_s25, %s4020_s24, %s4020_s24, %s3263_s5  }
  0xd9   : > { %620 = sbr.rel (%p4021_p1) target bundleno = 4421 (0x1145), region = 92  ;;  %s3658_s1 = sand.u32 (!%p4021_p1), 1, %s3239_s28  }
  0xda   : > { %s2392_s12 = sshll.u32 (!%p4021_p1), %s3658_s1, 4  ;;  %s623_s13 = scalar_lea.sflag (!%p4021_p1), [#allocation6], %s3658_s1 }
  0xdb   : > { %s3664_s17 = scalar_lea.vmem (!%p4021_p1), [#allocation5], %s2392_s12 }
  0xe0   : > { %3214 = dma.done.wait (%p3593_p2), %s623_s13, 256  }
  0xe1   : > { %3216 = vsyncadd (%p3593_p2), %s623_s13, 4294967040  ;;  %p4022_p4 = scmp.ne.s32.totalorder %s4004_s20, 0 }
  0xe3   : > { %3218 = dma.done.wait (%p4022_p4), [#allocation9], 2048  }
  0xe4   : > { %3220 = vsyncadd (%p4022_p4), [#allocation9], 4294965248 }
  0xe5   : > { %3222 = dma.done.wait (%p4022_p4), [#allocation12], 2048  }
  0xe6   : > { %3224 = vsyncadd (%p4022_p4), [#allocation12], 4294965248 }
  0xe7   : > { %3226 = dma.done.wait (%p4022_p4), [#allocation15], 4096  }
  0xe8   : > { %3228 = vsyncadd (%p4022_p4), [#allocation15], 4294963200  ;;  %v717_v0 = vld [vmem:[%s3664_s17] sm:$0xff]  ;;  %v718_v1 = vld [vmem:[%s3664_s17 + $0x8] sm:$0xff]  ;;  %v3268_v5 = vmov 0.0   ;;  %vm3269_vm0 = vmmov 0  }
  0xe9   : > { %719 = vadd.xlane.f32.xlu0 %v717_v0  ;;  %1038 = vadd.xlane.f32.xlu1 %v717_v0  ;;  %v2837_v2 = vld [vmem:[#allocation10] sm:$0xff]   ;;  %v2839_v4 = vld [vmem:[#allocation10 + $0x8] sm:$0xff]   ;;  %v2841_v23 = vld [vmem:[#allocation10 + $0x10] sm:$0xff]   ;;  %s4023_s25 = sld [smem:[#allocation26_spill]]  ;;  %s4024_s18 = sld [smem:[#allocation30_spill]]  ;;  %vm1023_vm1 = vcmask 130048  }
  0xea   : > { %v2838_v3 = vld [vmem:[#allocation11] sm:$0xff]   ;;  %2566 = vmatprep.subr.bf16.mxu0 %v3268_v5  ;;  %2586 = vmatprep.subr.bf16.mxu1 %v3268_v5  ;;  %v2840_v22 = vld [vmem:[#allocation11 + $0x8] sm:$0xff]   ;;  %v2842_v24 = vld [vmem:[#allocation11 + $0x10] sm:$0xff]   ;;  %s4025_s20 = sld [smem:[#allocation28_spill]]  ;;  %s4026_s21 = sld [smem:[#allocation23_spill]]  ;;  %vm1203_vm2 = vcmask 261120  }
  0xeb   : > { %2567 = vmatpush3.bf16.msra.mxu0 %v2837_v2  ;;  %2587 = vmatpush3.bf16.msra.mxu1 %v2838_v3  ;;  %v2843_v25 = vld [vmem:[#allocation10 + $0x18] sm:$0xff]   ;;  %v2845_v27 = vld [vmem:[#allocation10 + $0x20] sm:$0xff]   ;;  %v2847_v29 = vld [vmem:[#allocation10 + $0x28] sm:$0xff]   ;;  %s4027_s15 = sld [smem:[#allocation25_spill]]  ;;  %s3270_s2 = smov 96   ;;  %vm1444_vm4 = vcmask 523520  }
  0xec   : > { %2568 = vmatprep.subr.bf16.mxu0 %v3268_v5  ;;  %2588 = vmatprep.subr.bf16.mxu1 %v3268_v5  ;;  %v2844_v26 = vld [vmem:[#allocation11 + $0x18] sm:$0xff]   ;;  %v2846_v28 = vld [vmem:[#allocation11 + $0x20] sm:$0xff]   ;;  %v2848_v30 = vld [vmem:[#allocation11 + $0x28] sm:$0xff]   ;;  %s3271_s11 = smov 32   ;;  %vm1571_vm5 = vcmask 785920   ;;  %vm1698_vm6 = vcmask 1048320  }
  0xed   : > { %721 = vadd.xlane.f32.xlu0 %v718_v1  ;;  %1040 = vadd.xlane.f32.xlu1 %v718_v1  ;;  %v2849_v31 = vld [vmem:[#allocation10 + $0x30] sm:$0xff]   ;;  %v2851_v33 = vld [vmem:[#allocation10 + $0x38] sm:$0xff]   ;;  %v2853_v54 = vld [vmem:[#allocation8] sm:$0xff]   ;;  %s4029_s5 = sld [smem:[#allocation32_spill]]  ;;  %p4034_p10 = scmp.ne.s32.totalorder %s4016_s30, 0 }
  0xee   : > { %v2850_v32 = vld [vmem:[#allocation11 + $0x30] sm:$0xff]   ;;  %v2852_v34 = vld [vmem:[#allocation11 + $0x38] sm:$0xff]   ;;  %2582 = vmatprep.mubr.msk.bf16.mxu0 %vm3269_vm0, %v3268_v5  ;;  %2602 = vmatprep.mubr.msk.bf16.mxu1 %vm3269_vm0, %v3268_v5  ;;  %v2854_v58 = vld [vmem:[#allocation8 + $0x8] sm:$0xff]  }
  0xef   : > { %2569 = vmatpush3.bf16.msra.mxu0 %v2839_v4  ;;  %2589 = vmatpush3.bf16.msra.mxu1 %v2840_v22  ;;  %v2486_v43 = vld [vmem:[%s4023_s25] ss:$0 sm:$0xff]  ;;  %v2855_v60 = vld [vmem:[#allocation8 + $0x10] sm:$0xff]   ;;  %v2857_v62 = vld [vmem:[#allocation8 + $0x20] sm:$0xff]  }
  0xf0   : > { %2570 = vmatprep.subr.bf16.mxu0 %v3268_v5  ;;  %2590 = vmatprep.subr.bf16.mxu1 %v3268_v5  ;;  %v2487_v47 = vld [vmem:[%s3961_s3] ss:$0 sm:$0xff]  ;;  %v2859_v4 = vld [vmem:[#allocation8 + $0x30] sm:$0xff]   ;;  %p706_p2 = scmp.lt.s32.totalorder %s4026_s21, 1 }
  0xf1   : > { %v2856_v61 = vld [vmem:[#allocation8 + $0x18] sm:$0xff]  }
  0xf2   : > { %s707_s25 = scalar_select %p706_p2, %s4026_s21, 1 }
  0xf3   : > { %2571 = vmatpush3.bf16.msra.mxu0 %v2841_v23  ;;  %2591 = vmatpush3.bf16.msra.mxu1 %v2842_v24 }
  0xf4   : > { %2572 = vmatprep.subr.bf16.mxu0 %v3268_v5  ;;  %2592 = vmatprep.subr.bf16.mxu1 %v3268_v5  ;;  %s708_s8 = scalar_lea.vmem %s4027_s15, %s707_s25 }
  0xf7   : > { %2573 = vmatpush3.bf16.msra.mxu0 %v2843_v25  ;;  %2593 = vmatpush3.bf16.msra.mxu1 %v2844_v26 }
  0xf8   : > { %2574 = vmatprep.subr.bf16.mxu0 %v3268_v5  ;;  %2594 = vmatprep.subr.bf16.mxu1 %v3268_v5 }
  0xfb   : > { %2575 = vmatpush3.bf16.msra.mxu0 %v2845_v27  ;;  %2595 = vmatpush3.bf16.msra.mxu1 %v2846_v28  ;;  %v2418_v27 = vld [vmem:[%s4025_s20] ss:$0 sm:$0xff]  ;;  %s4028_s20 = sld [smem:[#allocation31_spill]] }
  0xfc   : > { %2576 = vmatprep.subr.bf16.mxu0 %v3268_v5  ;;  %2596 = vmatprep.subr.bf16.mxu1 %v3268_v5 }
  0xff   : > { %2577 = vmatpush3.bf16.msra.mxu0 %v2847_v29  ;;  %2597 = vmatpush3.bf16.msra.mxu1 %v2848_v30 }
 0x100   : > { %2578 = vmatprep.subr.bf16.mxu0 %v3268_v5  ;;  %2598 = vmatprep.subr.bf16.mxu1 %v3268_v5 }
 0x103   : > { %2579 = vmatpush3.bf16.msra.mxu0 %v2849_v31  ;;  %2599 = vmatpush3.bf16.msra.mxu1 %v2850_v32 }
 0x104   : > { %2580 = vmatprep.subr.bf16.mxu0 %v3268_v5  ;;  %2600 = vmatprep.subr.bf16.mxu1 %v3268_v5 }
 0x107   : > { %2581 = vmatpush3.bf16.msra.mxu0 %v2851_v33  ;;  %2601 = vmatpush3.bf16.msra.mxu1 %v2852_v34 }
 0x108   : > { %2606 = vmatprep.subr.bf16.mxu0 %v3268_v5  ;;  %2626 = vmatprep.subr.bf16.mxu1 %v3268_v5 }
 0x176   : > { %v720_v6 = vpop.xlane.xlu0 %719  ;;  %v1039_v7 = vpop.xlane.xlu1 %1038 }
 0x177   : > { %v724_v8 = vmul.f32 0.0078125, %v720_v6  ;;  %v1043_v9 = vmul.f32 0.0078125, %v1039_v7 }
 0x179   : > { %v3689_v10 = vsub.f32 %v717_v0, %v724_v8  ;;  %v3691_v11 = vsub.f32 %v717_v0, %v1043_v9  ;;  %v2860_v8 = vld [vmem:[#allocation8 + $0x38] sm:$0xff]  }
 0x17a   : > { %v722_v12 = vpop.xlane.xlu0 %721  ;;  %v1041_v13 = vpop.xlane.xlu1 %1040 }
 0x17b   : > { %v725_v14 = vmul.f32 0.0078125, %v722_v12  ;;  %v728_v15 = vmul.f32 %v3689_v10, %v3689_v10  ;;  %v1044_v16 = vmul.f32 0.0078125, %v1041_v13  ;;  %v1047_v19 = vmul.f32 %v3691_v11, %v3691_v11 }
 0x17d   : > { %v3695_v17 = vsub.f32 %v718_v1, %v725_v14  ;;  %730 = vadd.xlane.f32.xlu0 %v728_v15  ;;  %v3697_v18 = vsub.f32 %v718_v1, %v1044_v16  ;;  %v2858_v1 = vld [vmem:[#allocation8 + $0x28] sm:$0xff]   ;;  %v2409_v14 = vld [vmem:[%s4024_s18] ss:$0 sm:$0xff]  ;;  %s3272_s18 = smov 64  }
 0x17f   : > { %v729_v20 = vmul.f32 %v3695_v17, %v3695_v17  ;;  %v1048_v21 = vmul.f32 %v3697_v18, %v3697_v18 }
 0x181   : > { %1049 = vadd.xlane.f32.xlu0 %v1047_v19  ;;  %732 = vadd.xlane.f32.xlu1 %v729_v20 }
 0x185   : > { %1051 = vadd.xlane.f32.xlu1 %v1048_v21 }
 0x20a   : > { %v731_v35 = vpop.xlane.xlu0 %730 }
 0x20b   : > { %v734_v36 = vmul.f32 0.0078125, %v731_v35 }
 0x20d   : > { %v736_v37 = vadd.f32 1e-06, %v734_v36 }
 0x20e   : > { %v733_v38 = vpop.xlane.xlu1 %732  ;;  %v1050_v50 = vpop.xlane.xlu0 %1049 }
 0x20f   : > { %2909 = vrsqrt.f32 %v736_v37  ;;  %v735_v39 = vmul.f32 0.0078125, %v733_v38  ;;  %v1053_v56 = vmul.f32 0.0078125, %v1050_v50 }
 0x211   : > { %v737_v40 = vadd.f32 1e-06, %v735_v39  ;;  %v1055_v59 = vadd.f32 1e-06, %v1053_v56 }
 0x212   : > { %v1052_v48 = vpop.xlane.xlu1 %1051 }
 0x213   : > { %2911 = vrsqrt.f32 %v737_v40  ;;  %v1054_v53 = vmul.f32 0.0078125, %v1052_v48 }
 0x215   : > { %v1056_v57 = vadd.f32 1e-06, %v1054_v53 }
 0x217   : > { %2913 = vrsqrt.f32 %v1056_v57 }
 0x218   : > { %2915 = vrsqrt.f32 %v1055_v59 }
 0x219   : > { %v2910_v41 = vpop.eup %2909 }
 0x21a   : > { %v740_v42 = vmul.f32 %v2910_v41, %v3689_v10 }
 0x21c   : > { %v748_v46 = vmul.f32 %v2486_v43, %v740_v42 }
 0x21d   : > { %v2912_v44 = vpop.eup %2911 }
 0x21e   : > { %v741_v45 = vmul.f32 %v2912_v44, %v3695_v17  ;;  %v756_v51 = vadd.f32 %v2487_v47, %v748_v46  ;;  %v1191_v44 = vld [vmem:[%s708_s8] sm:$0x1]  ;;  %s4030_s8 = sld [smem:[#allocation33_spill]] }
 0x21f   : > { %vm1192_vm3 = vcmp.ne.s32.totalorder %v1191_v44, 0 }
 0x220   : > { %v749_v49 = vmul.f32 %v2486_v43, %v741_v45 }
 0x221   : > { %v2914_v63 = vpop.eup %2913 }
 0x222   : > { %v757_v52 = vadd.f32 %v2487_v47, %v749_v49  ;;  %v2916_v0 = vpop.eup %2915  ;;  %v1060_v2 = vmul.f32 %v2914_v63, %v3697_v18 }
 0x223   : > { %v1059_v3 = vmul.f32 %v2916_v0, %v3691_v11  ;;  %v2400_v11 = vld [vmem:[%s3965_s7] ss:$0 sm:$0xff] }
 0x224   : > { %v758_v55 = vpack.c.bf16 %v757_v52, %v756_v51  ;;  %v1068_v6 = vmul.f32 %v2486_v43, %v1060_v2 }
 0x225   : > { %v1067_v7 = vmul.f32 %v2486_v43, %v1059_v3  ;;  %v743_v43 = vlaneseq }
 0x226   : > { %2583 = vmatmul.mubr.bf16.vlgmr.msra.gmra.mrb[0].mxu0 %v758_v55  ;;  %2603 = vmatmul.mubr.bf16.vlgmr.msra.gmra.mrb[0].mxu1 %v758_v55  ;;  %v1076_v9 = vadd.f32 %v2487_v47, %v1068_v6 }
 0x227   : > { %2607 = vmatpush3.bf16.msra.mxu0 %v2853_v54  ;;  %2622 = vmatprep.mubr.msk.bf16.mxu0 %vm3269_vm0, %v3268_v5  ;;  %v1075_v10 = vadd.f32 %v2487_v47, %v1067_v7  ;;  %v3774_v45 = vshrl.u32 %v743_v43, 7  ;;  %v1193_v47 = vsel %vm1192_vm3, -1e+18, %v3268_v5 }
 0x228   : > { %2608 = vmatprep.subr.bf16.mxu0 %v3268_v5  ;;  %2630 = vmatprep.mubr.msk.bf16.mxu1 %vm3269_vm0, %v3268_v5 }
 0x229   : > { %v1077_v12 = vpack.c.bf16 %v1076_v9, %v1075_v10  ;;  %v745_v46 = vsub.s32 0, %v3774_v45 }
 0x22b   : > { %2609 = vmatpush3.bf16.msra.mxu0 %v2854_v58  ;;  %v3780_v48 = vrot.slane %v1193_v47, %v745_v46 }
 0x22c   : > { %2610 = vmatprep.subr.bf16.mxu0 %v3268_v5 }
 0x22f   : > { %2611 = vmatpush3.bf16.msra.mxu0 %v2855_v60 }
 0x230   : > { %2612 = vmatprep.subr.bf16.mxu0 %v3268_v5 }
 0x233   : > { %2613 = vmatpush3.bf16.msra.mxu0 %v2856_v61 }
 0x234   : > { %2614 = vmatprep.subr.bf16.mxu0 %v3268_v5 }
 0x237   : > { %2615 = vmatpush3.bf16.msra.mxu0 %v2857_v62 }
 0x238   : > { %2616 = vmatprep.subr.bf16.mxu0 %v3268_v5 }
 0x23b   : > { %2617 = vmatpush3.bf16.msra.mxu0 %v2858_v1 }
 0x23c   : > { %2618 = vmatprep.subr.bf16.mxu0 %v3268_v5 }
 0x23f   : > { %2619 = vmatpush3.bf16.msra.mxu0 %v2859_v4 }
 0x240   : > { %2620 = vmatprep.subr.bf16.mxu0 %v3268_v5 }
 0x243   : > { %2621 = vmatpush3.bf16.msra.mxu0 %v2860_v8 }
 0x244   : > { %2682 = vmatprep.subr.bf16.mxu0 %v3268_v5 }
 0x246   : > { %2623 = vmatmul.mubr.bf16.vlgmr.msra.gmra.mrb[4].mxu0 %v1077_v12 }
 0x247   : > { %2698 = vmatprep.mubr.msk.bf16.mxu0 %vm3269_vm0, %v3268_v5 }
 0x2f9   : > { %v864_v13 = vpop.f32.mrb[0].mxu0  ;;  %v976_v15 = vpop.f32.mrb[0].mxu1 }
 0x2fa   : > { %v865_v16 = vadd.f32 %v2400_v11, %v864_v13  ;;  %v2584_v17 = vpop.f32.mrb[1].mxu0  ;;  %v2604_v18 = vpop.f32.mrb[1].mxu1  ;;  %v977_v21 = vadd.f32 %v2409_v14, %v976_v15 }
 0x2fb   : > { %v867_v19 = vpop.f32.mrb[2].mxu0  ;;  %v979_v20 = vpop.f32.mrb[2].mxu1 }
 0x2fc   : > { %v980_v22 = vadd.f32 %v2409_v14, %v979_v20  ;;  %v2605_v23 = vpop.f32.mrb[3].mxu1  ;;  %983 = vxpose.xlu0.b32.start [1/2] (short) %v865_v16, 128  ;;  %v2585_v24 = vpop.f32.mrb[3].mxu0  ;;  %v868_v25 = vadd.f32 %v2400_v11, %v867_v19 }
 0x2fe   : > { %v3752_v26 = vpack.c.bf16 %v980_v22, %v977_v21 }
 0x300   : > { %984 = vxpose.xlu0.b32.end [2/2] (short) %v868_v25, 128 }
 0x319   : > { %v1183_v28 = vpop.f32.mrb[4].mxu0 }
 0x31a   : > { %v2624_v29 = vpop.f32.mrb[5].mxu0  ;;  %v1184_v31 = vadd.f32 %v2418_v27, %v1183_v28 }
 0x31b   : > { %v1186_v30 = vpop.f32.mrb[6].mxu0 }
 0x31c   : > { %v1187_v32 = vadd.f32 %v2418_v27, %v1186_v30  ;;  %v2625_v33 = vpop.f32.mrb[7].mxu0 }
 0x31e   : > { %v3757_v34 = vpack.c.bf16 %v1187_v32, %v1184_v31 }
 0x37c   : > { %v999_v35 = vpop.trf.xlu0 }
 0x380   : > { %v1000_v36 = vpop.trf.xlu0 }
 0x381   : > { %v1015_v37 = vpack.c.bf16 %v1000_v36, %v999_v35 }
 0x383   : > { %1024 = vst.msk [vmem:[#allocation2] sm:$0xff] %vm1023_vm1, %v1015_v37 }
 0x384   : > { %v1001_v38 = vpop.trf.xlu0 }
 0x388   : > { %v1002_v39 = vpop.trf.xlu0 }
 0x389   : > { %v1016_v40 = vpack.c.bf16 %v1002_v39, %v1001_v38 }
 0x38a   : > { %v1200_v41 = vld [vmem:[#allocation2] sm:$0xff] }
 0x38b   : > { %1025 = vst.msk [vmem:[#allocation2 + $0x8] sm:$0xff] %vm1023_vm1, %v1016_v40  ;;  %2627 = vmatpush3.bf16.msra.mxu1 %v1200_v41 }
 0x38c   : > { %2628 = vmatprep.subr.bf16.mxu1 %v3268_v5  ;;  %v1003_v3 = vpop.trf.xlu0 }
 0x390   : > { %v1004_v4 = vpop.trf.xlu0 }
 0x391   : > { %v1017_v6 = vpack.c.bf16 %v1004_v4, %v1003_v3 }
 0x392   : > { %v1201_v42 = vld [vmem:[#allocation2 + $0x8] sm:$0xff] }
 0x393   : > { %2629 = vmatpush3.bf16.msra.mxu1 %v1201_v42  ;;  %1026 = vst.msk [vmem:[#allocation2 + $0x10] sm:$0xff] %vm1023_vm1, %v1017_v6 }
 0x394   : > { %2634 = vmatprep.subr.bf16.mxu1 %v3268_v5  ;;  %v1005_v7 = vpop.trf.xlu0 }
 0x396   : > { %2631 = vmatmul.mubr.msk.bf16.vlgmr.msra.gmra.mrb[4].mxu1 %vm1203_vm2, %v3757_v34 }
 0x397   : > { %2635 = vmatpush3.bf16.msra.mxu1 %v3752_v26  ;;  %2636 = vmatprep.mubr.msk.bf16.mxu1 %vm3269_vm0, %v3268_v5 }
 0x398   : > { %2640 = vmatprep.subr.bf16.mxu1 %v3268_v5  ;;  %v1006_v8 = vpop.trf.xlu0 }
 0x399   : > { %v1018_v9 = vpack.c.bf16 %v1006_v8, %v1005_v7 }
 0x39a   : > { %v1318_v17 = vld [vmem:[#allocation2 + $0x10] sm:$0xff] }
 0x39b   : > { %1027 = vst.msk [vmem:[#allocation2 + $0x18] sm:$0xff] %vm1023_vm1, %v1018_v9 }
 0x39c   : > { %v1007_v20 = vpop.trf.xlu0 }
 0x3a0   : > { %v1008_v21 = vpop.trf.xlu0 }
 0x3a1   : > { %v1019_v22 = vpack.c.bf16 %v1008_v21, %v1007_v20 }
 0x3a2   : > { %v1319_v18 = vld [vmem:[#allocation2 + $0x18] sm:$0xff] }
 0x3a3   : > { %1028 = vst.msk [vmem:[#allocation2 + $0x20] sm:$0xff] %vm1023_vm1, %v1019_v22 }
 0x3a4   : > { %v1009_v23 = vpop.trf.xlu0 }
 0x3a8   : > { %v1010_v24 = vpop.trf.xlu0 }
 0x3a9   : > { %v1020_v25 = vpack.c.bf16 %v1010_v24, %v1009_v23 }
 0x3aa   : > { %v1446_v4 = vld [vmem:[#allocation2 + $0x20] sm:$0xff] }
 0x3ab   : > { %1029 = vst.msk [vmem:[#allocation2 + $0x28] sm:$0xff] %vm1023_vm1, %v1020_v25 }
 0x3ac   : > { %v1011_v27 = vpop.trf.xlu0 }
 0x3b0   : > { %v1012_v28 = vpop.trf.xlu0 }
 0x3b1   : > { %v1021_v29 = vpack.c.bf16 %v1012_v28, %v1011_v27 }
 0x3b3   : > { %1030 = vst.msk [vmem:[#allocation2 + $0x30] sm:$0xff] %vm1023_vm1, %v1021_v29 }
 0x3b4   : > { %v1013_v30 = vpop.trf.xlu0 }
 0x3b8   : > { %v1014_v31 = vpop.trf.xlu0 }
 0x3b9   : > { %v1022_v32 = vpack.c.bf16 %v1014_v31, %v1013_v30 }
 0x3bb   : > { %1031 = vst.msk [vmem:[#allocation2 + $0x38] sm:$0xff] %vm1023_vm1, %v1022_v32 }
 0x469   : > { %v1241_v49 = vpop.f32.mrb[4].mxu1 }
 0x46a   : > { %v1242_v50 = vadd.f32 %v1241_v49, %v3780_v48  ;;  %v2632_v51 = vpop.f32.mrb[5].mxu1 }
 0x46b   : > { %v1244_v52 = vpop.f32.mrb[6].mxu1 }
 0x46c   : > { %v1245_v53 = vadd.f32 %v1244_v52, %v3780_v48  ;;  %v2633_v54 = vpop.f32.mrb[7].mxu1  ;;  %v1249_v55 = vsel %vm1023_vm1, %v1242_v50, -inf }
 0x46d   : > { %1250 = vmax.xlane.f32.xlu1 %v1249_v55 }
 0x46e   : > { %v1252_v56 = vsel %vm1023_vm1, %v1245_v53, -inf }
 0x471   : > { %1253 = vmax.xlane.f32.xlu1 %v1252_v56 }
 0x4fa   : > { %v1251_v57 = vpop.xlane.xlu1 %1250 }
 0x4fb   : > { %v1255_v58 = vsub.f32 %v1242_v50, %v1251_v57 }
 0x4fd   : > { %v1257_v59 = vmul.f32 1.442695, %v1255_v58 }
 0x4fe   : > { %v1254_v60 = vpop.xlane.xlu1 %1253 }
 0x4ff   : > { %2917 = vpow2.f32 %v1257_v59  ;;  %v1256_v61 = vsub.f32 %v1245_v53, %v1254_v60 }
 0x501   : > { %v1259_v62 = vmul.f32 1.442695, %v1256_v61 }
 0x503   : > { %2919 = vpow2.f32 %v1259_v62 }
 0x509   : > { %v2918_v63 = vpop.eup %2917 }
 0x50a   : > { %v1261_v0 = vsel %vm1023_vm1, %v2918_v63, 0.0 }
 0x50b   : > { %1262 = vadd.xlane.f32.xlu1 %v1261_v0 }
 0x50d   : > { %v2920_v1 = vpop.eup %2919 }
 0x50e   : > { %v1264_v2 = vsel %vm1023_vm1, %v2920_v1, 0.0 }
 0x50f   : > { %1265 = vadd.xlane.f32.xlu1 %v1264_v2 }
 0x520   : > { %1322 = vrot.lane.b32.xlu1 %v3757_v34, %s3270_s2 }
 0x598   : > { %v1263_v10 = vpop.xlane.xlu1 %1262 }
 0x599   : > { %2921 = vrcp.f32 %v1263_v10 }
 0x59c   : > { %v1266_v12 = vpop.xlane.xlu1 %1265 }
 0x59d   : > { %2923 = vrcp.f32 %v1266_v12 }
 0x5a0   : > { %v1323_v19 = vpop.permute.xlu1 %1322 }
 0x5a3   : > { %v2922_v11 = vpop.eup %2921 }
 0x5a4   : > { %v1269_v14 = vmul.f32 %v2922_v11, %v2918_v63 }
 0x5a7   : > { %v2924_v13 = vpop.eup %2923 }
 0x5a8   : > { %v1270_v15 = vmul.f32 %v2924_v13, %v2920_v1 }
 0x5aa   : > { %v1271_v16 = vpack.c.bf16 %v1270_v15, %v1269_v14 }
 0x5ac   : > { %2637 = vmatmul.mubr.msk.bf16.vlgmr.msra.gmra.mrb[8].mxu1 %vm1023_vm1, %v1271_v16 }
 0x5ad   : > { %2641 = vmatpush3.bf16.msra.mxu1 %v1318_v17  ;;  %2644 = vmatprep.mubr.msk.bf16.mxu1 %vm3269_vm0, %v3268_v5 }
 0x5ae   : > { %2642 = vmatprep.subr.bf16.mxu1 %v3268_v5 }
 0x5b1   : > { %2643 = vmatpush3.bf16.msra.mxu1 %v1319_v18 }
 0x5b2   : > { %2648 = vmatprep.subr.bf16.mxu1 %v3268_v5 }
 0x5b4   : > { %2645 = vmatmul.mubr.msk.bf16.vlgmr.msra.gmra.mrb[12].mxu1 %vm1203_vm2, %v1323_v19 }
 0x5b5   : > { %2650 = vmatprep.mubr.msk.bf16.mxu1 %vm3269_vm0, %v3268_v5 }
 0x67f   : > { %v1309_v33 = vpop.f32.mrb[8].mxu1 }
 0x680   : > { %v2638_v35 = vpop.f32.mrb[9].mxu1 }
 0x681   : > { %v1312_v36 = vpop.f32.mrb[10].mxu1 }
 0x682   : > { %v1316_v37 = vpack.c.bf16 %v1312_v36, %v1309_v33  ;;  %v2639_v38 = vpop.f32.mrb[11].mxu1 }
 0x684   : > { %1317 = vst.msk [vmem:[#allocation4] sm:$0xff] %vm1203_vm2, %v1316_v37 }
 0x687   : > { %v1361_v39 = vpop.f32.mrb[12].mxu1 }
 0x688   : > { %v1362_v40 = vadd.f32 %v1361_v39, %v3780_v48  ;;  %v2646_v41 = vpop.f32.mrb[13].mxu1 }
 0x689   : > { %v1364_v42 = vpop.f32.mrb[14].mxu1  ;;  %v1574_v41 = vld [vmem:[#allocation2 + $0x38] sm:$0xff] }
 0x68a   : > { %v1365_v43 = vadd.f32 %v1364_v42, %v3780_v48  ;;  %v2647_v44 = vpop.f32.mrb[15].mxu1  ;;  %v1368_v47 = vsel %vm1023_vm1, %v1362_v40, -inf }
 0x68b   : > { %1369 = vmax.xlane.f32.xlu1 %v1368_v47 }
 0x68c   : > { %v1371_v49 = vsel %vm1023_vm1, %v1365_v43, -inf }
 0x68d   : > { %1372 = vmax.xlane.f32.xlu0 %v1371_v49 }
 0x6a3   : > { %1576 = vrot.lane.b32.xlu0 %v3757_v34, %s3271_s11 }
 0x718   : > { %v1370_v50 = vpop.xlane.xlu1 %1369 }
 0x719   : > { %v1374_v51 = vsub.f32 %v1362_v40, %v1370_v50  ;;  %v1573_v40 = vld [vmem:[#allocation2 + $0x30] sm:$0xff] }
 0x71a   : > { %v1373_v52 = vpop.xlane.xlu0 %1372 }
 0x71b   : > { %v1376_v53 = vmul.f32 1.442695, %v1374_v51  ;;  %v1375_v54 = vsub.f32 %v1365_v43, %v1373_v52 }
 0x71d   : > { %2925 = vpow2.f32 %v1376_v53  ;;  %v1378_v55 = vmul.f32 1.442695, %v1375_v54 }
 0x71e   : > { %v1577_v42 = vpop.permute.xlu0 %1576 }
 0x71f   : > { %2927 = vpow2.f32 %v1378_v55 }
 0x727   : > { %v2926_v56 = vpop.eup %2925 }
 0x728   : > { %v1380_v57 = vsel %vm1023_vm1, %v2926_v56, 0.0 }
 0x729   : > { %v2928_v58 = vpop.eup %2927  ;;  %1381 = vadd.xlane.f32.xlu1 %v1380_v57 }
 0x72a   : > { %v1383_v59 = vsel %vm1023_vm1, %v2928_v58, 0.0 }
 0x72d   : > { %1384 = vadd.xlane.f32.xlu1 %v1383_v59 }
 0x73e   : > { %1392 = vrot.lane.b32.xlu1 %v3752_v26, %s3270_s2 }
 0x742   : > { %1449 = vrot.lane.b32.xlu1 %v3757_v34, %s3272_s18  ;;  %v1447_v34 = vld [vmem:[#allocation2 + $0x28] sm:$0xff] }
 0x7b6   : > { %v1382_v60 = vpop.xlane.xlu1 %1381 }
 0x7b7   : > { %2929 = vrcp.f32 %v1382_v60 }
 0x7ba   : > { %v1385_v61 = vpop.xlane.xlu1 %1384 }
 0x7bb   : > { %2931 = vrcp.f32 %v1385_v61 }
 0x7be   : > { %v1393_v62 = vpop.permute.xlu1 %1392 }
 0x7bf   : > { %2649 = vmatpush3.bf16.msra.mxu1 %v1393_v62 }
 0x7c0   : > { %2654 = vmatprep.subr.bf16.mxu1 %v3268_v5 }
 0x7c1   : > { %v2930_v63 = vpop.eup %2929 }
 0x7c2   : > { %v1388_v1 = vmul.f32 %v2930_v63, %v2926_v56  ;;  %v1450_v6 = vpop.permute.xlu1 %1449 }
 0x7c5   : > { %v2932_v0 = vpop.eup %2931 }
 0x7c6   : > { %v1389_v2 = vmul.f32 %v2932_v0, %v2928_v58 }
 0x7c8   : > { %v1390_v3 = vpack.c.bf16 %v1389_v2, %v1388_v1 }
 0x7ca   : > { %2651 = vmatmul.mubr.msk.bf16.vlgmr.msra.gmra.mrb[16].mxu1 %vm1023_vm1, %v1390_v3 }
 0x7cb   : > { %2655 = vmatpush3.bf16.msra.mxu1 %v1446_v4  ;;  %2658 = vmatprep.mubr.msk.bf16.mxu1 %vm3269_vm0, %v3268_v5 }
 0x7cc   : > { %2656 = vmatprep.subr.bf16.mxu1 %v3268_v5 }
 0x7cf   : > { %2657 = vmatpush3.bf16.msra.mxu1 %v1447_v34 }
 0x7d0   : > { %2662 = vmatprep.subr.bf16.mxu1 %v3268_v5 }
 0x7d2   : > { %2659 = vmatmul.mubr.msk.bf16.vlgmr.msra.gmra.mrb[20].mxu1 %vm1203_vm2, %v1450_v6 }
 0x7d3   : > { %2664 = vmatprep.mubr.msk.bf16.mxu1 %vm3269_vm0, %v3268_v5 }
 0x89d   : > { %v3826_v7 = vpop.f32.mrb[16].mxu1 }
 0x89e   : > { %v2652_v8 = vpop.f32.mrb[17].mxu1 }
 0x89f   : > { %v3828_v9 = vpop.f32.mrb[18].mxu1 }
 0x8a0   : > { %v1439_v10 = vpack.c.bf16 %v3828_v9, %v3826_v7  ;;  %v2653_v12 = vpop.f32.mrb[19].mxu1  ;;  %v2861_v7 = vld [vmem:[#allocation13] sm:$0xff]   ;;  %v2862_v9 = vld [vmem:[#allocation13 + $0x8] sm:$0xff]  }
 0x8a1   : > { %2683 = vmatpush3.bf16.msra.mxu0 %v2861_v7 }
 0x8a2   : > { %2684 = vmatprep.subr.bf16.mxu0 %v3268_v5 }
 0x8a5   : > { %v1488_v11 = vpop.f32.mrb[20].mxu1  ;;  %2685 = vmatpush3.bf16.msra.mxu0 %v2862_v9  ;;  %v2444_v9 = vld [vmem:[%s4029_s5] ss:$0 sm:$0xff]  ;;  %s2485_s5 = sshll.u32 %s4026_s21, 8  ;;  %s3274_s21 = smov [#allocation17]  }
 0x8a6   : > { %v1489_v13 = vadd.f32 %v1488_v11, %v3780_v48  ;;  %v2660_v14 = vpop.f32.mrb[21].mxu1  ;;  %2686 = vmatprep.subr.bf16.mxu0 %v3268_v5 }
 0x8a7   : > { %v1491_v15 = vpop.f32.mrb[22].mxu1 }
 0x8a8   : > { %v1492_v16 = vadd.f32 %v1491_v15, %v3780_v48  ;;  %v2661_v17 = vpop.f32.mrb[23].mxu1  ;;  %v1495_v18 = vsel %vm1023_vm1, %v1489_v13, -inf }
 0x8a9   : > { %1496 = vmax.xlane.f32.xlu1 %v1495_v18  ;;  %v2865_v17 = vld [vmem:[#allocation13 + $0x20] sm:$0xff]   ;;  %v2866_v18 = vld [vmem:[#allocation13 + $0x28] sm:$0xff]  }
 0x8aa   : > { %v1498_v19 = vsel %vm1023_vm1, %v1492_v16, -inf }
 0x8ad   : > { %1499 = vmax.xlane.f32.xlu1 %v1498_v19  ;;  %v2867_v19 = vld [vmem:[#allocation13 + $0x30] sm:$0xff]  }
 0x936   : > { %v1497_v20 = vpop.xlane.xlu1 %1496 }
 0x937   : > { %v1501_v21 = vsub.f32 %v1489_v13, %v1497_v20  ;;  %v2868_v20 = vld [vmem:[#allocation13 + $0x38] sm:$0xff]  }
 0x939   : > { %v1503_v22 = vmul.f32 1.442695, %v1501_v21 }
 0x93a   : > { %v1500_v23 = vpop.xlane.xlu1 %1499 }
 0x93b   : > { %2933 = vpow2.f32 %v1503_v22  ;;  %v1502_v24 = vsub.f32 %v1492_v16, %v1500_v23  ;;  %v2864_v16 = vld [vmem:[#allocation13 + $0x18] sm:$0xff]  }
 0x93d   : > { %v1505_v25 = vmul.f32 1.442695, %v1502_v24 }
 0x93f   : > { %2935 = vpow2.f32 %v1505_v25 }
 0x945   : > { %v2934_v27 = vpop.eup %2933 }
 0x946   : > { %v1507_v28 = vsel %vm1023_vm1, %v2934_v27, 0.0 }
 0x947   : > { %1508 = vadd.xlane.f32.xlu1 %v1507_v28 }
 0x949   : > { %v2936_v29 = vpop.eup %2935 }
 0x94a   : > { %v1510_v30 = vsel %vm1023_vm1, %v2936_v29, 0.0 }
 0x94b   : > { %1511 = vadd.xlane.f32.xlu1 %v1510_v30 }
 0x95c   : > { %1519 = vrot.lane.b32.xlu1 %v3752_v26, %s3272_s18 }
 0x9d4   : > { %v1509_v31 = vpop.xlane.xlu1 %1508 }
 0x9d5   : > { %2937 = vrcp.f32 %v1509_v31 }
 0x9d8   : > { %v1512_v32 = vpop.xlane.xlu1 %1511 }
 0x9d9   : > { %2939 = vrcp.f32 %v1512_v32 }
 0x9dc   : > { %v1520_v33 = vpop.permute.xlu1 %1519 }
 0x9dd   : > { %2663 = vmatpush3.bf16.msra.mxu1 %v1520_v33  ;;  %v2961_v33 = vld [vmem:[%s3664_s17] sm:$0xff] }
 0x9de   : > { %2668 = vmatprep.subr.bf16.mxu1 %v3268_v5 }
 0x9df   : > { %v2938_v35 = vpop.eup %2937 }
 0x9e0   : > { %v1515_v37 = vmul.f32 %v2938_v35, %v2934_v27 }
 0x9e3   : > { %v2940_v36 = vpop.eup %2939 }
 0x9e4   : > { %v1516_v38 = vmul.f32 %v2940_v36, %v2936_v29  ;;  %v2435_v29 = vld [vmem:[%s4028_s20] ss:$0 sm:$0xff]  ;;  %s4032_s20 = sld [smem:[#allocation35_spill]] }
 0x9e6   : > { %v1517_v39 = vpack.c.bf16 %v1516_v38, %v1515_v37  ;;  %v2962_v38 = vld [vmem:[%s3664_s17 + $0x8] sm:$0xff]  ;;  %s705_s17 = scalar_lea.vmem [#allocation17], %s2392_s12  ;;  %s2211_s12 = scalar_lea.sflag [#allocation7], %s3658_s1 }
 0x9e7   : > { %s2226_s25 = sshll.u32 %s705_s17, 4  ;;  %s3903_s25 = int_to_ptr.vmem [resolvable:$true] %s2226_s25 }
 0x9e8   : > { %2665 = vmatmul.mubr.msk.bf16.vlgmr.msra.gmra.mrb[24].mxu1 %vm1023_vm1, %v1517_v39 }
 0x9e9   : > { %2669 = vmatpush3.bf16.msra.mxu1 %v1573_v40  ;;  %2672 = vmatprep.mubr.msk.bf16.mxu1 %vm3269_vm0, %v3268_v5  ;;  %v2869_v40 = vld [vmem:[#allocation14] ss:$8 sps:$4 sm:$0xff]  }
 0x9ea   : > { %2670 = vmatprep.subr.bf16.mxu1 %v3268_v5 }
 0x9ed   : > { %2671 = vmatpush3.bf16.msra.mxu1 %v1574_v41  ;;  %v2871_v41 = vld [vmem:[#allocation14 + $0x4] ss:$8 sps:$4 sm:$0xff]  }
 0x9ee   : > { %2676 = vmatprep.subr.bf16.mxu1 %v3268_v5 }
 0x9f0   : > { %2673 = vmatmul.mubr.msk.bf16.vlgmr.msra.gmra.mrb[28].mxu1 %vm1203_vm2, %v1577_v42  ;;  %v2874_v42 = vld [vmem:[#allocation14 + $0x14] ss:$8 sps:$4 sm:$0xff]  }
 0x9f1   : > { %2678 = vmatprep.mubr.msk.bf16.mxu1 %vm3269_vm0, %v3268_v5 }
 0xabb   : > { %v1559_v43 = vpop.f32.mrb[24].mxu1 }
 0xabc   : > { %v2666_v44 = vpop.f32.mrb[25].mxu1 }
 0xabd   : > { %v1562_v47 = vpop.f32.mrb[26].mxu1 }
 0xabe   : > { %v1566_v49 = vpack.c.bf16 %v1562_v47, %v1559_v43  ;;  %v2667_v50 = vpop.f32.mrb[27].mxu1  ;;  %v2872_v43 = vld [vmem:[#allocation14 + $0x10] ss:$8 sps:$4 sm:$0xff]  }
 0xac3   : > { %v1615_v51 = vpop.f32.mrb[28].mxu1 }
 0xac4   : > { %v1616_v52 = vadd.f32 %v1615_v51, %v3780_v48  ;;  %v2674_v53 = vpop.f32.mrb[29].mxu1 }
 0xac5   : > { %v1618_v54 = vpop.f32.mrb[30].mxu1 }
 0xac6   : > { %v1619_v55 = vadd.f32 %v1618_v54, %v3780_v48  ;;  %v2675_v56 = vpop.f32.mrb[31].mxu1  ;;  %v1622_v57 = vsel %vm1023_vm1, %v1616_v52, -inf }
 0xac7   : > { %1623 = vmax.xlane.f32.xlu1 %v1622_v57  ;;  %v2875_v56 = vld [vmem:[#allocation14 + $0x20] ss:$8 sps:$4 sm:$0xff]   ;;  %v2880_v57 = vld [vmem:[#allocation14 + $0x34] ss:$8 sps:$4 sm:$0xff]  }
 0xac8   : > { %v1625_v58 = vsel %vm1023_vm1, %v1619_v55, -inf }
 0xac9   : > { %1626 = vmax.xlane.f32.xlu0 %v1625_v58  ;;  %v2878_v58 = vld [vmem:[#allocation14 + $0x30] ss:$8 sps:$4 sm:$0xff]  }
 0xb54   : > { %v1624_v59 = vpop.xlane.xlu1 %1623 }
 0xb55   : > { %v1628_v60 = vsub.f32 %v1616_v52, %v1624_v59  ;;  %v2883_v59 = vld [vmem:[#allocation14 + $0x44] ss:$8 sps:$4 sm:$0xff]  }
 0xb56   : > { %v1627_v61 = vpop.xlane.xlu0 %1626 }
 0xb57   : > { %v1630_v62 = vmul.f32 1.442695, %v1628_v60  ;;  %v1629_v63 = vsub.f32 %v1619_v55, %v1627_v61  ;;  %v2877_v55 = vld [vmem:[#allocation14 + $0x24] ss:$8 sps:$4 sm:$0xff]   ;;  %v2881_v60 = vld [vmem:[#allocation14 + $0x40] ss:$8 sps:$4 sm:$0xff]  }
 0xb58   : > { %v2886_v61 = vld [vmem:[#allocation14 + $0x54] ss:$8 sps:$4 sm:$0xff]  }
 0xb59   : > { %2941 = vpow2.f32 %v1630_v62  ;;  %v1632_v0 = vmul.f32 1.442695, %v1629_v63  ;;  %v2884_v62 = vld [vmem:[#allocation14 + $0x50] ss:$8 sps:$4 sm:$0xff]   ;;  %v2889_v63 = vld [vmem:[#allocation14 + $0x64] ss:$8 sps:$4 sm:$0xff]  }
 0xb5b   : > { %2943 = vpow2.f32 %v1632_v0  ;;  %v2887_v0 = vld [vmem:[#allocation14 + $0x60] ss:$8 sps:$4 sm:$0xff]  }
 0xb63   : > { %v2942_v1 = vpop.eup %2941 }
 0xb64   : > { %v1634_v2 = vsel %vm1023_vm1, %v2942_v1, 0.0 }
 0xb65   : > { %v2944_v3 = vpop.eup %2943  ;;  %1635 = vadd.xlane.f32.xlu1 %v1634_v2  ;;  %v2890_v2 = vld [vmem:[#allocation14 + $0x70] ss:$8 sps:$4 sm:$0xff]  }
 0xb66   : > { %v1637_v48 = vsel %vm1023_vm1, %v2944_v3, 0.0 }
 0xb67   : > { %1638 = vadd.xlane.f32.xlu0 %v1637_v48  ;;  %v2893_v48 = vld [vmem:[#allocation16 + $0x40] sm:$0xff]  }
 0xb76   : > { %1646 = vrot.lane.b32.xlu1 %v3752_v26, %s3271_s11 }
 0xb7a   : > { %1568 = vrot.lane.b32.xlu1 %v1566_v49, %s3272_s18  ;;  %s4031_s18 = sld [smem:[#allocation34_spill]] }
 0xb7d   : > { %1441 = vrot.lane.b32.xlu0 %v1439_v10, %s3271_s11  ;;  %v2863_v10 = vld [vmem:[#allocation13 + $0x10] sm:$0xff]   ;;  %s3161_s11 = scalar_lea.vmem %s3903_s25, 256 }
 0xb7e   : > { %2687 = vmatpush3.bf16.msra.mxu0 %v2863_v10  ;;  %p3162_p9 = scmp.ne.s32.totalorder %s3903_s25, %s3161_s11 }
 0xb7f   : > { %2688 = vmatprep.subr.bf16.mxu0 %v3268_v5 }
 0xb80   : > { %p3163_p12 = pnand %p3162_p9, %p4034_p10 }
 0xb82   : > { %2689 = vmatpush3.bf16.msra.mxu0 %v2864_v16  ;;  %p3164_p0 = pneg %p3163_p12 }
 0xb83   : > { %2690 = vmatprep.subr.bf16.mxu0 %v3268_v5 }
 0xb86   : > { %2691 = vmatpush3.bf16.msra.mxu0 %v2865_v17 }
 0xb87   : > { %2692 = vmatprep.subr.bf16.mxu0 %v3268_v5 }
 0xb8a   : > { %2693 = vmatpush3.bf16.msra.mxu0 %v2866_v18  ;;  %v2445_v18 = vld [vmem:[%s4030_s8] ss:$0 sm:$0xff]  ;;  %s4033_s8 = sld [smem:[#allocation36_spill]] }
 0xb8b   : > { %2694 = vmatprep.subr.bf16.mxu0 %v3268_v5 }
 0xb8e   : > { %2695 = vmatpush3.bf16.msra.mxu0 %v2867_v19 }
 0xb8f   : > { %2696 = vmatprep.subr.bf16.mxu0 %v3268_v5 }
 0xb92   : > { %2697 = vmatpush3.bf16.msra.mxu0 %v2868_v20 }
 0xb93   : > { %2544 = vmatprep.subr.bf16.mxu0 %v2893_v48 }
 0xbf2   : > { %v1636_v4 = vpop.xlane.xlu1 %1635 }
 0xbf3   : > { %2945 = vrcp.f32 %v1636_v4  ;;  %v2894_v4 = vld [vmem:[#allocation16] sm:$0xff]  }
 0xbf4   : > { %v1639_v34 = vpop.xlane.xlu0 %1638 }
 0xbf5   : > { %2947 = vrcp.f32 %v1639_v34  ;;  %v2895_v34 = vld [vmem:[#allocation16 + $0x48] sm:$0xff]  }
 0xbf6   : > { %v1647_v6 = vpop.permute.xlu1 %1646 }
 0xbf7   : > { %2677 = vmatpush3.bf16.msra.mxu1 %v1647_v6  ;;  %v2896_v6 = vld [vmem:[#allocation16 + $0x8] sm:$0xff]  }
 0xbf8   : > { %v1442_v8 = vpop.permute.xlu0 %1441  ;;  %1964 = vmatprep.subr.bf16.mxu1 %v2871_v41 }
 0xbf9   : > { %1445 = vst.msk [vmem:[#allocation4] sm:$0xff] %vm1444_vm4, %v1442_v8 }
 0xbfa   : > { %v1569_v12 = vpop.permute.xlu1 %1568 }
 0xbfb   : > { %1572 = vst.msk [vmem:[#allocation4] sm:$0xff] %vm1571_vm5, %v1569_v12 }
 0xbfd   : > { %v2946_v26 = vpop.eup %2945 }
 0xbfe   : > { %v1642_v13 = vmul.f32 %v2946_v26, %v2942_v1  ;;  %v2892_v1 = vld [vmem:[#allocation14 + $0x74] ss:$8 sps:$4 sm:$0xff]  }
 0xbff   : > { %v2948_v11 = vpop.eup %2947 }
 0xc00   : > { %v1643_v14 = vmul.f32 %v2948_v11, %v2944_v3  ;;  %v3273_v3 = vmov 0  }
 0xc02   : > { %v1644_v15 = vpack.c.bf16 %v1643_v14, %v1642_v13 }
 0xc04   : > { %2679 = vmatmul.mubr.msk.bf16.vlgmr.msra.gmra.mrb[32].mxu1 %vm1023_vm1, %v1644_v15 }
 0xc05   : > { %1965 = vmatpush1.bf16.msra.mxu1 %v2869_v40  ;;  %1996 = vmatprep.mubr.bf16.mxu1 %v3273_v3 }
 0xc06   : > { %1966 = vmatprep.subr.bf16.mxu1 %v2874_v42 }
 0xc09   : > { %1967 = vmatpush1.bf16.msra.mxu1 %v2872_v43 }
 0xc0a   : > { %1968 = vmatprep.subr.bf16.mxu1 %v2877_v55 }
 0xc0d   : > { %1969 = vmatpush1.bf16.msra.mxu1 %v2875_v56 }
 0xc0e   : > { %1970 = vmatprep.subr.bf16.mxu1 %v2880_v57 }
 0xc11   : > { %1971 = vmatpush1.bf16.msra.mxu1 %v2878_v58 }
 0xc12   : > { %1972 = vmatprep.subr.bf16.mxu1 %v2883_v59 }
 0xc15   : > { %1973 = vmatpush1.bf16.msra.mxu1 %v2881_v60 }
 0xc16   : > { %1974 = vmatprep.subr.bf16.mxu1 %v2886_v61 }
 0xc19   : > { %1975 = vmatpush1.bf16.msra.mxu1 %v2884_v62 }
 0xc1a   : > { %1976 = vmatprep.subr.bf16.mxu1 %v2889_v63 }
 0xc1d   : > { %1977 = vmatpush1.bf16.msra.mxu1 %v2887_v0 }
 0xc1e   : > { %1978 = vmatprep.subr.bf16.mxu1 %v2892_v1 }
 0xc21   : > { %1979 = vmatpush1.bf16.msra.mxu1 %v2890_v2 }
 0xcd7   : > { %v1686_v21 = vpop.f32.mrb[32].mxu1 }
 0xcd8   : > { %v2680_v22 = vpop.f32.mrb[33].mxu1 }
 0xcd9   : > { %v1689_v23 = vpop.f32.mrb[34].mxu1 }
 0xcda   : > { %v1693_v24 = vpack.c.bf16 %v1689_v23, %v1686_v21  ;;  %v2681_v25 = vpop.f32.mrb[35].mxu1  ;;  %v2897_v23 = vld [vmem:[#allocation16 + $0x50] sm:$0xff]  }
 0xcdb   : > { %v2899_v25 = vld [vmem:[#allocation16 + $0x58] sm:$0xff]  }
 0xcdc   : > { %1695 = vrot.lane.b32.xlu1 %v1693_v24, %s3270_s2  ;;  %v2898_v24 = vld [vmem:[#allocation16 + $0x10] sm:$0xff]   ;;  %s3908_s2 = scalar_lea.hbm %s4033_s8, %s2485_s5 }
 0xd4e   : > { %v1696_v27 = vpop.permute.xlu1 %1695 }
 0xd4f   : > { %1699 = vst.msk [vmem:[#allocation4] sm:$0xff] %vm1698_vm6, %v1696_v27  ;;  %v2900_v27 = vld [vmem:[#allocation16 + $0x18] sm:$0xff]  }
 0xd56   : > { %v1700_v28 = vld [vmem:[#allocation4] sm:$0xff] }
 0xd57   : > { %2699 = vmatmul.mubr.bf16.vlgmr.msra.gmra.mrb[8].mxu0 %v1700_v28  ;;  %v2901_v28 = vld [vmem:[#allocation16 + $0x60] sm:$0xff]  }
 0xd58   : > { %2545 = vmatpush3.bf16.msra.mxu0 %v2894_v4 }
 0xd59   : > { %2546 = vmatprep.subr.bf16.mxu0 %v2895_v34 }
 0xd5c   : > { %2547 = vmatpush3.bf16.msra.mxu0 %v2896_v6 }
 0xd5d   : > { %2548 = vmatprep.subr.bf16.mxu0 %v2897_v23 }
 0xd60   : > { %2549 = vmatpush3.bf16.msra.mxu0 %v2898_v24 }
 0xd61   : > { %2550 = vmatprep.subr.bf16.mxu0 %v2899_v25 }
 0xd64   : > { %2551 = vmatpush3.bf16.msra.mxu0 %v2900_v27 }
 0xd65   : > { %2552 = vmatprep.subr.bf16.mxu0 %v2901_v28 }
 0xe2a   : > { %v1806_v5 = vpop.f32.mrb[8].mxu0 }
 0xe2b   : > { %v1807_v30 = vadd.f32 %v2435_v29, %v1806_v5  ;;  %v2700_v31 = vpop.f32.mrb[9].mxu0  ;;  %v2903_v5 = vld [vmem:[#allocation16 + $0x68] sm:$0xff]  }
 0xe2c   : > { %v1809_v32 = vpop.f32.mrb[10].mxu0  ;;  %v2905_v31 = vld [vmem:[#allocation16 + $0x70] sm:$0xff]  }
 0xe2d   : > { %v3875_v35 = vadd.f32 %v2961_v33, %v1807_v30  ;;  %v1810_v36 = vadd.f32 %v2435_v29, %v1809_v32  ;;  %v2701_v37 = vpop.f32.mrb[11].mxu0  ;;  %v2902_v29 = vld [vmem:[#allocation16 + $0x20] sm:$0xff]   ;;  %v2904_v30 = vld [vmem:[#allocation16 + $0x28] sm:$0xff]   ;;  %v2906_v32 = vld [vmem:[#allocation16 + $0x30] sm:$0xff]  }
 0xe2e   : > { %2553 = vmatpush3.bf16.msra.mxu0 %v2902_v29  ;;  %v2907_v33 = vld [vmem:[#allocation16 + $0x78] sm:$0xff]  }
 0xe2f   : > { %v3878_v39 = vadd.f32 %v2962_v38, %v1810_v36  ;;  %1817 = vadd.xlane.f32.xlu1 %v3875_v35  ;;  %2554 = vmatprep.subr.bf16.mxu0 %v2903_v5  ;;  %v2908_v36 = vld [vmem:[#allocation16 + $0x38] sm:$0xff]   ;;  %v1880_v38 = vsub.s32 1, %v3774_v45 }
 0xe30   : > { %v1872_v37 = vld [vmem:[%s4031_s18] sm:$0x3]  ;;  %s3165_s18 = sshll.u32 %s3274_s21, 4  ;;  %s3166_s18 = int_to_ptr.vmem [resolvable:$false] %s3165_s18 }
 0xe31   : > { %1819 = vadd.xlane.f32.xlu0 %v3878_v39  ;;  %v1877_v40 = vrot.slane %v1872_v37, %v745_v46  ;;  %v1881_v41 = vrot.slane %v1872_v37, %v1880_v38  ;;  %s3167_s24 = scalar_lea.vmem %s3166_s18, 512  ;;  %p3168_p7 = scmp.lt.s32.totalorder %s3903_s25, %s3166_s18 }
 0xe32   : > { %2555 = vmatpush3.bf16.msra.mxu0 %v2904_v30  ;;  %p3169_p5 = scmp.lt.s32.totalorder %s3167_s24, %s3161_s11 }
 0xe33   : > { %2556 = vmatprep.subr.bf16.mxu0 %v2905_v31 }
 0xe34   : > { %p3170_p8 = por %p3169_p5, %p3168_p7 }
 0xe36   : > { %2557 = vmatpush3.bf16.msra.mxu0 %v2906_v32  ;;  %p3171_p3 = pnand %p3170_p8, %p3164_p0 }
 0xe37   : > { %2558 = vmatprep.subr.bf16.mxu0 %v2907_v33 }
 0xe3a   : > { %2559 = vmatpush3.bf16.msra.mxu0 %v2908_v36 }
 0xebc   : > { %v1818_v44 = vpop.xlane.xlu1 %1817 }
 0xebd   : > { %v1821_v47 = vmul.f32 0.0078125, %v1818_v44 }
 0xebe   : > { %v1820_v49 = vpop.xlane.xlu0 %1819 }
 0xebf   : > { %v1823_v50 = vsub.f32 %v3875_v35, %v1821_v47  ;;  %v1822_v51 = vmul.f32 0.0078125, %v1820_v49 }
 0xec1   : > { %v1824_v52 = vsub.f32 %v3878_v39, %v1822_v51  ;;  %v1825_v53 = vmul.f32 %v1823_v50, %v1823_v50 }
 0xec3   : > { %1827 = vadd.xlane.f32.xlu0 %v1825_v53  ;;  %v1826_v54 = vmul.f32 %v1824_v52, %v1824_v52 }
 0xec7   : > { %1829 = vadd.xlane.f32.xlu0 %v1826_v54 }
 0xf50   : > { %v1828_v8 = vpop.xlane.xlu0 %1827 }
 0xf51   : > { %v1831_v12 = vmul.f32 0.0078125, %v1828_v8 }
 0xf53   : > { %v1833_v26 = vadd.f32 1e-06, %v1831_v12 }
 0xf54   : > { %v1830_v11 = vpop.xlane.xlu0 %1829 }
 0xf55   : > { %2949 = vrsqrt.f32 %v1833_v26  ;;  %v1832_v13 = vmul.f32 0.0078125, %v1830_v11  ;;  %v2462_v26 = vld [vmem:[%s4032_s20] ss:$0 sm:$0xff] }
 0xf57   : > { %v1834_v14 = vadd.f32 1e-06, %v1832_v13 }
 0xf59   : > { %2951 = vrsqrt.f32 %v1834_v14 }
 0xf5f   : > { %v2950_v15 = vpop.eup %2949 }
 0xf60   : > { %v1837_v7 = vmul.f32 %v2950_v15, %v1823_v50 }
 0xf62   : > { %v1845_v17 = vmul.f32 %v2444_v9, %v1837_v7 }
 0xf63   : > { %v2952_v10 = vpop.eup %2951 }
 0xf64   : > { %v1838_v16 = vmul.f32 %v2952_v10, %v1824_v52  ;;  %v1853_v20 = vadd.f32 %v2445_v18, %v1845_v17 }
 0xf66   : > { %v1846_v19 = vmul.f32 %v2444_v9, %v1838_v16 }
 0xf68   : > { %v1854_v21 = vadd.f32 %v2445_v18, %v1846_v19 }
 0xf6a   : > { %v1855_v22 = vpack.c.bf16 %v1854_v21, %v1853_v20 }
 0xf6c   : > { %1997 = vmatmul.mubr.bf16.vlgmr.msra.gmra.mrb[36].mxu1 %v1855_v22 }
0x103f   : > { %v1998_v42 = vpop.f32.mrb[36].mxu1 }
0x1040   : > { %v1999_v43 = vadd.f32 %v1998_v42, %v1877_v40  ;;  %v2000_v44 = vpop.f32.mrb[37].mxu1 }
0x1041   : > { %v2001_v47 = vadd.f32 %v2000_v44, %v1881_v41  ;;  %v2002_v49 = vpop.f32.mrb[38].mxu1 }
0x1042   : > { %v2012_v50 = vmul.f32 0.70710677, %v1999_v43  ;;  %v2003_v51 = vadd.f32 %v2002_v49, %v1877_v40  ;;  %v2004_v52 = vpop.f32.mrb[39].mxu1  ;;  %v2007_v61 = vmul.f32 0.5, %v1999_v43 }
0x1043   : > { %v2013_v53 = vmul.f32 0.70710677, %v2001_v47  ;;  %v2005_v54 = vadd.f32 %v2004_v52, %v1881_v41  ;;  %v2008_v0 = vmul.f32 0.5, %v2001_v47 }
0x1044   : > { %2953 = verf.f32 %v2012_v50  ;;  %v2014_v55 = vmul.f32 0.70710677, %v2003_v51  ;;  %v2009_v62 = vmul.f32 0.5, %v2003_v51 }
0x1045   : > { %2955 = verf.f32 %v2013_v53  ;;  %v2015_v56 = vmul.f32 0.70710677, %v2005_v54  ;;  %v2010_v1 = vmul.f32 0.5, %v2005_v54 }
0x1046   : > { %2957 = verf.f32 %v2014_v55 }
0x1047   : > { %2959 = verf.f32 %v2015_v56 }
0x104e   : > { %v2954_v57 = vpop.eup %2953 }
0x104f   : > { %v2956_v45 = vpop.eup %2955  ;;  %v2020_v46 = vadd.f32 1.0, %v2954_v57 }
0x1050   : > { %v2958_v58 = vpop.eup %2957  ;;  %v2021_v59 = vadd.f32 1.0, %v2956_v45 }
0x1051   : > { %v2960_v60 = vpop.eup %2959  ;;  %v2022_v63 = vadd.f32 1.0, %v2958_v58  ;;  %v2024_v3 = vmul.f32 %v2020_v46, %v2007_v61 }
0x1052   : > { %v2023_v2 = vadd.f32 1.0, %v2960_v60  ;;  %v2025_v4 = vmul.f32 %v2021_v59, %v2008_v0 }
0x1053   : > { %v2026_v48 = vmul.f32 %v2022_v63, %v2009_v62 }
0x1054   : > { %v2027_v34 = vmul.f32 %v2023_v2, %v2010_v1 }
0x1055   : > { %v2028_v6 = vpack.c.bf16 %v2026_v48, %v2024_v3 }
0x1056   : > { %v2029_v8 = vpack.c.bf16 %v2027_v34, %v2025_v4 }
0x1058   : > { %2197 = vmatprep.mubr.bf16.mxu0 %v2029_v8 }
0x1059   : > { %2198 = vmatmul.mubr.bf16.vlgmr.msra.gmra.mrb[12].mxu0 %v2028_v6 }
0x112c   : > { %v2560_v12 = vpop.f32.mrb[12].mxu0 }
0x112d   : > { %v2561_v11 = vpop.f32.mrb[13].mxu0 }
0x112e   : > { %v2562_v13 = vadd.f32 %v2561_v11, %v2560_v12  ;;  %v2563_v14 = vpop.f32.mrb[14].mxu0 }
0x112f   : > { %v2564_v15 = vpop.f32.mrb[15].mxu0 }
0x1130   : > { %v2200_v7 = vadd.f32 %v2562_v13, %v2462_v26  ;;  %v2565_v9 = vadd.f32 %v2564_v15, %v2563_v14 }
0x1132   : > { %v2206_v10 = vadd.f32 %v2200_v7, %v3875_v35  ;;  %v2203_v16 = vadd.f32 %v2565_v9, %v2462_v26 }
0x1134   : > { %2208 = vst [vmem:[%s705_s17] sm:$0xff] %v2206_v10  ;;  %v2207_v17 = vadd.f32 %v2203_v16, %v3878_v39 }
0x1136   : > { %2209 = vst [vmem:[%s705_s17 + $0x8] sm:$0xff] %v2207_v17 }
0x1137   : > { %3174 = shalt.err (!%p3171_p3)
}
0x1138   : > { %s3175_s13 = scalar_lea.hbm %s3908_s2, 256  ;;  %s3179_s5 = scalar_lea.hbm %s4033_s8, 512 }
0x1139   : > { %p3176_p11 = scmp.ne.s32.totalorder %s3908_s2, %s3175_s13  ;;  %p3180_p1 = scmp.lt.u32.totalorder %s3908_s2, %s4033_s8 }
0x113a   : > { %p3181_p4 = scmp.lt.u32.totalorder %s3179_s5, %s3175_s13  ;;  %p3183_p9 = scmp.lt.u32.totalorder %s3175_s13, %s3908_s2 }
0x113b   : > { %p3177_p6 = pnand %p3176_p11, %p4034_p10 }
0x113c   : > { %p3182_p2 = por %p3181_p4, %p3180_p1 }
0x113d   : > { %p3178_p13 = pneg %p3177_p6 }
0x113e   : > { %p3184_p12 = por %p3183_p9, %p3182_p2 }
0x1140   : > { %p3185_p0 = pnand %p3184_p12, %p3178_p13 }
0x1142   : > { %3188 = shalt.err (!%p3185_p0)
}
0x1143   : > { %s3275_s11 = smov 128   ;;  %s3276_s21 = smov 8  }
0x1144   : > { %2728 = dma.vmem_to_hbm [thread:$0]  (%p4034_p10), %s3903_s25, 256, %s3908_s2, %s2211_s12, %s3275_s11, %s3275_s11, %s3276_s21  }
0x1145 PF: > { %s2241_s18 = sand.u32 1, %s3235_s27   ;;  %p4035_p7 = scmp.ne.s32.totalorder %s4017_s26, 0 }
0x1146   : > { %p4036_p5 = scmp.ge.s32.totalorder %s3255_s19, 2  ;;  %s2242_s24 = scalar_lea.sflag [#allocation7], %s2241_s18 }
0x1148   : > { %p2754_p8 = pnand %p4036_p5, %p4035_p7 }
0x114a   : > { %3230 = dma.done.wait (!%p2754_p8), %s2242_s24, 256  }
0x114b   : > { %3232 = vsyncadd (!%p2754_p8), %s2242_s24, 4294967040  ;;  %s37_s19 = sadd.s32 1, %s3255_s19   ;;  %s4037_s27 = smov %s3239_s28 }
0x114c   : > { %p34_p3 = scmp.ge.s32.totalorder %s37_s19, 4   ;;  %s4038_s28 = smov %s3243_s29 }
0x114d   : > { %s4039_s29 = smov %s3602_s22  ;;  %s4040_s30 = smov %s3251_s0 }
0x114e   : > { %s4041_s0 = smov %s4043_s23  ;;  %36 = sbr.rel (!%p34_p3) target bundleno = 23 (0x17), region = 169 }
0x1155   :  { %2247 = vsyncpa [#allocation6], 1 }
0x1156   :  { %2249 = vsyncpa [#allocation6 + $0x1], 1 }
0x1157   :  { %2250 = vsyncpa [#allocation9], 1 }
0x1158   :  { %2251 = vsyncpa [#allocation12], 1 }
0x1159   :  { %2252 = vsyncpa [#allocation15], 1 }
0x115a   :  { %2253 = vsyncpa [#allocation7], 1 }
0x115b   :  { %2255 = vsyncpa [#allocation7 + $0x1], 1 }

// kernel: tpu_custom_call.1
= control target key start
LH: loop header
LB: loop body
LE: loop exit
PB: predicated region body
PF: predicated region fallthrough
CT: control target
= control target key end

     0   :  { %s3958_s0 = inlined_call_operand.hbm [shape: f32[2,16,128], index: 0, kind: input, shape index: {}]   ;;  %s3959_s1 = inlined_call_operand.vmem [shape: s32[2,1,16], index: 1, kind: input, shape index: {}]   ;;  %s3960_s2 = inlined_call_operand.vmem [shape: f32[1,128], index: 2, kind: input, shape index: {}]   ;;  %s3961_s3 = inlined_call_operand.vmem [shape: f32[1,128], index: 3, kind: input, shape index: {}]   ;;  %s3962_s4 = inlined_call_operand.hbm [shape: bf16[128,128], index: 4, kind: input, shape index: {}]   ;;  %s3963_s5 = inlined_call_operand.vmem [shape: f32[1,128], index: 5, kind: input, shape index: {}]   ;;  %s3964_s6 = inlined_call_operand.hbm [shape: bf16[128,128], index: 6, kind: input, shape index: {}]   ;;  %s3965_s7 = inlined_call_operand.vmem [shape: f32[1,128], index: 7, kind: input, shape index: {}]   ;;  %s3966_s8 = inlined_call_operand.hbm [shape: bf16[128,128], index: 8, kind: input, shape index: {}]   ;;  %s3967_s9 = inlined_call_operand.vmem [shape: f32[1,128], index: 9, kind: input, shape index: {}]   ;;  %s3968_s10 = inlined_call_operand.hbm [shape: bf16[128,128], index: 10, kind: input, shape index: {}]   ;;  %s3969_s11 = inlined_call_operand.vmem [shape: f32[1,128], index: 11, kind: input, shape index: {}]   ;;  %s3970_s12 = inlined_call_operand.vmem [shape: f32[1,128], index: 12, kind: input, shape index: {}]   ;;  %s3971_s13 = inlined_call_operand.vmem [shape: f32[1,128], index: 13, kind: input, shape index: {}]   ;;  %s3972_s14 = inlined_call_operand.hbm [shape: bf16[128,256], index: 14, kind: input, shape index: {}]   ;;  %s3973_s15 = inlined_call_operand.vmem [shape: f32[1,256], index: 15, kind: input, shape index: {}]   ;;  %s3974_s16 = inlined_call_operand.hbm [shape: bf16[256,128], index: 16, kind: input, shape index: {}]   ;;  %s3975_s17 = inlined_call_operand.vmem [shape: f32[1,128], index: 17, kind: input, shape index: {}]   ;;  %s3976_s18 = inlined_call_operand.hbm [shape: f32[2,16,128], index: 18, kind: output, shape index: {}]  }
   0x1   :  { %3990 = sst [smem:[#allocation24_spill]] %s3958_s0 }
   0x2   :  { %3991 = sst [smem:[#allocation25_spill]] %s3959_s1 }
   0x3   :  { %3992 = sst [smem:[#allocation26_spill]] %s3960_s2 }
   0x4   :  { %3993 = sst [smem:[#allocation27_spill]] %s3962_s4 }
   0x5   :  { %3994 = sst [smem:[#allocation28_spill]] %s3963_s5 }
   0x6   :  { %3995 = sst [smem:[#allocation29_spill]] %s3966_s8 }
   0x7   :  { %3996 = sst [smem:[#allocation30_spill]] %s3967_s9 }
   0x8   :  { %3997 = sst [smem:[#allocation31_spill]] %s3969_s11 }
   0x9   :  { %3998 = sst [smem:[#allocation32_spill]] %s3970_s12 }
   0xa   :  { %3999 = sst [smem:[#allocation33_spill]] %s3971_s13 }
   0xb   :  { %4000 = sst [smem:[#allocation34_spill]] %s3973_s15 }
   0xc   :  { %4001 = sst [smem:[#allocation35_spill]] %s3975_s17 }
   0xd   :  { %4002 = sst [smem:[#allocation36_spill]] %s3976_s18 }
   0xe   :  { %23 = vsyncpa [#allocation6], 0 }
   0xf   :  { %25 = vsyncpa [#allocation6 + $0x1], 0 }
  0x10   :  { %26 = vsyncpa [#allocation9], 0 }
  0x11   :  { %27 = vsyncpa [#allocation12], 0 }
  0x12   :  { %28 = vsyncpa [#allocation15], 0 }
  0x13   :  { %29 = vsyncpa [#allocation7], 0 }
  0x14   :  { %31 = vsyncpa [#allocation7 + $0x1], 0  ;;  %s3372_s27 = smov 0   ;;  %s3374_s28 = smov 0  }
  0x15   :  { %s3376_s29 = smov 0   ;;  %s3378_s30 = smov 0  }
  0x16   :  { %s3380_s0 = smov 0   ;;  %s3382_s19 = smov 0  }
  0x17 LB: > { %4003 = sst [smem:[#allocation23_spill]] %s3247_s30  ;;  %s3978_s1 = sadd.s32 4294967295, %s3255_s19   ;;  %s3255_s19 = sphi %s3382_s19, %s37_s19   ;;  %s3251_s0 = sphi %s3380_s0, %s4041_s0   ;;  %s3247_s30 = sphi %s3378_s30, %s4040_s30   ;;  %s3243_s29 = sphi %s3376_s29, %s4039_s29   ;;  %s3239_s28 = sphi %s3374_s28, %s4038_s28   ;;  %s3235_s27 = sphi %s3372_s27, %s4037_s27  }
  0x18   : > { %p2380_p0 = scmp.ge.s32.totalorder %s3255_s19, 1  ;;  %p3406_p1 = scmp.eq.s32.totalorder %s3978_s1, 0 }
  0x19   : > { %p470_p2 = scmp.lt.s32.totalorder %s3255_s19, 3  ;;  %s3257_s22 = smov [#allocation8]  }
  0x1a   : > { %s4004_s20 = scalar_select %p3406_p1, 1, 0 }
  0x1b   : > { %p3411_p3 = pnand %p2380_p0, %p470_p2  ;;  %s488_s2 = sshll.u32 %s3257_s22, 4  ;;  %s3415_s2 = int_to_ptr.vmem [resolvable:$true] %s488_s2 }
  0x1c   : > { %s3258_s24 = smov [#allocation11]   ;;  %s3259_s26 = smov [#allocation14]  }
  0x1d   : > { %s4005_s21 = scalar_select %p3411_p3, 1, 0 }
  0x1e   : > { %p2730_p4 = pneg %p3411_p3  ;;  %s520_s25 = sshll.u32 %s3258_s24, 4  ;;  %s3426_s25 = int_to_ptr.vmem [resolvable:$true] %s520_s25 }
  0x1f   : > { %s3428_s1 = sshll.u32 %s3259_s26, 4  ;;  %s4007_s4 = sld [smem:[#allocation27_spill]]  ;;  %s559_s1 = int_to_ptr.vmem [resolvable:$true] %s3428_s1 }
  0x20   : > { %p3422_p6 = pnand %p2730_p4, %p3406_p1 }
  0x22   : > { %p3438_p8 = pneg %p3422_p6 }
  0x25   : > { %s2963_s17 = scalar_lea.hbm %s4007_s4, 1024 }
  0x26   : > { %p2964_p7 = scmp.ne.s32.totalorder %s4007_s4, %s2963_s17  ;;  %p2970_p11 = scmp.lt.u32.totalorder %s2963_s17, %s4007_s4 }
  0x28   : > { %p2966_p9 = pnand %p3438_p8, %p2964_p7 }
  0x2a   : > { %p2967_p10 = pneg %p2966_p9 }
  0x2c   : > { %p2972_p12 = pnand %p2970_p11, %p2967_p10 }
  0x2e   : > { %2975 = shalt.err (!%p2972_p12)
}
  0x2f   : > { %s2976_s13 = scalar_lea.vmem %s3415_s2, 1024  ;;  %p2984_p4 = scmp.lt.s32.totalorder %s3415_s2, %s3415_s2 }
  0x30   : > { %p2977_p13 = scmp.ne.s32.totalorder %s3415_s2, %s2976_s13  ;;  %p2985_p5 = scmp.lt.s32.totalorder %s2976_s13, %s2976_s13 }
  0x32   : > { %p2979_p0 = pnand %p2977_p13, %p3438_p8  ;;  %p2986_p7 = por %p2985_p5, %p2984_p4 }
  0x34   : > { %p2980_p2 = pneg %p2979_p0 }
  0x36   : > { %p2987_p9 = pnand %p2986_p7, %p2980_p2 }
  0x38   : > { %2990 = shalt.err (!%p2987_p9)
}
  0x39   : > { %s3984_s15 = smov 64   ;;  %s3986_s17 = smov 4  }
  0x3a   : > { %2733 = dma.hbm_to_vmem [thread:$0]  (!%p3422_p6), %s4007_s4, 1024, %s3415_s2, [#allocation9], %s3984_s15, %s3984_s15, %s3986_s17  }
  0x3b   : > { %s4009_s8 = sld [smem:[#allocation29_spill]] }
  0x41   : > { %s2991_s13 = scalar_lea.hbm %s4009_s8, 1024 }
  0x42   : > { %p2992_p5 = scmp.ne.s32.totalorder %s4009_s8, %s2991_s13  ;;  %p2998_p12 = scmp.lt.u32.totalorder %s2991_s13, %s4009_s8 }
  0x44   : > { %p2994_p10 = pnand %p2992_p5, %p3438_p8 }
  0x46   : > { %p2995_p11 = pneg %p2994_p10 }
  0x48   : > { %p3000_p13 = pnand %p2998_p12, %p2995_p11 }
  0x4a   : > { %3003 = shalt.err (!%p3000_p13)
}
  0x4b   : > { %s3004_s2 = scalar_lea.vmem %s3426_s25, 1024  ;;  %p3012_p7 = scmp.lt.s32.totalorder %s3426_s25, %s3426_s25 }
  0x4c   : > { %p3005_p0 = scmp.ne.s32.totalorder %s3426_s25, %s3004_s2  ;;  %p3013_p9 = scmp.lt.s32.totalorder %s3004_s2, %s3004_s2 }
  0x4e   : > { %p3007_p2 = pnand %p3005_p0, %p3438_p8  ;;  %p3014_p5 = por %p3013_p9, %p3012_p7 }
  0x50   : > { %p3008_p4 = pneg %p3007_p2 }
  0x52   : > { %p3015_p10 = pnand %p3014_p5, %p3008_p4 }
  0x54   : > { %3018 = shalt.err (!%p3015_p10)
}
  0x55   : > { %2739 = dma.hbm_to_vmem [thread:$0]  (!%p3422_p6), %s4009_s8, 1024, %s3426_s25, [#allocation12], %s3984_s15, %s3984_s15, %s3986_s17  }
  0x56   : > { %s3019_s18 = scalar_lea.hbm %s3972_s14, 2048 }
  0x57   : > { %p3020_p11 = scmp.ne.s32.totalorder %s3972_s14, %s3019_s18  ;;  %p3026_p0 = scmp.lt.u32.totalorder %s3019_s18, %s3972_s14 }
  0x59   : > { %p3022_p12 = pnand %p3020_p11, %p3438_p8 }
  0x5b   : > { %p3023_p13 = pneg %p3022_p12 }
  0x5d   : > { %p3028_p2 = pnand %p3026_p0, %p3023_p13 }
  0x5f   : > { %3031 = shalt.err (!%p3028_p2)
}
  0x60   : > { %s3032_s2 = scalar_lea.vmem %s559_s1, 2048  ;;  %p3040_p5 = scmp.lt.s32.totalorder %s559_s1, %s559_s1 }
  0x61   : > { %p3033_p4 = scmp.ne.s32.totalorder %s559_s1, %s3032_s2  ;;  %p3041_p10 = scmp.lt.s32.totalorder %s3032_s2, %s3032_s2 }
  0x63   : > { %p3035_p7 = pnand %p3033_p4, %p3438_p8  ;;  %p3042_p3 = por %p3041_p10, %p3040_p5 }
  0x65   : > { %p3036_p9 = pneg %p3035_p7 }
  0x67   : > { %p3043_p1 = pnand %p3042_p3, %p3036_p9 }
  0x69   : > { %3046 = shalt.err (!%p3043_p1)
}
  0x6a   : > { %s3988_s25 = smov 128   ;;  %s3263_s5 = smov 8  }
  0x6b   : > { %2745 = dma.hbm_to_vmem [thread:$0]  (!%p3422_p6), %s3972_s14, 2048, %s559_s1, [#allocation15], %s3988_s25, %s3988_s25, %s3263_s5  }
  0x6c   : > { %s3264_s30 = smov [#allocation10]   ;;  %s3265_s22 = smov [#allocation13]  }
  0x6d   : > { %s504_s18 = sshll.u32 %s3264_s30, 4  ;;  %s536_s24 = sshll.u32 %s3265_s22, 4  ;;  %s505_s18 = int_to_ptr.vmem [resolvable:$true] %s504_s18  ;;  %s537_s24 = int_to_ptr.vmem [resolvable:$true] %s536_s24 }
  0x6e   : > { %s3047_s2 = scalar_lea.hbm %s3964_s6, 1024 }
  0x6f   : > { %p3048_p1 = scmp.ne.s32.totalorder %s3964_s6, %s3047_s2  ;;  %p3054_p12 = scmp.lt.u32.totalorder %s3047_s2, %s3964_s6 }
  0x71   : > { %p3050_p3 = pnand %p3048_p1, %p3438_p8 }
  0x73   : > { %p3051_p11 = pneg %p3050_p3 }
  0x75   : > { %p3056_p13 = pnand %p3054_p12, %p3051_p11 }
  0x77   : > { %3059 = shalt.err (!%p3056_p13)
}
  0x78   : > { %s3060_s1 = scalar_lea.vmem %s505_s18, 1024  ;;  %p3068_p7 = scmp.lt.s32.totalorder %s505_s18, %s505_s18 }
  0x79   : > { %p3061_p0 = scmp.ne.s32.totalorder %s505_s18, %s3060_s1  ;;  %p3069_p9 = scmp.lt.s32.totalorder %s3060_s1, %s3060_s1 }
  0x7b   : > { %p3063_p2 = pnand %p3061_p0, %p3438_p8  ;;  %p3070_p5 = por %p3069_p9, %p3068_p7 }
  0x7d   : > { %p3064_p4 = pneg %p3063_p2 }
  0x7f   : > { %p3071_p10 = pnand %p3070_p5, %p3064_p4 }
  0x81   : > { %3074 = shalt.err (!%p3071_p10)
}
  0x82   : > { %s4010_s15 = smov 4   ;;  %s4011_s17 = smov 64  }
  0x83   : > { %2736 = dma.hbm_to_vmem [thread:$0]  (!%p3422_p6), %s3964_s6, 1024, %s505_s18, [#allocation9], %s4011_s17, %s4011_s17, %s4010_s15  }
  0x84   : > { %s3075_s30 = scalar_lea.hbm %s3968_s10, 1024 }
  0x85   : > { %p3076_p1 = scmp.ne.s32.totalorder %s3968_s10, %s3075_s30  ;;  %p3082_p12 = scmp.lt.u32.totalorder %s3075_s30, %s3968_s10 }
  0x87   : > { %p3078_p3 = pnand %p3076_p1, %p3438_p8 }
  0x89   : > { %p3079_p11 = pneg %p3078_p3 }
  0x8b   : > { %p3084_p13 = pnand %p3082_p12, %p3079_p11 }
  0x8d   : > { %3087 = shalt.err (!%p3084_p13)
}
  0x8e   : > { %s3088_s1 = scalar_lea.vmem %s537_s24, 1024  ;;  %p3096_p7 = scmp.lt.s32.totalorder %s537_s24, %s537_s24 }
  0x8f   : > { %p3089_p0 = scmp.ne.s32.totalorder %s537_s24, %s3088_s1  ;;  %p3097_p9 = scmp.lt.s32.totalorder %s3088_s1, %s3088_s1 }
  0x91   : > { %p3091_p2 = pnand %p3089_p0, %p3438_p8  ;;  %p3098_p5 = por %p3097_p9, %p3096_p7 }
  0x93   : > { %p3092_p4 = pneg %p3091_p2 }
  0x95   : > { %p3099_p10 = pnand %p3098_p5, %p3092_p4 }
  0x97   : > { %3102 = shalt.err (!%p3099_p10)
}
  0x98   : > { %2742 = dma.hbm_to_vmem [thread:$0]  (!%p3422_p6), %s3968_s10, 1024, %s537_s24, [#allocation12], %s4011_s17, %s4011_s17, %s4010_s15  }
  0x99   : > { %s3266_s8 = smov [#allocation16]   ;;  %s3103_s22 = scalar_lea.hbm %s3974_s16, 2048 }
  0x9a   : > { %s574_s9 = sshll.u32 %s3266_s8, 4  ;;  %p3104_p1 = scmp.ne.s32.totalorder %s3974_s16, %s3103_s22  ;;  %s575_s9 = int_to_ptr.vmem [resolvable:$true] %s574_s9 }
  0x9b   : > { %p3110_p12 = scmp.lt.u32.totalorder %s3103_s22, %s3974_s16 }
  0x9c   : > { %p3106_p3 = pnand %p3104_p1, %p3438_p8 }
  0x9e   : > { %p3107_p11 = pneg %p3106_p3 }
  0xa0   : > { %p3112_p13 = pnand %p3110_p12, %p3107_p11 }
  0xa2   : > { %3115 = shalt.err (!%p3112_p13)
}
  0xa3   : > { %s3116_s24 = scalar_lea.vmem %s575_s9, 2048  ;;  %p3124_p7 = scmp.lt.s32.totalorder %s575_s9, %s575_s9 }
  0xa4   : > { %p3117_p0 = scmp.ne.s32.totalorder %s575_s9, %s3116_s24  ;;  %p3125_p9 = scmp.lt.s32.totalorder %s3116_s24, %s3116_s24 }
  0xa6   : > { %p3119_p2 = pnand %p3117_p0, %p3438_p8  ;;  %p3126_p5 = por %p3125_p9, %p3124_p7 }
  0xa8   : > { %p3120_p4 = pneg %p3119_p2 }
  0xaa   : > { %p3127_p10 = pnand %p3126_p5, %p3120_p4 }
  0xac   : > { %3130 = shalt.err (!%p3127_p10)
}
  0xad   : > { %2748 = dma.hbm_to_vmem [thread:$0]  (!%p3422_p6), %s3974_s16, 2048, %s575_s9, [#allocation15], %s4011_s17, %s4011_s17, %s4010_s15  }
  0xae   : > { %s2379_s12 = sadd.s32 4294967294, %s3255_s19   ;;  %s49_s23 = sadd.s32 1, %s3251_s0 }
  0xaf   : > { %p51_p8 = scmp.ge.s32.totalorder %s49_s23, 2  ;;  %s56_s8 = sadd.s32 1, %s3243_s29 }
  0xb0   : > { %p63_p1 = scmp.ne.s32.totalorder %s3243_s29, %s3239_s28  ;;  %p64_p3 = scmp.eq.s32.totalorder %s3255_s19, 0 }
  0xb1   : > { %s4043_s23 = smov (%p51_p8, %s49_s23), 0  ;;  %p69_p12 = scmp.ne.s32.totalorder %s3239_s28, %s3235_s27 }
  0xb2   : > { %p3581_p11 = por %p64_p3, %p63_p1  ;;  %s53_s15 = ssub.s32 %s3251_s0, %s4043_s23 }
  0xb3   : > { %s4013_s17 = sadd.s32 4294967295, %s3255_s19   ;;  %p54_p13 = scmp.eq.s32.totalorder %s53_s15, 0 }
  0xb4   : > { %p457_p6 = scmp.eq.s32.totalorder %s4013_s17, 1  ;;  %p4014_p0 = scmp.ne.s32.totalorder %s4004_s20, 0 }
  0xb5   : > { %p463_p7 = scmp.eq.s32.totalorder %s2379_s12, 1  ;;  %p2763_p5 = scmp.lt.s32.totalorder %s3255_s19, 2 }
  0xb6   : > { %p3593_p2 = por %p4014_p0, %p69_p12  ;;  %p3597_p4 = por %p457_p6, %p63_p1 }
  0xb7   : > { %s3602_s22 = scalar_select %p54_p13, %s3243_s29, %s56_s8  }
  0xb8   : > { %s4016_s30 = scalar_select %p3597_p4, 1, 0 }
  0xb9   : > { %p3604_p9 = por %p463_p7, %p69_p12  ;;  %s591_s13 = sand.u32 1, %s3243_s29  }
  0xba   : > { %s2484_s2 = sshll.u32 %s3251_s0, 8  ;;  %s2388_s1 = sshll.u32 %s591_s13, 4 }
  0xbb   : > { %s4017_s26 = scalar_select %p3604_p9, 1, 0 }
  0xbc   : > { %s4018_s4 = sld [smem:[#allocation24_spill]]  ;;  %s595_s12 = scalar_lea.vmem [#allocation5], %s2388_s1 }
  0xbd   : > { %s602_s8 = sshll.u32 %s595_s12, 4  ;;  %p3618_p10 = pnand %p2763_p5, %p3581_p11  ;;  %s3622_s8 = int_to_ptr.vmem [resolvable:$true] %s602_s8 }
  0xbe   : > { %s3624_s25 = scalar_lea.sflag [#allocation6], %s591_s13 }
  0xbf   : > { %p3133_p1 = pneg %p3618_p10 }
  0xc2   : > { %s3614_s15 = scalar_lea.hbm %s4018_s4, %s2484_s2  ;;  %s3136_s1 = scalar_lea.hbm %s4018_s4, 512 }
  0xc3   : > { %s3131_s24 = scalar_lea.hbm %s3614_s15, 256  ;;  %p3137_p11 = scmp.lt.u32.totalorder %s3614_s15, %s4018_s4 }
  0xc4   : > { %p3132_p8 = scmp.ne.s32.totalorder %s3614_s15, %s3131_s24  ;;  %p3138_p6 = scmp.lt.u32.totalorder %s3136_s1, %s3131_s24 }
  0xc5   : > { %p3140_p0 = scmp.lt.u32.totalorder %s3131_s24, %s3614_s15 }
  0xc6   : > { %p3134_p3 = pnand %p3133_p1, %p3132_p8  ;;  %p3139_p13 = por %p3138_p6, %p3137_p11 }
  0xc8   : > { %p3135_p12 = pneg %p3134_p3  ;;  %p3141_p7 = por %p3140_p0, %p3139_p13 }
  0xca   : > { %p3142_p5 = pnand %p3141_p7, %p3135_p12 }
  0xcc   : > { %3145 = shalt.err (!%p3142_p5)
}
  0xcd   : > { %s3146_s13 = scalar_lea.vmem %s3622_s8, 256  ;;  %s3267_s2 = smov [#allocation5]  }
  0xce   : > { %p3147_p8 = scmp.ne.s32.totalorder %s3622_s8, %s3146_s13  ;;  %s3151_s11 = sshll.u32 %s3267_s2, 4  ;;  %s3152_s11 = int_to_ptr.vmem [resolvable:$false] %s3151_s11 }
  0xcf   : > { %s3153_s18 = scalar_lea.vmem %s3152_s11, 512  ;;  %p3154_p4 = scmp.lt.s32.totalorder %s3622_s8, %s3152_s11 }
  0xd0   : > { %p3149_p3 = pnand %p3147_p8, %p3133_p1  ;;  %p3155_p11 = scmp.lt.s32.totalorder %s3153_s18, %s3146_s13 }
  0xd2   : > { %p3150_p9 = pneg %p3149_p3  ;;  %p3156_p6 = por %p3155_p11, %p3154_p4 }
  0xd4   : > { %p3157_p13 = pnand %p3156_p6, %p3150_p9 }
  0xd6   : > { %3160 = shalt.err (!%p3157_p13)
}
  0xd7   : > { %s4020_s24 = smov 128   ;;  %p4021_p1 = scmp.ne.s32.totalorder %s4005_s21, 0 }
  0xd8   : > { %2752 = dma.hbm_to_vmem [thread:$0]  (!%p3618_p10), %s3614_s15, 256, %s3622_s8, %s3624_s25, %s4020_s24, %s4020_s24, %s3263_s5  }
  0xd9   : > { %620 = sbr.rel (%p4021_p1) target bundleno = 4421 (0x1145), region = 92  ;;  %s3658_s1 = sand.u32 (!%p4021_p1), 1, %s3239_s28  }
  0xda   : > { %s2392_s12 = sshll.u32 (!%p4021_p1), %s3658_s1, 4  ;;  %s623_s13 = scalar_lea.sflag (!%p4021_p1), [#allocation6], %s3658_s1 }
  0xdb   : > { %s3664_s17 = scalar_lea.vmem (!%p4021_p1), [#allocation5], %s2392_s12 }
  0xe0   : > { %3214 = dma.done.wait (%p3593_p2), %s623_s13, 256  }
  0xe1   : > { %3216 = vsyncadd (%p3593_p2), %s623_s13, 4294967040  ;;  %p4022_p4 = scmp.ne.s32.totalorder %s4004_s20, 0 }
  0xe3   : > { %3218 = dma.done.wait (%p4022_p4), [#allocation9], 2048  }
  0xe4   : > { %3220 = vsyncadd (%p4022_p4), [#allocation9], 4294965248 }
  0xe5   : > { %3222 = dma.done.wait (%p4022_p4), [#allocation12], 2048  }
  0xe6   : > { %3224 = vsyncadd (%p4022_p4), [#allocation12], 4294965248 }
  0xe7   : > { %3226 = dma.done.wait (%p4022_p4), [#allocation15], 4096  }
  0xe8   : > { %3228 = vsyncadd (%p4022_p4), [#allocation15], 4294963200  ;;  %v717_v0 = vld [vmem:[%s3664_s17] sm:$0xff]  ;;  %v718_v1 = vld [vmem:[%s3664_s17 + $0x8] sm:$0xff]  ;;  %v3268_v5 = vmov 0.0   ;;  %vm3269_vm0 = vmmov 0  }
  0xe9   : > { %719 = vadd.xlane.f32.xlu0 %v717_v0  ;;  %1038 = vadd.xlane.f32.xlu1 %v717_v0  ;;  %v2837_v2 = vld [vmem:[#allocation10] sm:$0xff]   ;;  %v2839_v4 = vld [vmem:[#allocation10 + $0x8] sm:$0xff]   ;;  %v2841_v23 = vld [vmem:[#allocation10 + $0x10] sm:$0xff]   ;;  %s4023_s25 = sld [smem:[#allocation26_spill]]  ;;  %s4024_s18 = sld [smem:[#allocation30_spill]]  ;;  %vm1023_vm1 = vcmask 130048  }
  0xea   : > { %v2838_v3 = vld [vmem:[#allocation11] sm:$0xff]   ;;  %2566 = vmatprep.subr.bf16.mxu0 %v3268_v5  ;;  %2586 = vmatprep.subr.bf16.mxu1 %v3268_v5  ;;  %v2840_v22 = vld [vmem:[#allocation11 + $0x8] sm:$0xff]   ;;  %v2842_v24 = vld [vmem:[#allocation11 + $0x10] sm:$0xff]   ;;  %s4025_s20 = sld [smem:[#allocation28_spill]]  ;;  %s4026_s21 = sld [smem:[#allocation23_spill]]  ;;  %vm1203_vm2 = vcmask 261120  }
  0xeb   : > { %2567 = vmatpush3.bf16.msra.mxu0 %v2837_v2  ;;  %2587 = vmatpush3.bf16.msra.mxu1 %v2838_v3  ;;  %v2843_v25 = vld [vmem:[#allocation10 + $0x18] sm:$0xff]   ;;  %v2845_v27 = vld [vmem:[#allocation10 + $0x20] sm:$0xff]   ;;  %v2847_v29 = vld [vmem:[#allocation10 + $0x28] sm:$0xff]   ;;  %s4027_s15 = sld [smem:[#allocation25_spill]]  ;;  %s3270_s2 = smov 96   ;;  %vm1444_vm4 = vcmask 523520  }
  0xec   : > { %2568 = vmatprep.subr.bf16.mxu0 %v3268_v5  ;;  %2588 = vmatprep.subr.bf16.mxu1 %v3268_v5  ;;  %v2844_v26 = vld [vmem:[#allocation11 + $0x18] sm:$0xff]   ;;  %v2846_v28 = vld [vmem:[#allocation11 + $0x20] sm:$0xff]   ;;  %v2848_v30 = vld [vmem:[#allocation11 + $0x28] sm:$0xff]   ;;  %s3271_s11 = smov 32   ;;  %vm1571_vm5 = vcmask 785920   ;;  %vm1698_vm6 = vcmask 1048320  }
  0xed   : > { %721 = vadd.xlane.f32.xlu0 %v718_v1  ;;  %1040 = vadd.xlane.f32.xlu1 %v718_v1  ;;  %v2849_v31 = vld [vmem:[#allocation10 + $0x30] sm:$0xff]   ;;  %v2851_v33 = vld [vmem:[#allocation10 + $0x38] sm:$0xff]   ;;  %v2853_v54 = vld [vmem:[#allocation8] sm:$0xff]   ;;  %s4029_s5 = sld [smem:[#allocation32_spill]]  ;;  %p4034_p10 = scmp.ne.s32.totalorder %s4016_s30, 0 }
  0xee   : > { %v2850_v32 = vld [vmem:[#allocation11 + $0x30] sm:$0xff]   ;;  %v2852_v34 = vld [vmem:[#allocation11 + $0x38] sm:$0xff]   ;;  %2582 = vmatprep.mubr.msk.bf16.mxu0 %vm3269_vm0, %v3268_v5  ;;  %2602 = vmatprep.mubr.msk.bf16.mxu1 %vm3269_vm0, %v3268_v5  ;;  %v2854_v58 = vld [vmem:[#allocation8 + $0x8] sm:$0xff]  }
  0xef   : > { %2569 = vmatpush3.bf16.msra.mxu0 %v2839_v4  ;;  %2589 = vmatpush3.bf16.msra.mxu1 %v2840_v22  ;;  %v2486_v43 = vld [vmem:[%s4023_s25] ss:$0 sm:$0xff]  ;;  %v2855_v60 = vld [vmem:[#allocation8 + $0x10] sm:$0xff]   ;;  %v2857_v62 = vld [vmem:[#allocation8 + $0x20] sm:$0xff]  }
  0xf0   : > { %2570 = vmatprep.subr.bf16.mxu0 %v3268_v5  ;;  %2590 = vmatprep.subr.bf16.mxu1 %v3268_v5  ;;  %v2487_v47 = vld [vmem:[%s3961_s3] ss:$0 sm:$0xff]  ;;  %v2859_v4 = vld [vmem:[#allocation8 + $0x30] sm:$0xff]   ;;  %p706_p2 = scmp.lt.s32.totalorder %s4026_s21, 1 }
  0xf1   : > { %v2856_v61 = vld [vmem:[#allocation8 + $0x18] sm:$0xff]  }
  0xf2   : > { %s707_s25 = scalar_select %p706_p2, %s4026_s21, 1 }
  0xf3   : > { %2571 = vmatpush3.bf16.msra.mxu0 %v2841_v23  ;;  %2591 = vmatpush3.bf16.msra.mxu1 %v2842_v24 }
  0xf4   : > { %2572 = vmatprep.subr.bf16.mxu0 %v3268_v5  ;;  %2592 = vmatprep.subr.bf16.mxu1 %v3268_v5  ;;  %s708_s8 = scalar_lea.vmem %s4027_s15, %s707_s25 }
  0xf7   : > { %2573 = vmatpush3.bf16.msra.mxu0 %v2843_v25  ;;  %2593 = vmatpush3.bf16.msra.mxu1 %v2844_v26 }
  0xf8   : > { %2574 = vmatprep.subr.bf16.mxu0 %v3268_v5  ;;  %2594 = vmatprep.subr.bf16.mxu1 %v3268_v5 }
  0xfb   : > { %2575 = vmatpush3.bf16.msra.mxu0 %v2845_v27  ;;  %2595 = vmatpush3.bf16.msra.mxu1 %v2846_v28  ;;  %v2418_v27 = vld [vmem:[%s4025_s20] ss:$0 sm:$0xff]  ;;  %s4028_s20 = sld [smem:[#allocation31_spill]] }
  0xfc   : > { %2576 = vmatprep.subr.bf16.mxu0 %v3268_v5  ;;  %2596 = vmatprep.subr.bf16.mxu1 %v3268_v5 }
  0xff   : > { %2577 = vmatpush3.bf16.msra.mxu0 %v2847_v29  ;;  %2597 = vmatpush3.bf16.msra.mxu1 %v2848_v30 }
 0x100   : > { %2578 = vmatprep.subr.bf16.mxu0 %v3268_v5  ;;  %2598 = vmatprep.subr.bf16.mxu1 %v3268_v5 }
 0x103   : > { %2579 = vmatpush3.bf16.msra.mxu0 %v2849_v31  ;;  %2599 = vmatpush3.bf16.msra.mxu1 %v2850_v32 }
 0x104   : > { %2580 = vmatprep.subr.bf16.mxu0 %v3268_v5  ;;  %2600 = vmatprep.subr.bf16.mxu1 %v3268_v5 }
 0x107   : > { %2581 = vmatpush3.bf16.msra.mxu0 %v2851_v33  ;;  %2601 = vmatpush3.bf16.msra.mxu1 %v2852_v34 }
 0x108   : > { %2606 = vmatprep.subr.bf16.mxu0 %v3268_v5  ;;  %2626 = vmatprep.subr.bf16.mxu1 %v3268_v5 }
 0x176   : > { %v720_v6 = vpop.xlane.xlu0 %719  ;;  %v1039_v7 = vpop.xlane.xlu1 %1038 }
 0x177   : > { %v724_v8 = vmul.f32 0.0078125, %v720_v6  ;;  %v1043_v9 = vmul.f32 0.0078125, %v1039_v7 }
 0x179   : > { %v3689_v10 = vsub.f32 %v717_v0, %v724_v8  ;;  %v3691_v11 = vsub.f32 %v717_v0, %v1043_v9  ;;  %v2860_v8 = vld [vmem:[#allocation8 + $0x38] sm:$0xff]  }
 0x17a   : > { %v722_v12 = vpop.xlane.xlu0 %721  ;;  %v1041_v13 = vpop.xlane.xlu1 %1040 }
 0x17b   : > { %v725_v14 = vmul.f32 0.0078125, %v722_v12  ;;  %v728_v15 = vmul.f32 %v3689_v10, %v3689_v10  ;;  %v1044_v16 = vmul.f32 0.0078125, %v1041_v13  ;;  %v1047_v19 = vmul.f32 %v3691_v11, %v3691_v11 }
 0x17d   : > { %v3695_v17 = vsub.f32 %v718_v1, %v725_v14  ;;  %730 = vadd.xlane.f32.xlu0 %v728_v15  ;;  %v3697_v18 = vsub.f32 %v718_v1, %v1044_v16  ;;  %v2858_v1 = vld [vmem:[#allocation8 + $0x28] sm:$0xff]   ;;  %v2409_v14 = vld [vmem:[%s4024_s18] ss:$0 sm:$0xff]  ;;  %s3272_s18 = smov 64  }
 0x17f   : > { %v729_v20 = vmul.f32 %v3695_v17, %v3695_v17  ;;  %v1048_v21 = vmul.f32 %v3697_v18, %v3697_v18 }
 0x181   : > { %1049 = vadd.xlane.f32.xlu0 %v1047_v19  ;;  %732 = vadd.xlane.f32.xlu1 %v729_v20 }
 0x185   : > { %1051 = vadd.xlane.f32.xlu1 %v1048_v21 }
 0x20a   : > { %v731_v35 = vpop.xlane.xlu0 %730 }
 0x20b   : > { %v734_v36 = vmul.f32 0.0078125, %v731_v35 }
 0x20d   : > { %v736_v37 = vadd.f32 1e-06, %v734_v36 }
 0x20e   : > { %v733_v38 = vpop.xlane.xlu1 %732  ;;  %v1050_v50 = vpop.xlane.xlu0 %1049 }
 0x20f   : > { %2909 = vrsqrt.f32 %v736_v37  ;;  %v735_v39 = vmul.f32 0.0078125, %v733_v38  ;;  %v1053_v56 = vmul.f32 0.0078125, %v1050_v50 }
 0x211   : > { %v737_v40 = vadd.f32 1e-06, %v735_v39  ;;  %v1055_v59 = vadd.f32 1e-06, %v1053_v56 }
 0x212   : > { %v1052_v48 = vpop.xlane.xlu1 %1051 }
 0x213   : > { %2911 = vrsqrt.f32 %v737_v40  ;;  %v1054_v53 = vmul.f32 0.0078125, %v1052_v48 }
 0x215   : > { %v1056_v57 = vadd.f32 1e-06, %v1054_v53 }
 0x217   : > { %2913 = vrsqrt.f32 %v1056_v57 }
 0x218   : > { %2915 = vrsqrt.f32 %v1055_v59 }
 0x219   : > { %v2910_v41 = vpop.eup %2909 }
 0x21a   : > { %v740_v42 = vmul.f32 %v2910_v41, %v3689_v10 }
 0x21c   : > { %v748_v46 = vmul.f32 %v2486_v43, %v740_v42 }
 0x21d   : > { %v2912_v44 = vpop.eup %2911 }
 0x21e   : > { %v741_v45 = vmul.f32 %v2912_v44, %v3695_v17  ;;  %v756_v51 = vadd.f32 %v2487_v47, %v748_v46  ;;  %v1191_v44 = vld [vmem:[%s708_s8] sm:$0x1]  ;;  %s4030_s8 = sld [smem:[#allocation33_spill]] }
 0x21f   : > { %vm1192_vm3 = vcmp.ne.s32.totalorder %v1191_v44, 0 }
 0x220   : > { %v749_v49 = vmul.f32 %v2486_v43, %v741_v45 }
 0x221   : > { %v2914_v63 = vpop.eup %2913 }
 0x222   : > { %v757_v52 = vadd.f32 %v2487_v47, %v749_v49  ;;  %v2916_v0 = vpop.eup %2915  ;;  %v1060_v2 = vmul.f32 %v2914_v63, %v3697_v18 }
 0x223   : > { %v1059_v3 = vmul.f32 %v2916_v0, %v3691_v11  ;;  %v2400_v11 = vld [vmem:[%s3965_s7] ss:$0 sm:$0xff] }
 0x224   : > { %v758_v55 = vpack.c.bf16 %v757_v52, %v756_v51  ;;  %v1068_v6 = vmul.f32 %v2486_v43, %v1060_v2 }
 0x225   : > { %v1067_v7 = vmul.f32 %v2486_v43, %v1059_v3  ;;  %v743_v43 = vlaneseq }
 0x226   : > { %2583 = vmatmul.mubr.bf16.vlgmr.msra.gmra.mrb[0].mxu0 %v758_v55  ;;  %2603 = vmatmul.mubr.bf16.vlgmr.msra.gmra.mrb[0].mxu1 %v758_v55  ;;  %v1076_v9 = vadd.f32 %v2487_v47, %v1068_v6 }
 0x227   : > { %2607 = vmatpush3.bf16.msra.mxu0 %v2853_v54  ;;  %2622 = vmatprep.mubr.msk.bf16.mxu0 %vm3269_vm0, %v3268_v5  ;;  %v1075_v10 = vadd.f32 %v2487_v47, %v1067_v7  ;;  %v3774_v45 = vshrl.u32 %v743_v43, 7  ;;  %v1193_v47 = vsel %vm1192_vm3, -1e+18, %v3268_v5 }
 0x228   : > { %2608 = vmatprep.subr.bf16.mxu0 %v3268_v5  ;;  %2630 = vmatprep.mubr.msk.bf16.mxu1 %vm3269_vm0, %v3268_v5 }
 0x229   : > { %v1077_v12 = vpack.c.bf16 %v1076_v9, %v1075_v10  ;;  %v745_v46 = vsub.s32 0, %v3774_v45 }
 0x22b   : > { %2609 = vmatpush3.bf16.msra.mxu0 %v2854_v58  ;;  %v3780_v48 = vrot.slane %v1193_v47, %v745_v46 }
 0x22c   : > { %2610 = vmatprep.subr.bf16.mxu0 %v3268_v5 }
 0x22f   : > { %2611 = vmatpush3.bf16.msra.mxu0 %v2855_v60 }
 0x230   : > { %2612 = vmatprep.subr.bf16.mxu0 %v3268_v5 }
 0x233   : > { %2613 = vmatpush3.bf16.msra.mxu0 %v2856_v61 }
 0x234   : > { %2614 = vmatprep.subr.bf16.mxu0 %v3268_v5 }
 0x237   : > { %2615 = vmatpush3.bf16.msra.mxu0 %v2857_v62 }
 0x238   : > { %2616 = vmatprep.subr.bf16.mxu0 %v3268_v5 }
 0x23b   : > { %2617 = vmatpush3.bf16.msra.mxu0 %v2858_v1 }
 0x23c   : > { %2618 = vmatprep.subr.bf16.mxu0 %v3268_v5 }
 0x23f   : > { %2619 = vmatpush3.bf16.msra.mxu0 %v2859_v4 }
 0x240   : > { %2620 = vmatprep.subr.bf16.mxu0 %v3268_v5 }
 0x243   : > { %2621 = vmatpush3.bf16.msra.mxu0 %v2860_v8 }
 0x244   : > { %2682 = vmatprep.subr.bf16.mxu0 %v3268_v5 }
 0x246   : > { %2623 = vmatmul.mubr.bf16.vlgmr.msra.gmra.mrb[4].mxu0 %v1077_v12 }
 0x247   : > { %2698 = vmatprep.mubr.msk.bf16.mxu0 %vm3269_vm0, %v3268_v5 }
 0x2f9   : > { %v864_v13 = vpop.f32.mrb[0].mxu0  ;;  %v976_v15 = vpop.f32.mrb[0].mxu1 }
 0x2fa   : > { %v865_v16 = vadd.f32 %v2400_v11, %v864_v13  ;;  %v2584_v17 = vpop.f32.mrb[1].mxu0  ;;  %v2604_v18 = vpop.f32.mrb[1].mxu1  ;;  %v977_v21 = vadd.f32 %v2409_v14, %v976_v15 }
 0x2fb   : > { %v867_v19 = vpop.f32.mrb[2].mxu0  ;;  %v979_v20 = vpop.f32.mrb[2].mxu1 }
 0x2fc   : > { %v980_v22 = vadd.f32 %v2409_v14, %v979_v20  ;;  %v2605_v23 = vpop.f32.mrb[3].mxu1  ;;  %983 = vxpose.xlu0.b32.start [1/2] (short) %v865_v16, 128  ;;  %v2585_v24 = vpop.f32.mrb[3].mxu0  ;;  %v868_v25 = vadd.f32 %v2400_v11, %v867_v19 }
 0x2fe   : > { %v3752_v26 = vpack.c.bf16 %v980_v22, %v977_v21 }
 0x300   : > { %984 = vxpose.xlu0.b32.end [2/2] (short) %v868_v25, 128 }
 0x319   : > { %v1183_v28 = vpop.f32.mrb[4].mxu0 }
 0x31a   : > { %v2624_v29 = vpop.f32.mrb[5].mxu0  ;;  %v1184_v31 = vadd.f32 %v2418_v27, %v1183_v28 }
 0x31b   : > { %v1186_v30 = vpop.f32.mrb[6].mxu0 }
 0x31c   : > { %v1187_v32 = vadd.f32 %v2418_v27, %v1186_v30  ;;  %v2625_v33 = vpop.f32.mrb[7].mxu0 }
 0x31e   : > { %v3757_v34 = vpack.c.bf16 %v1187_v32, %v1184_v31 }
 0x37c   : > { %v999_v35 = vpop.trf.xlu0 }
 0x380   : > { %v1000_v36 = vpop.trf.xlu0 }
 0x381   : > { %v1015_v37 = vpack.c.bf16 %v1000_v36, %v999_v35 }
 0x383   : > { %1024 = vst.msk [vmem:[#allocation2] sm:$0xff] %vm1023_vm1, %v1015_v37 }
 0x384   : > { %v1001_v38 = vpop.trf.xlu0 }
 0x388   : > { %v1002_v39 = vpop.trf.xlu0 }
 0x389   : > { %v1016_v40 = vpack.c.bf16 %v1002_v39, %v1001_v38 }
 0x38a   : > { %v1200_v41 = vld [vmem:[#allocation2] sm:$0xff] }
 0x38b   : > { %1025 = vst.msk [vmem:[#allocation2 + $0x8] sm:$0xff] %vm1023_vm1, %v1016_v40  ;;  %2627 = vmatpush3.bf16.msra.mxu1 %v1200_v41 }
 0x38c   : > { %2628 = vmatprep.subr.bf16.mxu1 %v3268_v5  ;;  %v1003_v3 = vpop.trf.xlu0 }
 0x390   : > { %v1004_v4 = vpop.trf.xlu0 }
 0x391   : > { %v1017_v6 = vpack.c.bf16 %v1004_v4, %v1003_v3 }
 0x392   : > { %v1201_v42 = vld [vmem:[#allocation2 + $0x8] sm:$0xff] }
 0x393   : > { %2629 = vmatpush3.bf16.msra.mxu1 %v1201_v42  ;;  %1026 = vst.msk [vmem:[#allocation2 + $0x10] sm:$0xff] %vm1023_vm1, %v1017_v6 }
 0x394   : > { %2634 = vmatprep.subr.bf16.mxu1 %v3268_v5  ;;  %v1005_v7 = vpop.trf.xlu0 }
 0x396   : > { %2631 = vmatmul.mubr.msk.bf16.vlgmr.msra.gmra.mrb[4].mxu1 %vm1203_vm2, %v3757_v34 }
 0x397   : > { %2635 = vmatpush3.bf16.msra.mxu1 %v3752_v26  ;;  %2636 = vmatprep.mubr.msk.bf16.mxu1 %vm3269_vm0, %v3268_v5 }
 0x398   : > { %2640 = vmatprep.subr.bf16.mxu1 %v3268_v5  ;;  %v1006_v8 = vpop.trf.xlu0 }
 0x399   : > { %v1018_v9 = vpack.c.bf16 %v1006_v8, %v1005_v7 }
 0x39a   : > { %v1318_v17 = vld [vmem:[#allocation2 + $0x10] sm:$0xff] }
 0x39b   : > { %1027 = vst.msk [vmem:[#allocation2 + $0x18] sm:$0xff] %vm1023_vm1, %v1018_v9 }
 0x39c   : > { %v1007_v20 = vpop.trf.xlu0 }
 0x3a0   : > { %v1008_v21 = vpop.trf.xlu0 }
 0x3a1   : > { %v1019_v22 = vpack.c.bf16 %v1008_v21, %v1007_v20 }
 0x3a2   : > { %v1319_v18 = vld [vmem:[#allocation2 + $0x18] sm:$0xff] }
 0x3a3   : > { %1028 = vst.msk [vmem:[#allocation2 + $0x20] sm:$0xff] %vm1023_vm1, %v1019_v22 }
 0x3a4   : > { %v1009_v23 = vpop.trf.xlu0 }
 0x3a8   : > { %v1010_v24 = vpop.trf.xlu0 }
 0x3a9   : > { %v1020_v25 = vpack.c.bf16 %v1010_v24, %v1009_v23 }
 0x3aa   : > { %v1446_v4 = vld [vmem:[#allocation2 + $0x20] sm:$0xff] }
 0x3ab   : > { %1029 = vst.msk [vmem:[#allocation2 + $0x28] sm:$0xff] %vm1023_vm1, %v1020_v25 }
 0x3ac   : > { %v1011_v27 = vpop.trf.xlu0 }
 0x3b0   : > { %v1012_v28 = vpop.trf.xlu0 }
 0x3b1   : > { %v1021_v29 = vpack.c.bf16 %v1012_v28, %v1011_v27 }
 0x3b3   : > { %1030 = vst.msk [vmem:[#allocation2 + $0x30] sm:$0xff] %vm1023_vm1, %v1021_v29 }
 0x3b4   : > { %v1013_v30 = vpop.trf.xlu0 }
 0x3b8   : > { %v1014_v31 = vpop.trf.xlu0 }
 0x3b9   : > { %v1022_v32 = vpack.c.bf16 %v1014_v31, %v1013_v30 }
 0x3bb   : > { %1031 = vst.msk [vmem:[#allocation2 + $0x38] sm:$0xff] %vm1023_vm1, %v1022_v32 }
 0x469   : > { %v1241_v49 = vpop.f32.mrb[4].mxu1 }
 0x46a   : > { %v1242_v50 = vadd.f32 %v1241_v49, %v3780_v48  ;;  %v2632_v51 = vpop.f32.mrb[5].mxu1 }
 0x46b   : > { %v1244_v52 = vpop.f32.mrb[6].mxu1 }
 0x46c   : > { %v1245_v53 = vadd.f32 %v1244_v52, %v3780_v48  ;;  %v2633_v54 = vpop.f32.mrb[7].mxu1  ;;  %v1249_v55 = vsel %vm1023_vm1, %v1242_v50, -inf }
 0x46d   : > { %1250 = vmax.xlane.f32.xlu1 %v1249_v55 }
 0x46e   : > { %v1252_v56 = vsel %vm1023_vm1, %v1245_v53, -inf }
 0x471   : > { %1253 = vmax.xlane.f32.xlu1 %v1252_v56 }
 0x4fa   : > { %v1251_v57 = vpop.xlane.xlu1 %1250 }
 0x4fb   : > { %v1255_v58 = vsub.f32 %v1242_v50, %v1251_v57 }
 0x4fd   : > { %v1257_v59 = vmul.f32 1.442695, %v1255_v58 }
 0x4fe   : > { %v1254_v60 = vpop.xlane.xlu1 %1253 }
 0x4ff   : > { %2917 = vpow2.f32 %v1257_v59  ;;  %v1256_v61 = vsub.f32 %v1245_v53, %v1254_v60 }
 0x501   : > { %v1259_v62 = vmul.f32 1.442695, %v1256_v61 }
 0x503   : > { %2919 = vpow2.f32 %v1259_v62 }
 0x509   : > { %v2918_v63 = vpop.eup %2917 }
 0x50a   : > { %v1261_v0 = vsel %vm1023_vm1, %v2918_v63, 0.0 }
 0x50b   : > { %1262 = vadd.xlane.f32.xlu1 %v1261_v0 }
 0x50d   : > { %v2920_v1 = vpop.eup %2919 }
 0x50e   : > { %v1264_v2 = vsel %vm1023_vm1, %v2920_v1, 0.0 }
 0x50f   : > { %1265 = vadd.xlane.f32.xlu1 %v1264_v2 }
 0x520   : > { %1322 = vrot.lane.b32.xlu1 %v3757_v34, %s3270_s2 }
 0x598   : > { %v1263_v10 = vpop.xlane.xlu1 %1262 }
 0x599   : > { %2921 = vrcp.f32 %v1263_v10 }
 0x59c   : > { %v1266_v12 = vpop.xlane.xlu1 %1265 }
 0x59d   : > { %2923 = vrcp.f32 %v1266_v12 }
 0x5a0   : > { %v1323_v19 = vpop.permute.xlu1 %1322 }
 0x5a3   : > { %v2922_v11 = vpop.eup %2921 }
 0x5a4   : > { %v1269_v14 = vmul.f32 %v2922_v11, %v2918_v63 }
 0x5a7   : > { %v2924_v13 = vpop.eup %2923 }
 0x5a8   : > { %v1270_v15 = vmul.f32 %v2924_v13, %v2920_v1 }
 0x5aa   : > { %v1271_v16 = vpack.c.bf16 %v1270_v15, %v1269_v14 }
 0x5ac   : > { %2637 = vmatmul.mubr.msk.bf16.vlgmr.msra.gmra.mrb[8].mxu1 %vm1023_vm1, %v1271_v16 }
 0x5ad   : > { %2641 = vmatpush3.bf16.msra.mxu1 %v1318_v17  ;;  %2644 = vmatprep.mubr.msk.bf16.mxu1 %vm3269_vm0, %v3268_v5 }
 0x5ae   : > { %2642 = vmatprep.subr.bf16.mxu1 %v3268_v5 }
 0x5b1   : > { %2643 = vmatpush3.bf16.msra.mxu1 %v1319_v18 }
 0x5b2   : > { %2648 = vmatprep.subr.bf16.mxu1 %v3268_v5 }
 0x5b4   : > { %2645 = vmatmul.mubr.msk.bf16.vlgmr.msra.gmra.mrb[12].mxu1 %vm1203_vm2, %v1323_v19 }
 0x5b5   : > { %2650 = vmatprep.mubr.msk.bf16.mxu1 %vm3269_vm0, %v3268_v5 }
 0x67f   : > { %v1309_v33 = vpop.f32.mrb[8].mxu1 }
 0x680   : > { %v2638_v35 = vpop.f32.mrb[9].mxu1 }
 0x681   : > { %v1312_v36 = vpop.f32.mrb[10].mxu1 }
 0x682   : > { %v1316_v37 = vpack.c.bf16 %v1312_v36, %v1309_v33  ;;  %v2639_v38 = vpop.f32.mrb[11].mxu1 }
 0x684   : > { %1317 = vst.msk [vmem:[#allocation4] sm:$0xff] %vm1203_vm2, %v1316_v37 }
 0x687   : > { %v1361_v39 = vpop.f32.mrb[12].mxu1 }
 0x688   : > { %v1362_v40 = vadd.f32 %v1361_v39, %v3780_v48  ;;  %v2646_v41 = vpop.f32.mrb[13].mxu1 }
 0x689   : > { %v1364_v42 = vpop.f32.mrb[14].mxu1  ;;  %v1574_v41 = vld [vmem:[#allocation2 + $0x38] sm:$0xff] }
 0x68a   : > { %v1365_v43 = vadd.f32 %v1364_v42, %v3780_v48  ;;  %v2647_v44 = vpop.f32.mrb[15].mxu1  ;;  %v1368_v47 = vsel %vm1023_vm1, %v1362_v40, -inf }
 0x68b   : > { %1369 = vmax.xlane.f32.xlu1 %v1368_v47 }
 0x68c   : > { %v1371_v49 = vsel %vm1023_vm1, %v1365_v43, -inf }
 0x68d   : > { %1372 = vmax.xlane.f32.xlu0 %v1371_v49 }
 0x6a3   : > { %1576 = vrot.lane.b32.xlu0 %v3757_v34, %s3271_s11 }
 0x718   : > { %v1370_v50 = vpop.xlane.xlu1 %1369 }
 0x719   : > { %v1374_v51 = vsub.f32 %v1362_v40, %v1370_v50  ;;  %v1573_v40 = vld [vmem:[#allocation2 + $0x30] sm:$0xff] }
 0x71a   : > { %v1373_v52 = vpop.xlane.xlu0 %1372 }
 0x71b   : > { %v1376_v53 = vmul.f32 1.442695, %v1374_v51  ;;  %v1375_v54 = vsub.f32 %v1365_v43, %v1373_v52 }
 0x71d   : > { %2925 = vpow2.f32 %v1376_v53  ;;  %v1378_v55 = vmul.f32 1.442695, %v1375_v54 }
 0x71e   : > { %v1577_v42 = vpop.permute.xlu0 %1576 }
 0x71f   : > { %2927 = vpow2.f32 %v1378_v55 }
 0x727   : > { %v2926_v56 = vpop.eup %2925 }
 0x728   : > { %v1380_v57 = vsel %vm1023_vm1, %v2926_v56, 0.0 }
 0x729   : > { %v2928_v58 = vpop.eup %2927  ;;  %1381 = vadd.xlane.f32.xlu1 %v1380_v57 }
 0x72a   : > { %v1383_v59 = vsel %vm1023_vm1, %v2928_v58, 0.0 }
 0x72d   : > { %1384 = vadd.xlane.f32.xlu1 %v1383_v59 }
 0x73e   : > { %1392 = vrot.lane.b32.xlu1 %v3752_v26, %s3270_s2 }
 0x742   : > { %1449 = vrot.lane.b32.xlu1 %v3757_v34, %s3272_s18  ;;  %v1447_v34 = vld [vmem:[#allocation2 + $0x28] sm:$0xff] }
 0x7b6   : > { %v1382_v60 = vpop.xlane.xlu1 %1381 }
 0x7b7   : > { %2929 = vrcp.f32 %v1382_v60 }
 0x7ba   : > { %v1385_v61 = vpop.xlane.xlu1 %1384 }
 0x7bb   : > { %2931 = vrcp.f32 %v1385_v61 }
 0x7be   : > { %v1393_v62 = vpop.permute.xlu1 %1392 }
 0x7bf   : > { %2649 = vmatpush3.bf16.msra.mxu1 %v1393_v62 }
 0x7c0   : > { %2654 = vmatprep.subr.bf16.mxu1 %v3268_v5 }
 0x7c1   : > { %v2930_v63 = vpop.eup %2929 }
 0x7c2   : > { %v1388_v1 = vmul.f32 %v2930_v63, %v2926_v56  ;;  %v1450_v6 = vpop.permute.xlu1 %1449 }
 0x7c5   : > { %v2932_v0 = vpop.eup %2931 }
 0x7c6   : > { %v1389_v2 = vmul.f32 %v2932_v0, %v2928_v58 }
 0x7c8   : > { %v1390_v3 = vpack.c.bf16 %v1389_v2, %v1388_v1 }
 0x7ca   : > { %2651 = vmatmul.mubr.msk.bf16.vlgmr.msra.gmra.mrb[16].mxu1 %vm1023_vm1, %v1390_v3 }
 0x7cb   : > { %2655 = vmatpush3.bf16.msra.mxu1 %v1446_v4  ;;  %2658 = vmatprep.mubr.msk.bf16.mxu1 %vm3269_vm0, %v3268_v5 }
 0x7cc   : > { %2656 = vmatprep.subr.bf16.mxu1 %v3268_v5 }
 0x7cf   : > { %2657 = vmatpush3.bf16.msra.mxu1 %v1447_v34 }
 0x7d0   : > { %2662 = vmatprep.subr.bf16.mxu1 %v3268_v5 }
 0x7d2   : > { %2659 = vmatmul.mubr.msk.bf16.vlgmr.msra.gmra.mrb[20].mxu1 %vm1203_vm2, %v1450_v6 }
 0x7d3   : > { %2664 = vmatprep.mubr.msk.bf16.mxu1 %vm3269_vm0, %v3268_v5 }
 0x89d   : > { %v3826_v7 = vpop.f32.mrb[16].mxu1 }
 0x89e   : > { %v2652_v8 = vpop.f32.mrb[17].mxu1 }
 0x89f   : > { %v3828_v9 = vpop.f32.mrb[18].mxu1 }
 0x8a0   : > { %v1439_v10 = vpack.c.bf16 %v3828_v9, %v3826_v7  ;;  %v2653_v12 = vpop.f32.mrb[19].mxu1  ;;  %v2861_v7 = vld [vmem:[#allocation13] sm:$0xff]   ;;  %v2862_v9 = vld [vmem:[#allocation13 + $0x8] sm:$0xff]  }
 0x8a1   : > { %2683 = vmatpush3.bf16.msra.mxu0 %v2861_v7 }
 0x8a2   : > { %2684 = vmatprep.subr.bf16.mxu0 %v3268_v5 }
 0x8a5   : > { %v1488_v11 = vpop.f32.mrb[20].mxu1  ;;  %2685 = vmatpush3.bf16.msra.mxu0 %v2862_v9  ;;  %v2444_v9 = vld [vmem:[%s4029_s5] ss:$0 sm:$0xff]  ;;  %s2485_s5 = sshll.u32 %s4026_s21, 8  ;;  %s3274_s21 = smov [#allocation17]  }
 0x8a6   : > { %v1489_v13 = vadd.f32 %v1488_v11, %v3780_v48  ;;  %v2660_v14 = vpop.f32.mrb[21].mxu1  ;;  %2686 = vmatprep.subr.bf16.mxu0 %v3268_v5 }
 0x8a7   : > { %v1491_v15 = vpop.f32.mrb[22].mxu1 }
 0x8a8   : > { %v1492_v16 = vadd.f32 %v1491_v15, %v3780_v48  ;;  %v2661_v17 = vpop.f32.mrb[23].mxu1  ;;  %v1495_v18 = vsel %vm1023_vm1, %v1489_v13, -inf }
 0x8a9   : > { %1496 = vmax.xlane.f32.xlu1 %v1495_v18  ;;  %v2865_v17 = vld [vmem:[#allocation13 + $0x20] sm:$0xff]   ;;  %v2866_v18 = vld [vmem:[#allocation13 + $0x28] sm:$0xff]  }
 0x8aa   : > { %v1498_v19 = vsel %vm1023_vm1, %v1492_v16, -inf }
 0x8ad   : > { %1499 = vmax.xlane.f32.xlu1 %v1498_v19  ;;  %v2867_v19 = vld [vmem:[#allocation13 + $0x30] sm:$0xff]  }
 0x936   : > { %v1497_v20 = vpop.xlane.xlu1 %1496 }
 0x937   : > { %v1501_v21 = vsub.f32 %v1489_v13, %v1497_v20  ;;  %v2868_v20 = vld [vmem:[#allocation13 + $0x38] sm:$0xff]  }
 0x939   : > { %v1503_v22 = vmul.f32 1.442695, %v1501_v21 }
 0x93a   : > { %v1500_v23 = vpop.xlane.xlu1 %1499 }
 0x93b   : > { %2933 = vpow2.f32 %v1503_v22  ;;  %v1502_v24 = vsub.f32 %v1492_v16, %v1500_v23  ;;  %v2864_v16 = vld [vmem:[#allocation13 + $0x18] sm:$0xff]  }
 0x93d   : > { %v1505_v25 = vmul.f32 1.442695, %v1502_v24 }
 0x93f   : > { %2935 = vpow2.f32 %v1505_v25 }
 0x945   : > { %v2934_v27 = vpop.eup %2933 }
 0x946   : > { %v1507_v28 = vsel %vm1023_vm1, %v2934_v27, 0.0 }
 0x947   : > { %1508 = vadd.xlane.f32.xlu1 %v1507_v28 }
 0x949   : > { %v2936_v29 = vpop.eup %2935 }
 0x94a   : > { %v1510_v30 = vsel %vm1023_vm1, %v2936_v29, 0.0 }
 0x94b   : > { %1511 = vadd.xlane.f32.xlu1 %v1510_v30 }
 0x95c   : > { %1519 = vrot.lane.b32.xlu1 %v3752_v26, %s3272_s18 }
 0x9d4   : > { %v1509_v31 = vpop.xlane.xlu1 %1508 }
 0x9d5   : > { %2937 = vrcp.f32 %v1509_v31 }
 0x9d8   : > { %v1512_v32 = vpop.xlane.xlu1 %1511 }
 0x9d9   : > { %2939 = vrcp.f32 %v1512_v32 }
 0x9dc   : > { %v1520_v33 = vpop.permute.xlu1 %1519 }
 0x9dd   : > { %2663 = vmatpush3.bf16.msra.mxu1 %v1520_v33  ;;  %v2961_v33 = vld [vmem:[%s3664_s17] sm:$0xff] }
 0x9de   : > { %2668 = vmatprep.subr.bf16.mxu1 %v3268_v5 }
 0x9df   : > { %v2938_v35 = vpop.eup %2937 }
 0x9e0   : > { %v1515_v37 = vmul.f32 %v2938_v35, %v2934_v27 }
 0x9e3   : > { %v2940_v36 = vpop.eup %2939 }
 0x9e4   : > { %v1516_v38 = vmul.f32 %v2940_v36, %v2936_v29  ;;  %v2435_v29 = vld [vmem:[%s4028_s20] ss:$0 sm:$0xff]  ;;  %s4032_s20 = sld [smem:[#allocation35_spill]] }
 0x9e6   : > { %v1517_v39 = vpack.c.bf16 %v1516_v38, %v1515_v37  ;;  %v2962_v38 = vld [vmem:[%s3664_s17 + $0x8] sm:$0xff]  ;;  %s705_s17 = scalar_lea.vmem [#allocation17], %s2392_s12  ;;  %s2211_s12 = scalar_lea.sflag [#allocation7], %s3658_s1 }
 0x9e7   : > { %s2226_s25 = sshll.u32 %s705_s17, 4  ;;  %s3903_s25 = int_to_ptr.vmem [resolvable:$true] %s2226_s25 }
 0x9e8   : > { %2665 = vmatmul.mubr.msk.bf16.vlgmr.msra.gmra.mrb[24].mxu1 %vm1023_vm1, %v1517_v39 }
 0x9e9   : > { %2669 = vmatpush3.bf16.msra.mxu1 %v1573_v40  ;;  %2672 = vmatprep.mubr.msk.bf16.mxu1 %vm3269_vm0, %v3268_v5  ;;  %v2869_v40 = vld [vmem:[#allocation14] ss:$8 sps:$4 sm:$0xff]  }
 0x9ea   : > { %2670 = vmatprep.subr.bf16.mxu1 %v3268_v5 }
 0x9ed   : > { %2671 = vmatpush3.bf16.msra.mxu1 %v1574_v41  ;;  %v2871_v41 = vld [vmem:[#allocation14 + $0x4] ss:$8 sps:$4 sm:$0xff]  }
 0x9ee   : > { %2676 = vmatprep.subr.bf16.mxu1 %v3268_v5 }
 0x9f0   : > { %2673 = vmatmul.mubr.msk.bf16.vlgmr.msra.gmra.mrb[28].mxu1 %vm1203_vm2, %v1577_v42  ;;  %v2874_v42 = vld [vmem:[#allocation14 + $0x14] ss:$8 sps:$4 sm:$0xff]  }
 0x9f1   : > { %2678 = vmatprep.mubr.msk.bf16.mxu1 %vm3269_vm0, %v3268_v5 }
 0xabb   : > { %v1559_v43 = vpop.f32.mrb[24].mxu1 }
 0xabc   : > { %v2666_v44 = vpop.f32.mrb[25].mxu1 }
 0xabd   : > { %v1562_v47 = vpop.f32.mrb[26].mxu1 }
 0xabe   : > { %v1566_v49 = vpack.c.bf16 %v1562_v47, %v1559_v43  ;;  %v2667_v50 = vpop.f32.mrb[27].mxu1  ;;  %v2872_v43 = vld [vmem:[#allocation14 + $0x10] ss:$8 sps:$4 sm:$0xff]  }
 0xac3   : > { %v1615_v51 = vpop.f32.mrb[28].mxu1 }
 0xac4   : > { %v1616_v52 = vadd.f32 %v1615_v51, %v3780_v48  ;;  %v2674_v53 = vpop.f32.mrb[29].mxu1 }
 0xac5   : > { %v1618_v54 = vpop.f32.mrb[30].mxu1 }
 0xac6   : > { %v1619_v55 = vadd.f32 %v1618_v54, %v3780_v48  ;;  %v2675_v56 = vpop.f32.mrb[31].mxu1  ;;  %v1622_v57 = vsel %vm1023_vm1, %v1616_v52, -inf }
 0xac7   : > { %1623 = vmax.xlane.f32.xlu1 %v1622_v57  ;;  %v2875_v56 = vld [vmem:[#allocation14 + $0x20] ss:$8 sps:$4 sm:$0xff]   ;;  %v2880_v57 = vld [vmem:[#allocation14 + $0x34] ss:$8 sps:$4 sm:$0xff]  }
 0xac8   : > { %v1625_v58 = vsel %vm1023_vm1, %v1619_v55, -inf }
 0xac9   : > { %1626 = vmax.xlane.f32.xlu0 %v1625_v58  ;;  %v2878_v58 = vld [vmem:[#allocation14 + $0x30] ss:$8 sps:$4 sm:$0xff]  }
 0xb54   : > { %v1624_v59 = vpop.xlane.xlu1 %1623 }
 0xb55   : > { %v1628_v60 = vsub.f32 %v1616_v52, %v1624_v59  ;;  %v2883_v59 = vld [vmem:[#allocation14 + $0x44] ss:$8 sps:$4 sm:$0xff]  }
 0xb56   : > { %v1627_v61 = vpop.xlane.xlu0 %1626 }
 0xb57   : > { %v1630_v62 = vmul.f32 1.442695, %v1628_v60  ;;  %v1629_v63 = vsub.f32 %v1619_v55, %v1627_v61  ;;  %v2877_v55 = vld [vmem:[#allocation14 + $0x24] ss:$8 sps:$4 sm:$0xff]   ;;  %v2881_v60 = vld [vmem:[#allocation14 + $0x40] ss:$8 sps:$4 sm:$0xff]  }
 0xb58   : > { %v2886_v61 = vld [vmem:[#allocation14 + $0x54] ss:$8 sps:$4 sm:$0xff]  }
 0xb59   : > { %2941 = vpow2.f32 %v1630_v62  ;;  %v1632_v0 = vmul.f32 1.442695, %v1629_v63  ;;  %v2884_v62 = vld [vmem:[#allocation14 + $0x50] ss:$8 sps:$4 sm:$0xff]   ;;  %v2889_v63 = vld [vmem:[#allocation14 + $0x64] ss:$8 sps:$4 sm:$0xff]  }
 0xb5b   : > { %2943 = vpow2.f32 %v1632_v0  ;;  %v2887_v0 = vld [vmem:[#allocation14 + $0x60] ss:$8 sps:$4 sm:$0xff]  }
 0xb63   : > { %v2942_v1 = vpop.eup %2941 }
 0xb64   : > { %v1634_v2 = vsel %vm1023_vm1, %v2942_v1, 0.0 }
 0xb65   : > { %v2944_v3 = vpop.eup %2943  ;;  %1635 = vadd.xlane.f32.xlu1 %v1634_v2  ;;  %v2890_v2 = vld [vmem:[#allocation14 + $0x70] ss:$8 sps:$4 sm:$0xff]  }
 0xb66   : > { %v1637_v48 = vsel %vm1023_vm1, %v2944_v3, 0.0 }
 0xb67   : > { %1638 = vadd.xlane.f32.xlu0 %v1637_v48  ;;  %v2893_v48 = vld [vmem:[#allocation16 + $0x40] sm:$0xff]  }
 0xb76   : > { %1646 = vrot.lane.b32.xlu1 %v3752_v26, %s3271_s11 }
 0xb7a   : > { %1568 = vrot.lane.b32.xlu1 %v1566_v49, %s3272_s18  ;;  %s4031_s18 = sld [smem:[#allocation34_spill]] }
 0xb7d   : > { %1441 = vrot.lane.b32.xlu0 %v1439_v10, %s3271_s11  ;;  %v2863_v10 = vld [vmem:[#allocation13 + $0x10] sm:$0xff]   ;;  %s3161_s11 = scalar_lea.vmem %s3903_s25, 256 }
 0xb7e   : > { %2687 = vmatpush3.bf16.msra.mxu0 %v2863_v10  ;;  %p3162_p9 = scmp.ne.s32.totalorder %s3903_s25, %s3161_s11 }
 0xb7f   : > { %2688 = vmatprep.subr.bf16.mxu0 %v3268_v5 }
 0xb80   : > { %p3163_p12 = pnand %p3162_p9, %p4034_p10 }
 0xb82   : > { %2689 = vmatpush3.bf16.msra.mxu0 %v2864_v16  ;;  %p3164_p0 = pneg %p3163_p12 }
 0xb83   : > { %2690 = vmatprep.subr.bf16.mxu0 %v3268_v5 }
 0xb86   : > { %2691 = vmatpush3.bf16.msra.mxu0 %v2865_v17 }
 0xb87   : > { %2692 = vmatprep.subr.bf16.mxu0 %v3268_v5 }
 0xb8a   : > { %2693 = vmatpush3.bf16.msra.mxu0 %v2866_v18  ;;  %v2445_v18 = vld [vmem:[%s4030_s8] ss:$0 sm:$0xff]  ;;  %s4033_s8 = sld [smem:[#allocation36_spill]] }
 0xb8b   : > { %2694 = vmatprep.subr.bf16.mxu0 %v3268_v5 }
 0xb8e   : > { %2695 = vmatpush3.bf16.msra.mxu0 %v2867_v19 }
 0xb8f   : > { %2696 = vmatprep.subr.bf16.mxu0 %v3268_v5 }
 0xb92   : > { %2697 = vmatpush3.bf16.msra.mxu0 %v2868_v20 }
 0xb93   : > { %2544 = vmatprep.subr.bf16.mxu0 %v2893_v48 }
 0xbf2   : > { %v1636_v4 = vpop.xlane.xlu1 %1635 }
 0xbf3   : > { %2945 = vrcp.f32 %v1636_v4  ;;  %v2894_v4 = vld [vmem:[#allocation16] sm:$0xff]  }
 0xbf4   : > { %v1639_v34 = vpop.xlane.xlu0 %1638 }
 0xbf5   : > { %2947 = vrcp.f32 %v1639_v34  ;;  %v2895_v34 = vld [vmem:[#allocation16 + $0x48] sm:$0xff]  }
 0xbf6   : > { %v1647_v6 = vpop.permute.xlu1 %1646 }
 0xbf7   : > { %2677 = vmatpush3.bf16.msra.mxu1 %v1647_v6  ;;  %v2896_v6 = vld [vmem:[#allocation16 + $0x8] sm:$0xff]  }
 0xbf8   : > { %v1442_v8 = vpop.permute.xlu0 %1441  ;;  %1964 = vmatprep.subr.bf16.mxu1 %v2871_v41 }
 0xbf9   : > { %1445 = vst.msk [vmem:[#allocation4] sm:$0xff] %vm1444_vm4, %v1442_v8 }
 0xbfa   : > { %v1569_v12 = vpop.permute.xlu1 %1568 }
 0xbfb   : > { %1572 = vst.msk [vmem:[#allocation4] sm:$0xff] %vm1571_vm5, %v1569_v12 }
 0xbfd   : > { %v2946_v26 = vpop.eup %2945 }
 0xbfe   : > { %v1642_v13 = vmul.f32 %v2946_v26, %v2942_v1  ;;  %v2892_v1 = vld [vmem:[#allocation14 + $0x74] ss:$8 sps:$4 sm:$0xff]  }
 0xbff   : > { %v2948_v11 = vpop.eup %2947 }
 0xc00   : > { %v1643_v14 = vmul.f32 %v2948_v11, %v2944_v3  ;;  %v3273_v3 = vmov 0  }
 0xc02   : > { %v1644_v15 = vpack.c.bf16 %v1643_v14, %v1642_v13 }
 0xc04   : > { %2679 = vmatmul.mubr.msk.bf16.vlgmr.msra.gmra.mrb[32].mxu1 %vm1023_vm1, %v1644_v15 }
 0xc05   : > { %1965 = vmatpush1.bf16.msra.mxu1 %v2869_v40  ;;  %1996 = vmatprep.mubr.bf16.mxu1 %v3273_v3 }
 0xc06   : > { %1966 = vmatprep.subr.bf16.mxu1 %v2874_v42 }
 0xc09   : > { %1967 = vmatpush1.bf16.msra.mxu1 %v2872_v43 }
 0xc0a   : > { %1968 = vmatprep.subr.bf16.mxu1 %v2877_v55 }
 0xc0d   : > { %1969 = vmatpush1.bf16.msra.mxu1 %v2875_v56 }
 0xc0e   : > { %1970 = vmatprep.subr.bf16.mxu1 %v2880_v57 }
 0xc11   : > { %1971 = vmatpush1.bf16.msra.mxu1 %v2878_v58 }
 0xc12   : > { %1972 = vmatprep.subr.bf16.mxu1 %v2883_v59 }
 0xc15   : > { %1973 = vmatpush1.bf16.msra.mxu1 %v2881_v60 }
 0xc16   : > { %1974 = vmatprep.subr.bf16.mxu1 %v2886_v61 }
 0xc19   : > { %1975 = vmatpush1.bf16.msra.mxu1 %v2884_v62 }
 0xc1a   : > { %1976 = vmatprep.subr.bf16.mxu1 %v2889_v63 }
 0xc1d   : > { %1977 = vmatpush1.bf16.msra.mxu1 %v2887_v0 }
 0xc1e   : > { %1978 = vmatprep.subr.bf16.mxu1 %v2892_v1 }
 0xc21   : > { %1979 = vmatpush1.bf16.msra.mxu1 %v2890_v2 }
 0xcd7   : > { %v1686_v21 = vpop.f32.mrb[32].mxu1 }
 0xcd8   : > { %v2680_v22 = vpop.f32.mrb[33].mxu1 }
 0xcd9   : > { %v1689_v23 = vpop.f32.mrb[34].mxu1 }
 0xcda   : > { %v1693_v24 = vpack.c.bf16 %v1689_v23, %v1686_v21  ;;  %v2681_v25 = vpop.f32.mrb[35].mxu1  ;;  %v2897_v23 = vld [vmem:[#allocation16 + $0x50] sm:$0xff]  }
 0xcdb   : > { %v2899_v25 = vld [vmem:[#allocation16 + $0x58] sm:$0xff]  }
 0xcdc   : > { %1695 = vrot.lane.b32.xlu1 %v1693_v24, %s3270_s2  ;;  %v2898_v24 = vld [vmem:[#allocation16 + $0x10] sm:$0xff]   ;;  %s3908_s2 = scalar_lea.hbm %s4033_s8, %s2485_s5 }
 0xd4e   : > { %v1696_v27 = vpop.permute.xlu1 %1695 }
 0xd4f   : > { %1699 = vst.msk [vmem:[#allocation4] sm:$0xff] %vm1698_vm6, %v1696_v27  ;;  %v2900_v27 = vld [vmem:[#allocation16 + $0x18] sm:$0xff]  }
 0xd56   : > { %v1700_v28 = vld [vmem:[#allocation4] sm:$0xff] }
 0xd57   : > { %2699 = vmatmul.mubr.bf16.vlgmr.msra.gmra.mrb[8].mxu0 %v1700_v28  ;;  %v2901_v28 = vld [vmem:[#allocation16 + $0x60] sm:$0xff]  }
 0xd58   : > { %2545 = vmatpush3.bf16.msra.mxu0 %v2894_v4 }
 0xd59   : > { %2546 = vmatprep.subr.bf16.mxu0 %v2895_v34 }
 0xd5c   : > { %2547 = vmatpush3.bf16.msra.mxu0 %v2896_v6 }
 0xd5d   : > { %2548 = vmatprep.subr.bf16.mxu0 %v2897_v23 }
 0xd60   : > { %2549 = vmatpush3.bf16.msra.mxu0 %v2898_v24 }
 0xd61   : > { %2550 = vmatprep.subr.bf16.mxu0 %v2899_v25 }
 0xd64   : > { %2551 = vmatpush3.bf16.msra.mxu0 %v2900_v27 }
 0xd65   : > { %2552 = vmatprep.subr.bf16.mxu0 %v2901_v28 }
 0xe2a   : > { %v1806_v5 = vpop.f32.mrb[8].mxu0 }
 0xe2b   : > { %v1807_v30 = vadd.f32 %v2435_v29, %v1806_v5  ;;  %v2700_v31 = vpop.f32.mrb[9].mxu0  ;;  %v2903_v5 = vld [vmem:[#allocation16 + $0x68] sm:$0xff]  }
 0xe2c   : > { %v1809_v32 = vpop.f32.mrb[10].mxu0  ;;  %v2905_v31 = vld [vmem:[#allocation16 + $0x70] sm:$0xff]  }
 0xe2d   : > { %v3875_v35 = vadd.f32 %v2961_v33, %v1807_v30  ;;  %v1810_v36 = vadd.f32 %v2435_v29, %v1809_v32  ;;  %v2701_v37 = vpop.f32.mrb[11].mxu0  ;;  %v2902_v29 = vld [vmem:[#allocation16 + $0x20] sm:$0xff]   ;;  %v2904_v30 = vld [vmem:[#allocation16 + $0x28] sm:$0xff]   ;;  %v2906_v32 = vld [vmem:[#allocation16 + $0x30] sm:$0xff]  }
 0xe2e   : > { %2553 = vmatpush3.bf16.msra.mxu0 %v2902_v29  ;;  %v2907_v33 = vld [vmem:[#allocation16 + $0x78] sm:$0xff]  }
 0xe2f   : > { %v3878_v39 = vadd.f32 %v2962_v38, %v1810_v36  ;;  %1817 = vadd.xlane.f32.xlu1 %v3875_v35  ;;  %2554 = vmatprep.subr.bf16.mxu0 %v2903_v5  ;;  %v2908_v36 = vld [vmem:[#allocation16 + $0x38] sm:$0xff]   ;;  %v1880_v38 = vsub.s32 1, %v3774_v45 }
 0xe30   : > { %v1872_v37 = vld [vmem:[%s4031_s18] sm:$0x3]  ;;  %s3165_s18 = sshll.u32 %s3274_s21, 4  ;;  %s3166_s18 = int_to_ptr.vmem [resolvable:$false] %s3165_s18 }
 0xe31   : > { %1819 = vadd.xlane.f32.xlu0 %v3878_v39  ;;  %v1877_v40 = vrot.slane %v1872_v37, %v745_v46  ;;  %v1881_v41 = vrot.slane %v1872_v37, %v1880_v38  ;;  %s3167_s24 = scalar_lea.vmem %s3166_s18, 512  ;;  %p3168_p7 = scmp.lt.s32.totalorder %s3903_s25, %s3166_s18 }
 0xe32   : > { %2555 = vmatpush3.bf16.msra.mxu0 %v2904_v30  ;;  %p3169_p5 = scmp.lt.s32.totalorder %s3167_s24, %s3161_s11 }
 0xe33   : > { %2556 = vmatprep.subr.bf16.mxu0 %v2905_v31 }
 0xe34   : > { %p3170_p8 = por %p3169_p5, %p3168_p7 }
 0xe36   : > { %2557 = vmatpush3.bf16.msra.mxu0 %v2906_v32  ;;  %p3171_p3 = pnand %p3170_p8, %p3164_p0 }
 0xe37   : > { %2558 = vmatprep.subr.bf16.mxu0 %v2907_v33 }
 0xe3a   : > { %2559 = vmatpush3.bf16.msra.mxu0 %v2908_v36 }
 0xebc   : > { %v1818_v44 = vpop.xlane.xlu1 %1817 }
 0xebd   : > { %v1821_v47 = vmul.f32 0.0078125, %v1818_v44 }
 0xebe   : > { %v1820_v49 = vpop.xlane.xlu0 %1819 }
 0xebf   : > { %v1823_v50 = vsub.f32 %v3875_v35, %v1821_v47  ;;  %v1822_v51 = vmul.f32 0.0078125, %v1820_v49 }
 0xec1   : > { %v1824_v52 = vsub.f32 %v3878_v39, %v1822_v51  ;;  %v1825_v53 = vmul.f32 %v1823_v50, %v1823_v50 }
 0xec3   : > { %1827 = vadd.xlane.f32.xlu0 %v1825_v53  ;;  %v1826_v54 = vmul.f32 %v1824_v52, %v1824_v52 }
 0xec7   : > { %1829 = vadd.xlane.f32.xlu0 %v1826_v54 }
 0xf50   : > { %v1828_v8 = vpop.xlane.xlu0 %1827 }
 0xf51   : > { %v1831_v12 = vmul.f32 0.0078125, %v1828_v8 }
 0xf53   : > { %v1833_v26 = vadd.f32 1e-06, %v1831_v12 }
 0xf54   : > { %v1830_v11 = vpop.xlane.xlu0 %1829 }
 0xf55   : > { %2949 = vrsqrt.f32 %v1833_v26  ;;  %v1832_v13 = vmul.f32 0.0078125, %v1830_v11  ;;  %v2462_v26 = vld [vmem:[%s4032_s20] ss:$0 sm:$0xff] }
 0xf57   : > { %v1834_v14 = vadd.f32 1e-06, %v1832_v13 }
 0xf59   : > { %2951 = vrsqrt.f32 %v1834_v14 }
 0xf5f   : > { %v2950_v15 = vpop.eup %2949 }
 0xf60   : > { %v1837_v7 = vmul.f32 %v2950_v15, %v1823_v50 }
 0xf62   : > { %v1845_v17 = vmul.f32 %v2444_v9, %v1837_v7 }
 0xf63   : > { %v2952_v10 = vpop.eup %2951 }
 0xf64   : > { %v1838_v16 = vmul.f32 %v2952_v10, %v1824_v52  ;;  %v1853_v20 = vadd.f32 %v2445_v18, %v1845_v17 }
 0xf66   : > { %v1846_v19 = vmul.f32 %v2444_v9, %v1838_v16 }
 0xf68   : > { %v1854_v21 = vadd.f32 %v2445_v18, %v1846_v19 }
 0xf6a   : > { %v1855_v22 = vpack.c.bf16 %v1854_v21, %v1853_v20 }
 0xf6c   : > { %1997 = vmatmul.mubr.bf16.vlgmr.msra.gmra.mrb[36].mxu1 %v1855_v22 }
0x103f   : > { %v1998_v42 = vpop.f32.mrb[36].mxu1 }
0x1040   : > { %v1999_v43 = vadd.f32 %v1998_v42, %v1877_v40  ;;  %v2000_v44 = vpop.f32.mrb[37].mxu1 }
0x1041   : > { %v2001_v47 = vadd.f32 %v2000_v44, %v1881_v41  ;;  %v2002_v49 = vpop.f32.mrb[38].mxu1 }
0x1042   : > { %v2012_v50 = vmul.f32 0.70710677, %v1999_v43  ;;  %v2003_v51 = vadd.f32 %v2002_v49, %v1877_v40  ;;  %v2004_v52 = vpop.f32.mrb[39].mxu1  ;;  %v2007_v61 = vmul.f32 0.5, %v1999_v43 }
0x1043   : > { %v2013_v53 = vmul.f32 0.70710677, %v2001_v47  ;;  %v2005_v54 = vadd.f32 %v2004_v52, %v1881_v41  ;;  %v2008_v0 = vmul.f32 0.5, %v2001_v47 }
0x1044   : > { %2953 = verf.f32 %v2012_v50  ;;  %v2014_v55 = vmul.f32 0.70710677, %v2003_v51  ;;  %v2009_v62 = vmul.f32 0.5, %v2003_v51 }
0x1045   : > { %2955 = verf.f32 %v2013_v53  ;;  %v2015_v56 = vmul.f32 0.70710677, %v2005_v54  ;;  %v2010_v1 = vmul.f32 0.5, %v2005_v54 }
0x1046   : > { %2957 = verf.f32 %v2014_v55 }
0x1047   : > { %2959 = verf.f32 %v2015_v56 }
0x104e   : > { %v2954_v57 = vpop.eup %2953 }
0x104f   : > { %v2956_v45 = vpop.eup %2955  ;;  %v2020_v46 = vadd.f32 1.0, %v2954_v57 }
0x1050   : > { %v2958_v58 = vpop.eup %2957  ;;  %v2021_v59 = vadd.f32 1.0, %v2956_v45 }
0x1051   : > { %v2960_v60 = vpop.eup %2959  ;;  %v2022_v63 = vadd.f32 1.0, %v2958_v58  ;;  %v2024_v3 = vmul.f32 %v2020_v46, %v2007_v61 }
0x1052   : > { %v2023_v2 = vadd.f32 1.0, %v2960_v60  ;;  %v2025_v4 = vmul.f32 %v2021_v59, %v2008_v0 }
0x1053   : > { %v2026_v48 = vmul.f32 %v2022_v63, %v2009_v62 }
0x1054   : > { %v2027_v34 = vmul.f32 %v2023_v2, %v2010_v1 }
0x1055   : > { %v2028_v6 = vpack.c.bf16 %v2026_v48, %v2024_v3 }
0x1056   : > { %v2029_v8 = vpack.c.bf16 %v2027_v34, %v2025_v4 }
0x1058   : > { %2197 = vmatprep.mubr.bf16.mxu0 %v2029_v8 }
0x1059   : > { %2198 = vmatmul.mubr.bf16.vlgmr.msra.gmra.mrb[12].mxu0 %v2028_v6 }
0x112c   : > { %v2560_v12 = vpop.f32.mrb[12].mxu0 }
0x112d   : > { %v2561_v11 = vpop.f32.mrb[13].mxu0 }
0x112e   : > { %v2562_v13 = vadd.f32 %v2561_v11, %v2560_v12  ;;  %v2563_v14 = vpop.f32.mrb[14].mxu0 }
0x112f   : > { %v2564_v15 = vpop.f32.mrb[15].mxu0 }
0x1130   : > { %v2200_v7 = vadd.f32 %v2562_v13, %v2462_v26  ;;  %v2565_v9 = vadd.f32 %v2564_v15, %v2563_v14 }
0x1132   : > { %v2206_v10 = vadd.f32 %v2200_v7, %v3875_v35  ;;  %v2203_v16 = vadd.f32 %v2565_v9, %v2462_v26 }
0x1134   : > { %2208 = vst [vmem:[%s705_s17] sm:$0xff] %v2206_v10  ;;  %v2207_v17 = vadd.f32 %v2203_v16, %v3878_v39 }
0x1136   : > { %2209 = vst [vmem:[%s705_s17 + $0x8] sm:$0xff] %v2207_v17 }
0x1137   : > { %3174 = shalt.err (!%p3171_p3)
}
0x1138   : > { %s3175_s13 = scalar_lea.hbm %s3908_s2, 256  ;;  %s3179_s5 = scalar_lea.hbm %s4033_s8, 512 }
0x1139   : > { %p3176_p11 = scmp.ne.s32.totalorder %s3908_s2, %s3175_s13  ;;  %p3180_p1 = scmp.lt.u32.totalorder %s3908_s2, %s4033_s8 }
0x113a   : > { %p3181_p4 = scmp.lt.u32.totalorder %s3179_s5, %s3175_s13  ;;  %p3183_p9 = scmp.lt.u32.totalorder %s3175_s13, %s3908_s2 }
0x113b   : > { %p3177_p6 = pnand %p3176_p11, %p4034_p10 }
0x113c   : > { %p3182_p2 = por %p3181_p4, %p3180_p1 }
0x113d   : > { %p3178_p13 = pneg %p3177_p6 }
0x113e   : > { %p3184_p12 = por %p3183_p9, %p3182_p2 }
0x1140   : > { %p3185_p0 = pnand %p3184_p12, %p3178_p13 }
0x1142   : > { %3188 = shalt.err (!%p3185_p0)
}
0x1143   : > { %s3275_s11 = smov 128   ;;  %s3276_s21 = smov 8  }
0x1144   : > { %2728 = dma.vmem_to_hbm [thread:$0]  (%p4034_p10), %s3903_s25, 256, %s3908_s2, %s2211_s12, %s3275_s11, %s3275_s11, %s3276_s21  }
0x1145 PF: > { %s2241_s18 = sand.u32 1, %s3235_s27   ;;  %p4035_p7 = scmp.ne.s32.totalorder %s4017_s26, 0 }
0x1146   : > { %p4036_p5 = scmp.ge.s32.totalorder %s3255_s19, 2  ;;  %s2242_s24 = scalar_lea.sflag [#allocation7], %s2241_s18 }
0x1148   : > { %p2754_p8 = pnand %p4036_p5, %p4035_p7 }
0x114a   : > { %3230 = dma.done.wait (!%p2754_p8), %s2242_s24, 256  }
0x114b   : > { %3232 = vsyncadd (!%p2754_p8), %s2242_s24, 4294967040  ;;  %s37_s19 = sadd.s32 1, %s3255_s19   ;;  %s4037_s27 = smov %s3239_s28 }
0x114c   : > { %p34_p3 = scmp.ge.s32.totalorder %s37_s19, 4   ;;  %s4038_s28 = smov %s3243_s29 }
0x114d   : > { %s4039_s29 = smov %s3602_s22  ;;  %s4040_s30 = smov %s3251_s0 }
0x114e   : > { %s4041_s0 = smov %s4043_s23  ;;  %36 = sbr.rel (!%p34_p3) target bundleno = 23 (0x17), region = 169 }
0x1155   :  { %2247 = vsyncpa [#allocation6], 1 }
0x1156   :  { %2249 = vsyncpa [#allocation6 + $0x1], 1 }
0x1157   :  { %2250 = vsyncpa [#allocation9], 1 }
0x1158   :  { %2251 = vsyncpa [#allocation12], 1 }
0x1159   :  { %2252 = vsyncpa [#allocation15], 1 }
0x115a   :  { %2253 = vsyncpa [#allocation7], 1 }
0x115b   :  { %2255 = vsyncpa [#allocation7 + $0x1], 1 }

</bundles_post_ra>
